<compile_context>
chip_gen: v7x
topology: tpu7x:2x2x1
jax: 0.10.0
libtpu: 0.0.40
codegen_flags: <defaults>
</compile_context>

<pallas_src>
import functools

import jax
import jax.numpy as jnp
from jax.experimental import pallas as pl
from jax.experimental.pallas import tpu as pltpu


_ALIGN = 8  # sublane-aligned row offset at which each layer's data is stored


# ----------------------------------------------------------------------------
# Fused kernel: 4x (Conv1d + ReLU) -> mean pool -> 4-layer MLP -> sigmoid.
# One grid step == one batch tile of Bt samples.
# ----------------------------------------------------------------------------
def _fused_forward_kernel(
        x_ref,                                            # (Bt, T, C) f32
        cw1, cb1, cw2, cb2, cw3, cb3, cw4, cb4,           # conv weights/biases
        hw1, hb1, hw2, hb2, hw3, hb3, hw4, hb4,           # head weights/biases
        o_ref,                                            # (Bt, 1) output tile
        a1, a2, a3, a4,                                   # VMEM padded-act scratch
        *, conv_cfg, bt):
    """conv_cfg: static tuple of (kernel, stride, pad) per conv layer."""
    conv_scr = (a1, a2, a3, a4)
    conv_w = (cw1, cw2, cw3, cw4)
    conv_b = (cb1, cb2, cb3, cb4)

    # Zero only the pad rows that the shifted reads actually touch (the data
    # rows are fully overwritten for every sample before being read).
    for (_, _, pad), act_ref in zip(conv_cfg, conv_scr):
        if pad > 0:
            c_in = act_ref.shape[1]
            t_in = act_ref.shape[0] - 2 * _ALIGN
            zeros = jnp.zeros((pad, c_in), jnp.float32)
            act_ref[pl.ds(_ALIGN - pad, pad), :] = zeros
            act_ref[pl.ds(_ALIGN + t_in, pad), :] = zeros

    def conv_relu(act_ref, x_in, w_ref, b_ref, ksize, stride, pad):
        t_in = x_in.shape[0]
        t_out = (t_in + 2 * pad - ksize) // stride + 1
        base = _ALIGN - pad

        # Stage this sample's activation at a sublane-aligned offset.
        act_ref[pl.ds(_ALIGN, t_in), :] = x_in

        # Conv1d as K shifted, stride-folded matmuls:
        #   z[i, o] = sum_k A_pad[stride*i + base + k, :] @ W[k]
        # Each LHS is a strided sublane read, cast to bf16 for the MXU.
        z = None
        for k in range(ksize):
            if stride == 1:
                lhs = act_ref[pl.ds(base + k, t_out), :]
            else:
                lhs = act_ref[pl.ds(base + k, t_out, stride=stride), :]
            part = jnp.dot(lhs.astype(jnp.bfloat16), w_ref[k],
                           preferred_element_type=jnp.float32)
            z = part if z is None else z + part
        return jnp.maximum(z + b_ref[...], 0.0)           # f32 (t_out, O)

    # Per-sample conv stack (statically unrolled over the batch tile); each
    # sample's pooled feature row is collected for one batched head matmul.
    feats = []
    for b in range(bt):
        h = x_ref[b]                                      # (T, C) f32
        for (ksz, st, pd), act_ref, w_ref, b_ref in zip(
                conv_cfg, conv_scr, conv_w, conv_b):
            h = conv_relu(act_ref, h, w_ref, b_ref, ksz, st, pd)
        # Global average pool over time; the 1/T scale is folded into hw1.
        feats.append(jnp.sum(h, axis=0, keepdims=True))   # (1, 256)
    feat = jnp.concatenate(feats, axis=0)                 # (Bt, 256) f32

    # MLP head: bf16 operands, f32 accumulation / bias / ReLU / sigmoid.
    g = jnp.dot(feat.astype(jnp.bfloat16), hw1[...],
                preferred_element_type=jnp.float32) + hb1[...]
    g = jnp.maximum(g, 0.0)                               # (Bt, 128)
    g = jnp.dot(g.astype(jnp.bfloat16), hw2[...],
                preferred_element_type=jnp.float32) + hb2[...]
    g = jnp.maximum(g, 0.0)                               # (Bt, 64)
    g = jnp.dot(g.astype(jnp.bfloat16), hw3[...],
                preferred_element_type=jnp.float32) + hb3[...]
    g = jnp.maximum(g, 0.0)                               # (Bt, 32)
    y = jnp.dot(g.astype(jnp.bfloat16), hw4[...],
                preferred_element_type=jnp.float32) + hb4[...]
    o_ref[...] = jax.nn.sigmoid(y).astype(o_ref.dtype)    # (Bt, 1)


# ----------------------------------------------------------------------------
# Wrapper: one pallas_call for the full forward pass.
# ----------------------------------------------------------------------------
def nyst_classifier_forward(params, x, *, max_batch_tile=8):
    """x: (B, 8, 300) channels-first -> (B, 1) sigmoid probabilities."""
    B, C, T = x.shape
    conv_cfg = params["conv_cfg"]

    # Batch tile: Bt samples per grid step; pad B up to a multiple of Bt.
    # (For v7x, pick B so the number of grid steps is even — both TCs busy.)
    bt = min(max_batch_tile, B)
    n_blk = pl.cdiv(B, bt)
    b_pad = n_blk * bt

    # Single tiny transpose to GEMM-native (B, T, C); channels ride the
    # 128-lane axis for every conv matmul inside the kernel.
    x_btc = jnp.transpose(x, (0, 2, 1)).astype(jnp.float32)
    if b_pad != B:
        x_btc = jnp.pad(x_btc, ((0, b_pad - B), (0, 0), (0, 0)))

    # Static per-layer extents + padded-activation scratch shapes.
    scratch_shapes = []
    t = T
    for (_, c_in, k, s, p) in conv_cfg:
        scratch_shapes.append(pltpu.VMEM((t + 2 * _ALIGN, c_in), jnp.float32))
        t = (t + 2 * p - k) // s + 1
    t_pool = t                                             # final time extent (19)

    # Conv weights (O, C, K) -> (K, C, O) bf16 so W[k] is a lane-dense (C, O)
    # matrix for the MXU; biases stay f32 (1, O).
    args = [x_btc]
    for (w, b) in params["conv"]:
        args.append(jnp.transpose(w, (2, 1, 0)).astype(jnp.bfloat16))
        args.append(b.reshape(1, -1).astype(jnp.float32))
    # Head: fold the 1/T mean-pool scale into the first linear weight; weights
    # bf16, biases f32.
    (hw1, hb1), (hw2, hb2), (hw3, hb3), (hw4, hb4) = params["head"]
    args += [(hw1 * (1.0 / t_pool)).astype(jnp.bfloat16), hb1.reshape(1, -1),
             hw2.astype(jnp.bfloat16), hb2.reshape(1, -1),
             hw3.astype(jnp.bfloat16), hb3.reshape(1, -1),
             hw4.astype(jnp.bfloat16), hb4.reshape(1, -1)]

    def replicated(shape):
        return pl.BlockSpec(shape, lambda i: (0,) * len(shape))

    in_specs = [pl.BlockSpec((bt, T, C), lambda i: (i, 0, 0))]
    in_specs += [replicated(a.shape) for a in args[1:]]

    kernel = functools.partial(
        _fused_forward_kernel,
        conv_cfg=tuple((k, s, p) for (_, _, k, s, p) in conv_cfg),
        bt=bt)

    out = pl.pallas_call(
        kernel,
        out_shape=jax.ShapeDtypeStruct((n_blk, bt, 1), jnp.float32),
        grid=(n_blk,),
        in_specs=in_specs,
        out_specs=pl.BlockSpec((None, bt, 1), lambda i: (i, 0, 0)),
        scratch_shapes=scratch_shapes,
        compiler_params=pltpu.CompilerParams(
            dimension_semantics=("parallel",)),
    )(*args)
    return out.reshape(b_pad, 1)[:B]


# ----------------------------------------------------------------------------
# Parameter construction (deterministic, PyTorch-style uniform init)
# ----------------------------------------------------------------------------
def _uniform(key, shape, fan_in):
    bound = 1.0 / jnp.sqrt(jnp.float32(fan_in))
    return jax.random.uniform(key, shape, jnp.float32, -bound, bound)


def init_params(key):
    nf = 64
    num_channels = 8
    # (out_ch, in_ch, kernel, stride, padding)
    conv_cfg = [
        (nf,     num_channels, 7, 2, 3),   # 300 -> 150
        (nf,     nf,           5, 2, 2),   # 150 -> 75
        (2 * nf, nf,           5, 2, 2),   # 75  -> 38
        (4 * nf, 2 * nf,       3, 2, 1),   # 38  -> 19   (4*nf = 256 feats)
    ]
    params = {"conv": [], "conv_cfg": conv_cfg, "head": []}
    keys = jax.random.split(key, 2 * len(conv_cfg) + 8)
    ki = 0
    for (o, c, k, _, _) in conv_cfg:
        w = _uniform(keys[ki], (o, c, k), c * k); ki += 1
        b = _uniform(keys[ki], (o,), c * k);      ki += 1
        params["conv"].append((w, b))
    head_dims = [(256, 128), (128, 64), (64, 32), (32, 1)]
    for (fin, fout) in head_dims:
        w = _uniform(keys[ki], (fin, fout), fin); ki += 1
        b = _uniform(keys[ki], (fout,), fin);     ki += 1
        params["head"].append((w, b))
    return params


if __name__ == "__main__":
    key = jax.random.PRNGKey(0)
    pkey, xkey = jax.random.split(key)
    params = init_params(pkey)

    # Module-consistent input: batch=2, channels=8, time=300.
    x = jax.random.normal(xkey, (2, 8, 300), dtype=jnp.float32)

    fwd = jax.jit(functools.partial(nyst_classifier_forward, params))
    out = jax.block_until_ready(fwd(x))

    assert out.shape == (2, 1)
    assert bool(jnp.all(jnp.isfinite(out)))
    assert bool(jnp.all((out >= 0.0) & (out <= 1.0)))
    print("KERNEL_OK")
</pallas_src>

<mosaic_0001>
module attributes {stable_mosaic.version = 11 : i64} {
  func.func @_fused_forward_kernel(%arg0: i32, %arg1: memref<2x300x8xf32, #tpu.memory_space<vmem>>, %arg2: memref<7x8x64xbf16, #tpu.memory_space<vmem>>, %arg3: memref<1x64xf32, #tpu.memory_space<vmem>>, %arg4: memref<5x64x64xbf16, #tpu.memory_space<vmem>>, %arg5: memref<1x64xf32, #tpu.memory_space<vmem>>, %arg6: memref<5x64x128xbf16, #tpu.memory_space<vmem>>, %arg7: memref<1x128xf32, #tpu.memory_space<vmem>>, %arg8: memref<3x128x256xbf16, #tpu.memory_space<vmem>>, %arg9: memref<1x256xf32, #tpu.memory_space<vmem>>, %arg10: memref<256x128xbf16, #tpu.memory_space<vmem>>, %arg11: memref<1x128xf32, #tpu.memory_space<vmem>>, %arg12: memref<128x64xbf16, #tpu.memory_space<vmem>>, %arg13: memref<1x64xf32, #tpu.memory_space<vmem>>, %arg14: memref<64x32xbf16, #tpu.memory_space<vmem>>, %arg15: memref<1x32xf32, #tpu.memory_space<vmem>>, %arg16: memref<32x1xbf16, #tpu.memory_space<vmem>>, %arg17: memref<1x1xf32, #tpu.memory_space<vmem>>, %arg18: memref<1x2x1xf32, #tpu.memory_space<vmem>>, %arg19: memref<316x8xf32, #tpu.memory_space<vmem>>, %arg20: memref<166x64xf32, #tpu.memory_space<vmem>>, %arg21: memref<91x64xf32, #tpu.memory_space<vmem>>, %arg22: memref<54x128xf32, #tpu.memory_space<vmem>>) attributes {dimension_semantics = [#tpu.dimension_semantics<parallel>], iteration_bounds = array<i64: 1>, scalar_prefetch = 0 : i64, scratch_operands = 4 : i64, tpu.core_type = #tpu.core_type<tc>, window_params = [{transform_indices = @transform_0, window_bounds = array<i64: 2, 300, 8>}, {pipeline_mode = #tpu.pipeline_mode<synchronous>, transform_indices = @transform_1, window_bounds = array<i64: 7, 8, 64>}, {pipeline_mode = #tpu.pipeline_mode<synchronous>, transform_indices = @transform_2, window_bounds = array<i64: 1, 64>}, {pipeline_mode = #tpu.pipeline_mode<synchronous>, transform_indices = @transform_3, window_bounds = array<i64: 5, 64, 64>}, {pipeline_mode = #tpu.pipeline_mode<synchronous>, transform_indices = @transform_4, window_bounds = array<i64: 1, 64>}, {pipeline_mode = #tpu.pipeline_mode<synchronous>, transform_indices = @transform_5, window_bounds = array<i64: 5, 64, 128>}, {pipeline_mode = #tpu.pipeline_mode<synchronous>, transform_indices = @transform_6, window_bounds = array<i64: 1, 128>}, {pipeline_mode = #tpu.pipeline_mode<synchronous>, transform_indices = @transform_7, window_bounds = array<i64: 3, 128, 256>}, {pipeline_mode = #tpu.pipeline_mode<synchronous>, transform_indices = @transform_8, window_bounds = array<i64: 1, 256>}, {pipeline_mode = #tpu.pipeline_mode<synchronous>, transform_indices = @transform_9, window_bounds = array<i64: 256, 128>}, {pipeline_mode = #tpu.pipeline_mode<synchronous>, transform_indices = @transform_10, window_bounds = array<i64: 1, 128>}, {pipeline_mode = #tpu.pipeline_mode<synchronous>, transform_indices = @transform_11, window_bounds = array<i64: 128, 64>}, {pipeline_mode = #tpu.pipeline_mode<synchronous>, transform_indices = @transform_12, window_bounds = array<i64: 1, 64>}, {pipeline_mode = #tpu.pipeline_mode<synchronous>, transform_indices = @transform_13, window_bounds = array<i64: 64, 32>}, {pipeline_mode = #tpu.pipeline_mode<synchronous>, transform_indices = @transform_14, window_bounds = array<i64: 1, 32>}, {pipeline_mode = #tpu.pipeline_mode<synchronous>, transform_indices = @transform_15, window_bounds = array<i64: 32, 1>}, {pipeline_mode = #tpu.pipeline_mode<synchronous>, transform_indices = @transform_16, window_bounds = array<i64: 1, 1>}, {transform_indices = @transform_17, window_bounds = array<i64: 1, 2, 1>}]} {
    %cst = arith.constant 0.000000e+00 : f32
    %0 = vector.broadcast %cst : f32 to vector<3x8xf32>
    %c5 = arith.constant 5 : index
    %c0 = arith.constant 0 : index
    %1 = vector.load %arg19[%c5, %c0] : memref<316x8xf32, #tpu.memory_space<vmem>>, vector<3x8xf32>
    tpu.vector_store %arg19[%c5, %c0], %0 {strides = array<i32>} : memref<316x8xf32, #tpu.memory_space<vmem>>, vector<3x8xf32>,
    %c308 = arith.constant 308 : index
    %c0_0 = arith.constant 0 : index
    %2 = vector.load %arg19[%c308, %c0_0] : memref<316x8xf32, #tpu.memory_space<vmem>>, vector<3x8xf32>
    tpu.vector_store %arg19[%c308, %c0_0], %0 {strides = array<i32>} : memref<316x8xf32, #tpu.memory_space<vmem>>, vector<3x8xf32>,
    %cst_1 = arith.constant 0.000000e+00 : f32
    %3 = vector.broadcast %cst_1 : f32 to vector<2x64xf32>
    %c6 = arith.constant 6 : index
    %c0_2 = arith.constant 0 : index
    %4 = vector.load %arg20[%c6, %c0_2] : memref<166x64xf32, #tpu.memory_space<vmem>>, vector<2x64xf32>
    tpu.vector_store %arg20[%c6, %c0_2], %3 {strides = array<i32>} : memref<166x64xf32, #tpu.memory_space<vmem>>, vector<2x64xf32>,
    %c158 = arith.constant 158 : index
    %c0_3 = arith.constant 0 : index
    %5 = vector.load %arg20[%c158, %c0_3] : memref<166x64xf32, #tpu.memory_space<vmem>>, vector<2x64xf32>
    tpu.vector_store %arg20[%c158, %c0_3], %3 {strides = array<i32>} : memref<166x64xf32, #tpu.memory_space<vmem>>, vector<2x64xf32>,
    %cst_4 = arith.constant 0.000000e+00 : f32
    %6 = vector.broadcast %cst_4 : f32 to vector<2x64xf32>
    %c6_5 = arith.constant 6 : index
    %c0_6 = arith.constant 0 : index
    %7 = vector.load %arg21[%c6_5, %c0_6] : memref<91x64xf32, #tpu.memory_space<vmem>>, vector<2x64xf32>
    tpu.vector_store %arg21[%c6_5, %c0_6], %6 {strides = array<i32>} : memref<91x64xf32, #tpu.memory_space<vmem>>, vector<2x64xf32>,
    %c83 = arith.constant 83 : index
    %c0_7 = arith.constant 0 : index
    %8 = vector.load %arg21[%c83, %c0_7] : memref<91x64xf32, #tpu.memory_space<vmem>>, vector<2x64xf32>
    tpu.vector_store %arg21[%c83, %c0_7], %6 {strides = array<i32>} : memref<91x64xf32, #tpu.memory_space<vmem>>, vector<2x64xf32>,
    %cst_8 = arith.constant 0.000000e+00 : f32
    %9 = vector.broadcast %cst_8 : f32 to vector<1x128xf32>
    %c7 = arith.constant 7 : index
    %c0_9 = arith.constant 0 : index
    %10 = vector.load %arg22[%c7, %c0_9] : memref<54x128xf32, #tpu.memory_space<vmem>>, vector<1x128xf32>
    tpu.vector_store %arg22[%c7, %c0_9], %9 {strides = array<i32>} : memref<54x128xf32, #tpu.memory_space<vmem>>, vector<1x128xf32>,
    %c46 = arith.constant 46 : index
    %c0_10 = arith.constant 0 : index
    %11 = vector.load %arg22[%c46, %c0_10] : memref<54x128xf32, #tpu.memory_space<vmem>>, vector<1x128xf32>
    tpu.vector_store %arg22[%c46, %c0_10], %9 {strides = array<i32>} : memref<54x128xf32, #tpu.memory_space<vmem>>, vector<1x128xf32>,
    %c0_11 = arith.constant 0 : index
    %c0_12 = arith.constant 0 : index
    %c0_13 = arith.constant 0 : index
    %12 = vector.load %arg1[%c0_11, %c0_12, %c0_13] : memref<2x300x8xf32, #tpu.memory_space<vmem>>, vector<1x300x8xf32>
    %13 = vector.shape_cast %12 : vector<1x300x8xf32> to vector<300x8xf32>
    %c8 = arith.constant 8 : index
    %c0_14 = arith.constant 0 : index
    %14 = vector.load %arg19[%c8, %c0_14] : memref<316x8xf32, #tpu.memory_space<vmem>>, vector<300x8xf32>
    tpu.vector_store %arg19[%c8, %c0_14], %13 {strides = array<i32>} : memref<316x8xf32, #tpu.memory_space<vmem>>, vector<300x8xf32>,
    %c5_15 = arith.constant 5 : index
    %c0_16 = arith.constant 0 : index
    %15 = tpu.strided_load %arg19[%c5_15, %c0_16] {strides = array<i32: 2, 1>} : memref<316x8xf32, #tpu.memory_space<vmem>>, vector<150x8xf32>
    %16 = arith.truncf %15 : vector<150x8xf32> to vector<150x8xbf16>
    %c0_17 = arith.constant 0 : index
    %c0_18 = arith.constant 0 : index
    %c0_19 = arith.constant 0 : index
    %17 = vector.load %arg2[%c0_17, %c0_18, %c0_19] : memref<7x8x64xbf16, #tpu.memory_space<vmem>>, vector<1x8x64xbf16>
    %18 = vector.shape_cast %17 : vector<1x8x64xbf16> to vector<8x64xbf16>
    %cst_20 = arith.constant dense<0.000000e+00> : vector<150x64xf32>
    %19 = tpu.matmul %16, %18, %cst_20 {dimension_numbers = #tpu.dot_dimension_numbers<[1], [0], [0], [1], [0, 0, 1, 1], [], []>} : vector<150x8xbf16>, vector<8x64xbf16>, vector<150x64xf32> -> vector<150x64xf32>
    %c6_21 = arith.constant 6 : index
    %c0_22 = arith.constant 0 : index
    %20 = tpu.strided_load %arg19[%c6_21, %c0_22] {strides = array<i32: 2, 1>} : memref<316x8xf32, #tpu.memory_space<vmem>>, vector<150x8xf32>
    %21 = arith.truncf %20 : vector<150x8xf32> to vector<150x8xbf16>
    %c1 = arith.constant 1 : index
    %c0_23 = arith.constant 0 : index
    %c0_24 = arith.constant 0 : index
    %22 = vector.load %arg2[%c1, %c0_23, %c0_24] : memref<7x8x64xbf16, #tpu.memory_space<vmem>>, vector<1x8x64xbf16>
    %23 = vector.shape_cast %22 : vector<1x8x64xbf16> to vector<8x64xbf16>
    %cst_25 = arith.constant dense<0.000000e+00> : vector<150x64xf32>
    %24 = tpu.matmul %21, %23, %cst_25 {dimension_numbers = #tpu.dot_dimension_numbers<[1], [0], [0], [1], [0, 0, 1, 1], [], []>} : vector<150x8xbf16>, vector<8x64xbf16>, vector<150x64xf32> -> vector<150x64xf32>
    %25 = arith.addf %19, %24 : vector<150x64xf32>
    %c7_26 = arith.constant 7 : index
    %c0_27 = arith.constant 0 : index
    %26 = tpu.strided_load %arg19[%c7_26, %c0_27] {strides = array<i32: 2, 1>} : memref<316x8xf32, #tpu.memory_space<vmem>>, vector<150x8xf32>
    %27 = arith.truncf %26 : vector<150x8xf32> to vector<150x8xbf16>
    %c2 = arith.constant 2 : index
    %c0_28 = arith.constant 0 : index
    %c0_29 = arith.constant 0 : index
    %28 = vector.load %arg2[%c2, %c0_28, %c0_29] : memref<7x8x64xbf16, #tpu.memory_space<vmem>>, vector<1x8x64xbf16>
    %29 = vector.shape_cast %28 : vector<1x8x64xbf16> to vector<8x64xbf16>
    %cst_30 = arith.constant dense<0.000000e+00> : vector<150x64xf32>
    %30 = tpu.matmul %27, %29, %cst_30 {dimension_numbers = #tpu.dot_dimension_numbers<[1], [0], [0], [1], [0, 0, 1, 1], [], []>} : vector<150x8xbf16>, vector<8x64xbf16>, vector<150x64xf32> -> vector<150x64xf32>
    %31 = arith.addf %25, %30 : vector<150x64xf32>
    %c8_31 = arith.constant 8 : index
    %c0_32 = arith.constant 0 : index
    %32 = tpu.strided_load %arg19[%c8_31, %c0_32] {strides = array<i32: 2, 1>} : memref<316x8xf32, #tpu.memory_space<vmem>>, vector<150x8xf32>
    %33 = arith.truncf %32 : vector<150x8xf32> to vector<150x8xbf16>
    %c3 = arith.constant 3 : index
    %c0_33 = arith.constant 0 : index
    %c0_34 = arith.constant 0 : index
    %34 = vector.load %arg2[%c3, %c0_33, %c0_34] : memref<7x8x64xbf16, #tpu.memory_space<vmem>>, vector<1x8x64xbf16>
    %35 = vector.shape_cast %34 : vector<1x8x64xbf16> to vector<8x64xbf16>
    %cst_35 = arith.constant dense<0.000000e+00> : vector<150x64xf32>
    %36 = tpu.matmul %33, %35, %cst_35 {dimension_numbers = #tpu.dot_dimension_numbers<[1], [0], [0], [1], [0, 0, 1, 1], [], []>} : vector<150x8xbf16>, vector<8x64xbf16>, vector<150x64xf32> -> vector<150x64xf32>
    %37 = arith.addf %31, %36 : vector<150x64xf32>
    %c9 = arith.constant 9 : index
    %c0_36 = arith.constant 0 : index
    %38 = tpu.strided_load %arg19[%c9, %c0_36] {strides = array<i32: 2, 1>} : memref<316x8xf32, #tpu.memory_space<vmem>>, vector<150x8xf32>
    %39 = arith.truncf %38 : vector<150x8xf32> to vector<150x8xbf16>
    %c4 = arith.constant 4 : index
    %c0_37 = arith.constant 0 : index
    %c0_38 = arith.constant 0 : index
    %40 = vector.load %arg2[%c4, %c0_37, %c0_38] : memref<7x8x64xbf16, #tpu.memory_space<vmem>>, vector<1x8x64xbf16>
    %41 = vector.shape_cast %40 : vector<1x8x64xbf16> to vector<8x64xbf16>
    %cst_39 = arith.constant dense<0.000000e+00> : vector<150x64xf32>
    %42 = tpu.matmul %39, %41, %cst_39 {dimension_numbers = #tpu.dot_dimension_numbers<[1], [0], [0], [1], [0, 0, 1, 1], [], []>} : vector<150x8xbf16>, vector<8x64xbf16>, vector<150x64xf32> -> vector<150x64xf32>
    %43 = arith.addf %37, %42 : vector<150x64xf32>
    %c10 = arith.constant 10 : index
    %c0_40 = arith.constant 0 : index
    %44 = tpu.strided_load %arg19[%c10, %c0_40] {strides = array<i32: 2, 1>} : memref<316x8xf32, #tpu.memory_space<vmem>>, vector<150x8xf32>
    %45 = arith.truncf %44 : vector<150x8xf32> to vector<150x8xbf16>
    %c5_41 = arith.constant 5 : index
    %c0_42 = arith.constant 0 : index
    %c0_43 = arith.constant 0 : index
    %46 = vector.load %arg2[%c5_41, %c0_42, %c0_43] : memref<7x8x64xbf16, #tpu.memory_space<vmem>>, vector<1x8x64xbf16>
    %47 = vector.shape_cast %46 : vector<1x8x64xbf16> to vector<8x64xbf16>
    %cst_44 = arith.constant dense<0.000000e+00> : vector<150x64xf32>
    %48 = tpu.matmul %45, %47, %cst_44 {dimension_numbers = #tpu.dot_dimension_numbers<[1], [0], [0], [1], [0, 0, 1, 1], [], []>} : vector<150x8xbf16>, vector<8x64xbf16>, vector<150x64xf32> -> vector<150x64xf32>
    %49 = arith.addf %43, %48 : vector<150x64xf32>
    %c11 = arith.constant 11 : index
    %c0_45 = arith.constant 0 : index
    %50 = tpu.strided_load %arg19[%c11, %c0_45] {strides = array<i32: 2, 1>} : memref<316x8xf32, #tpu.memory_space<vmem>>, vector<150x8xf32>
    %51 = arith.truncf %50 : vector<150x8xf32> to vector<150x8xbf16>
    %c6_46 = arith.constant 6 : index
    %c0_47 = arith.constant 0 : index
    %c0_48 = arith.constant 0 : index
    %52 = vector.load %arg2[%c6_46, %c0_47, %c0_48] : memref<7x8x64xbf16, #tpu.memory_space<vmem>>, vector<1x8x64xbf16>
    %53 = vector.shape_cast %52 : vector<1x8x64xbf16> to vector<8x64xbf16>
    %cst_49 = arith.constant dense<0.000000e+00> : vector<150x64xf32>
    %54 = tpu.matmul %51, %53, %cst_49 {dimension_numbers = #tpu.dot_dimension_numbers<[1], [0], [0], [1], [0, 0, 1, 1], [], []>} : vector<150x8xbf16>, vector<8x64xbf16>, vector<150x64xf32> -> vector<150x64xf32>
    %55 = arith.addf %49, %54 : vector<150x64xf32>
    %c0_50 = arith.constant 0 : index
    %c0_51 = arith.constant 0 : index
    %56 = vector.load %arg3[%c0_50, %c0_51] : memref<1x64xf32, #tpu.memory_space<vmem>>, vector<1x64xf32>
    %57 = vector.broadcast %56 : vector<1x64xf32> to vector<150x64xf32>
    %58 = arith.addf %55, %57 : vector<150x64xf32>
    %cst_52 = arith.constant 0.000000e+00 : f32
    %59 = vector.broadcast %cst_52 : f32 to vector<150x64xf32>
    %60 = arith.maximumf %58, %59 : vector<150x64xf32>
    %c8_53 = arith.constant 8 : index
    %c0_54 = arith.constant 0 : index
    %61 = vector.load %arg20[%c8_53, %c0_54] : memref<166x64xf32, #tpu.memory_space<vmem>>, vector<150x64xf32>
    tpu.vector_store %arg20[%c8_53, %c0_54], %60 {strides = array<i32>} : memref<166x64xf32, #tpu.memory_space<vmem>>, vector<150x64xf32>,
    %c6_55 = arith.constant 6 : index
    %c0_56 = arith.constant 0 : index
    %62 = tpu.strided_load %arg20[%c6_55, %c0_56] {strides = array<i32: 2, 1>} : memref<166x64xf32, #tpu.memory_space<vmem>>, vector<75x64xf32>
    %63 = arith.truncf %62 : vector<75x64xf32> to vector<75x64xbf16>
    %c0_57 = arith.constant 0 : index
    %c0_58 = arith.constant 0 : index
    %c0_59 = arith.constant 0 : index
    %64 = vector.load %arg4[%c0_57, %c0_58, %c0_59] : memref<5x64x64xbf16, #tpu.memory_space<vmem>>, vector<1x64x64xbf16>
    %65 = vector.shape_cast %64 : vector<1x64x64xbf16> to vector<64x64xbf16>
    %cst_60 = arith.constant dense<0.000000e+00> : vector<75x64xf32>
    %66 = tpu.matmul %63, %65, %cst_60 {dimension_numbers = #tpu.dot_dimension_numbers<[1], [0], [0], [1], [0, 0, 1, 1], [], []>} : vector<75x64xbf16>, vector<64x64xbf16>, vector<75x64xf32> -> vector<75x64xf32>
    %c7_61 = arith.constant 7 : index
    %c0_62 = arith.constant 0 : index
    %67 = tpu.strided_load %arg20[%c7_61, %c0_62] {strides = array<i32: 2, 1>} : memref<166x64xf32, #tpu.memory_space<vmem>>, vector<75x64xf32>
    %68 = arith.truncf %67 : vector<75x64xf32> to vector<75x64xbf16>
    %c1_63 = arith.constant 1 : index
    %c0_64 = arith.constant 0 : index
    %c0_65 = arith.constant 0 : index
    %69 = vector.load %arg4[%c1_63, %c0_64, %c0_65] : memref<5x64x64xbf16, #tpu.memory_space<vmem>>, vector<1x64x64xbf16>
    %70 = vector.shape_cast %69 : vector<1x64x64xbf16> to vector<64x64xbf16>
    %cst_66 = arith.constant dense<0.000000e+00> : vector<75x64xf32>
    %71 = tpu.matmul %68, %70, %cst_66 {dimension_numbers = #tpu.dot_dimension_numbers<[1], [0], [0], [1], [0, 0, 1, 1], [], []>} : vector<75x64xbf16>, vector<64x64xbf16>, vector<75x64xf32> -> vector<75x64xf32>
    %72 = arith.addf %66, %71 : vector<75x64xf32>
    %c8_67 = arith.constant 8 : index
    %c0_68 = arith.constant 0 : index
    %73 = tpu.strided_load %arg20[%c8_67, %c0_68] {strides = array<i32: 2, 1>} : memref<166x64xf32, #tpu.memory_space<vmem>>, vector<75x64xf32>
    %74 = arith.truncf %73 : vector<75x64xf32> to vector<75x64xbf16>
    %c2_69 = arith.constant 2 : index
    %c0_70 = arith.constant 0 : index
    %c0_71 = arith.constant 0 : index
    %75 = vector.load %arg4[%c2_69, %c0_70, %c0_71] : memref<5x64x64xbf16, #tpu.memory_space<vmem>>, vector<1x64x64xbf16>
    %76 = vector.shape_cast %75 : vector<1x64x64xbf16> to vector<64x64xbf16>
    %cst_72 = arith.constant dense<0.000000e+00> : vector<75x64xf32>
    %77 = tpu.matmul %74, %76, %cst_72 {dimension_numbers = #tpu.dot_dimension_numbers<[1], [0], [0], [1], [0, 0, 1, 1], [], []>} : vector<75x64xbf16>, vector<64x64xbf16>, vector<75x64xf32> -> vector<75x64xf32>
    %78 = arith.addf %72, %77 : vector<75x64xf32>
    %c9_73 = arith.constant 9 : index
    %c0_74 = arith.constant 0 : index
    %79 = tpu.strided_load %arg20[%c9_73, %c0_74] {strides = array<i32: 2, 1>} : memref<166x64xf32, #tpu.memory_space<vmem>>, vector<75x64xf32>
    %80 = arith.truncf %79 : vector<75x64xf32> to vector<75x64xbf16>
    %c3_75 = arith.constant 3 : index
    %c0_76 = arith.constant 0 : index
    %c0_77 = arith.constant 0 : index
    %81 = vector.load %arg4[%c3_75, %c0_76, %c0_77] : memref<5x64x64xbf16, #tpu.memory_space<vmem>>, vector<1x64x64xbf16>
    %82 = vector.shape_cast %81 : vector<1x64x64xbf16> to vector<64x64xbf16>
    %cst_78 = arith.constant dense<0.000000e+00> : vector<75x64xf32>
    %83 = tpu.matmul %80, %82, %cst_78 {dimension_numbers = #tpu.dot_dimension_numbers<[1], [0], [0], [1], [0, 0, 1, 1], [], []>} : vector<75x64xbf16>, vector<64x64xbf16>, vector<75x64xf32> -> vector<75x64xf32>
    %84 = arith.addf %78, %83 : vector<75x64xf32>
    %c10_79 = arith.constant 10 : index
    %c0_80 = arith.constant 0 : index
    %85 = tpu.strided_load %arg20[%c10_79, %c0_80] {strides = array<i32: 2, 1>} : memref<166x64xf32, #tpu.memory_space<vmem>>, vector<75x64xf32>
    %86 = arith.truncf %85 : vector<75x64xf32> to vector<75x64xbf16>
    %c4_81 = arith.constant 4 : index
    %c0_82 = arith.constant 0 : index
    %c0_83 = arith.constant 0 : index
    %87 = vector.load %arg4[%c4_81, %c0_82, %c0_83] : memref<5x64x64xbf16, #tpu.memory_space<vmem>>, vector<1x64x64xbf16>
    %88 = vector.shape_cast %87 : vector<1x64x64xbf16> to vector<64x64xbf16>
    %cst_84 = arith.constant dense<0.000000e+00> : vector<75x64xf32>
    %89 = tpu.matmul %86, %88, %cst_84 {dimension_numbers = #tpu.dot_dimension_numbers<[1], [0], [0], [1], [0, 0, 1, 1], [], []>} : vector<75x64xbf16>, vector<64x64xbf16>, vector<75x64xf32> -> vector<75x64xf32>
    %90 = arith.addf %84, %89 : vector<75x64xf32>
    %c0_85 = arith.constant 0 : index
    %c0_86 = arith.constant 0 : index
    %91 = vector.load %arg5[%c0_85, %c0_86] : memref<1x64xf32, #tpu.memory_space<vmem>>, vector<1x64xf32>
    %92 = vector.broadcast %91 : vector<1x64xf32> to vector<75x64xf32>
    %93 = arith.addf %90, %92 : vector<75x64xf32>
    %cst_87 = arith.constant 0.000000e+00 : f32
    %94 = vector.broadcast %cst_87 : f32 to vector<75x64xf32>
    %95 = arith.maximumf %93, %94 : vector<75x64xf32>
    %c8_88 = arith.constant 8 : index
    %c0_89 = arith.constant 0 : index
    %96 = vector.load %arg21[%c8_88, %c0_89] : memref<91x64xf32, #tpu.memory_space<vmem>>, vector<75x64xf32>
    tpu.vector_store %arg21[%c8_88, %c0_89], %95 {strides = array<i32>} : memref<91x64xf32, #tpu.memory_space<vmem>>, vector<75x64xf32>,
    %c6_90 = arith.constant 6 : index
    %c0_91 = arith.constant 0 : index
    %97 = tpu.strided_load %arg21[%c6_90, %c0_91] {strides = array<i32: 2, 1>} : memref<91x64xf32, #tpu.memory_space<vmem>>, vector<38x64xf32>
    %98 = arith.truncf %97 : vector<38x64xf32> to vector<38x64xbf16>
    %c0_92 = arith.constant 0 : index
    %c0_93 = arith.constant 0 : index
    %c0_94 = arith.constant 0 : index
    %99 = vector.load %arg6[%c0_92, %c0_93, %c0_94] : memref<5x64x128xbf16, #tpu.memory_space<vmem>>, vector<1x64x128xbf16>
    %100 = vector.shape_cast %99 : vector<1x64x128xbf16> to vector<64x128xbf16>
    %cst_95 = arith.constant dense<0.000000e+00> : vector<38x128xf32>
    %101 = tpu.matmul %98, %100, %cst_95 {dimension_numbers = #tpu.dot_dimension_numbers<[1], [0], [0], [1], [0, 0, 1, 1], [], []>} : vector<38x64xbf16>, vector<64x128xbf16>, vector<38x128xf32> -> vector<38x128xf32>
    %c7_96 = arith.constant 7 : index
    %c0_97 = arith.constant 0 : index
    %102 = tpu.strided_load %arg21[%c7_96, %c0_97] {strides = array<i32: 2, 1>} : memref<91x64xf32, #tpu.memory_space<vmem>>, vector<38x64xf32>
    %103 = arith.truncf %102 : vector<38x64xf32> to vector<38x64xbf16>
    %c1_98 = arith.constant 1 : index
    %c0_99 = arith.constant 0 : index
    %c0_100 = arith.constant 0 : index
    %104 = vector.load %arg6[%c1_98, %c0_99, %c0_100] : memref<5x64x128xbf16, #tpu.memory_space<vmem>>, vector<1x64x128xbf16>
    %105 = vector.shape_cast %104 : vector<1x64x128xbf16> to vector<64x128xbf16>
    %cst_101 = arith.constant dense<0.000000e+00> : vector<38x128xf32>
    %106 = tpu.matmul %103, %105, %cst_101 {dimension_numbers = #tpu.dot_dimension_numbers<[1], [0], [0], [1], [0, 0, 1, 1], [], []>} : vector<38x64xbf16>, vector<64x128xbf16>, vector<38x128xf32> -> vector<38x128xf32>
    %107 = arith.addf %101, %106 : vector<38x128xf32>
    %c8_102 = arith.constant 8 : index
    %c0_103 = arith.constant 0 : index
    %108 = tpu.strided_load %arg21[%c8_102, %c0_103] {strides = array<i32: 2, 1>} : memref<91x64xf32, #tpu.memory_space<vmem>>, vector<38x64xf32>
    %109 = arith.truncf %108 : vector<38x64xf32> to vector<38x64xbf16>
    %c2_104 = arith.constant 2 : index
    %c0_105 = arith.constant 0 : index
    %c0_106 = arith.constant 0 : index
    %110 = vector.load %arg6[%c2_104, %c0_105, %c0_106] : memref<5x64x128xbf16, #tpu.memory_space<vmem>>, vector<1x64x128xbf16>
    %111 = vector.shape_cast %110 : vector<1x64x128xbf16> to vector<64x128xbf16>
    %cst_107 = arith.constant dense<0.000000e+00> : vector<38x128xf32>
    %112 = tpu.matmul %109, %111, %cst_107 {dimension_numbers = #tpu.dot_dimension_numbers<[1], [0], [0], [1], [0, 0, 1, 1], [], []>} : vector<38x64xbf16>, vector<64x128xbf16>, vector<38x128xf32> -> vector<38x128xf32>
    %113 = arith.addf %107, %112 : vector<38x128xf32>
    %c9_108 = arith.constant 9 : index
    %c0_109 = arith.constant 0 : index
    %114 = tpu.strided_load %arg21[%c9_108, %c0_109] {strides = array<i32: 2, 1>} : memref<91x64xf32, #tpu.memory_space<vmem>>, vector<38x64xf32>
    %115 = arith.truncf %114 : vector<38x64xf32> to vector<38x64xbf16>
    %c3_110 = arith.constant 3 : index
    %c0_111 = arith.constant 0 : index
    %c0_112 = arith.constant 0 : index
    %116 = vector.load %arg6[%c3_110, %c0_111, %c0_112] : memref<5x64x128xbf16, #tpu.memory_space<vmem>>, vector<1x64x128xbf16>
    %117 = vector.shape_cast %116 : vector<1x64x128xbf16> to vector<64x128xbf16>
    %cst_113 = arith.constant dense<0.000000e+00> : vector<38x128xf32>
    %118 = tpu.matmul %115, %117, %cst_113 {dimension_numbers = #tpu.dot_dimension_numbers<[1], [0], [0], [1], [0, 0, 1, 1], [], []>} : vector<38x64xbf16>, vector<64x128xbf16>, vector<38x128xf32> -> vector<38x128xf32>
    %119 = arith.addf %113, %118 : vector<38x128xf32>
    %c10_114 = arith.constant 10 : index
    %c0_115 = arith.constant 0 : index
    %120 = tpu.strided_load %arg21[%c10_114, %c0_115] {strides = array<i32: 2, 1>} : memref<91x64xf32, #tpu.memory_space<vmem>>, vector<38x64xf32>
    %121 = arith.truncf %120 : vector<38x64xf32> to vector<38x64xbf16>
    %c4_116 = arith.constant 4 : index
    %c0_117 = arith.constant 0 : index
    %c0_118 = arith.constant 0 : index
    %122 = vector.load %arg6[%c4_116, %c0_117, %c0_118] : memref<5x64x128xbf16, #tpu.memory_space<vmem>>, vector<1x64x128xbf16>
    %123 = vector.shape_cast %122 : vector<1x64x128xbf16> to vector<64x128xbf16>
    %cst_119 = arith.constant dense<0.000000e+00> : vector<38x128xf32>
    %124 = tpu.matmul %121, %123, %cst_119 {dimension_numbers = #tpu.dot_dimension_numbers<[1], [0], [0], [1], [0, 0, 1, 1], [], []>} : vector<38x64xbf16>, vector<64x128xbf16>, vector<38x128xf32> -> vector<38x128xf32>
    %125 = arith.addf %119, %124 : vector<38x128xf32>
    %c0_120 = arith.constant 0 : index
    %c0_121 = arith.constant 0 : index
    %126 = vector.load %arg7[%c0_120, %c0_121] : memref<1x128xf32, #tpu.memory_space<vmem>>, vector<1x128xf32>
    %127 = vector.broadcast %126 : vector<1x128xf32> to vector<38x128xf32>
    %128 = arith.addf %125, %127 : vector<38x128xf32>
    %cst_122 = arith.constant 0.000000e+00 : f32
    %129 = vector.broadcast %cst_122 : f32 to vector<38x128xf32>
    %130 = arith.maximumf %128, %129 : vector<38x128xf32>
    %c8_123 = arith.constant 8 : index
    %c0_124 = arith.constant 0 : index
    %131 = vector.load %arg22[%c8_123, %c0_124] : memref<54x128xf32, #tpu.memory_space<vmem>>, vector<38x128xf32>
    tpu.vector_store %arg22[%c8_123, %c0_124], %130 {strides = array<i32>} : memref<54x128xf32, #tpu.memory_space<vmem>>, vector<38x128xf32>,
    %c7_125 = arith.constant 7 : index
    %c0_126 = arith.constant 0 : index
    %132 = tpu.strided_load %arg22[%c7_125, %c0_126] {strides = array<i32: 2, 1>} : memref<54x128xf32, #tpu.memory_space<vmem>>, vector<19x128xf32>
    %133 = arith.truncf %132 : vector<19x128xf32> to vector<19x128xbf16>
    %c0_127 = arith.constant 0 : index
    %c0_128 = arith.constant 0 : index
    %c0_129 = arith.constant 0 : index
    %134 = vector.load %arg8[%c0_127, %c0_128, %c0_129] : memref<3x128x256xbf16, #tpu.memory_space<vmem>>, vector<1x128x256xbf16>
    %135 = vector.shape_cast %134 : vector<1x128x256xbf16> to vector<128x256xbf16>
    %cst_130 = arith.constant dense<0.000000e+00> : vector<19x256xf32>
    %136 = tpu.matmul %133, %135, %cst_130 {dimension_numbers = #tpu.dot_dimension_numbers<[1], [0], [0], [1], [0, 0, 1, 1], [], []>} : vector<19x128xbf16>, vector<128x256xbf16>, vector<19x256xf32> -> vector<19x256xf32>
    %c8_131 = arith.constant 8 : index
    %c0_132 = arith.constant 0 : index
    %137 = tpu.strided_load %arg22[%c8_131, %c0_132] {strides = array<i32: 2, 1>} : memref<54x128xf32, #tpu.memory_space<vmem>>, vector<19x128xf32>
    %138 = arith.truncf %137 : vector<19x128xf32> to vector<19x128xbf16>
    %c1_133 = arith.constant 1 : index
    %c0_134 = arith.constant 0 : index
    %c0_135 = arith.constant 0 : index
    %139 = vector.load %arg8[%c1_133, %c0_134, %c0_135] : memref<3x128x256xbf16, #tpu.memory_space<vmem>>, vector<1x128x256xbf16>
    %140 = vector.shape_cast %139 : vector<1x128x256xbf16> to vector<128x256xbf16>
    %cst_136 = arith.constant dense<0.000000e+00> : vector<19x256xf32>
    %141 = tpu.matmul %138, %140, %cst_136 {dimension_numbers = #tpu.dot_dimension_numbers<[1], [0], [0], [1], [0, 0, 1, 1], [], []>} : vector<19x128xbf16>, vector<128x256xbf16>, vector<19x256xf32> -> vector<19x256xf32>
    %142 = arith.addf %136, %141 : vector<19x256xf32>
    %c9_137 = arith.constant 9 : index
    %c0_138 = arith.constant 0 : index
    %143 = tpu.strided_load %arg22[%c9_137, %c0_138] {strides = array<i32: 2, 1>} : memref<54x128xf32, #tpu.memory_space<vmem>>, vector<19x128xf32>
    %144 = arith.truncf %143 : vector<19x128xf32> to vector<19x128xbf16>
    %c2_139 = arith.constant 2 : index
    %c0_140 = arith.constant 0 : index
    %c0_141 = arith.constant 0 : index
    %145 = vector.load %arg8[%c2_139, %c0_140, %c0_141] : memref<3x128x256xbf16, #tpu.memory_space<vmem>>, vector<1x128x256xbf16>
    %146 = vector.shape_cast %145 : vector<1x128x256xbf16> to vector<128x256xbf16>
    %cst_142 = arith.constant dense<0.000000e+00> : vector<19x256xf32>
    %147 = tpu.matmul %144, %146, %cst_142 {dimension_numbers = #tpu.dot_dimension_numbers<[1], [0], [0], [1], [0, 0, 1, 1], [], []>} : vector<19x128xbf16>, vector<128x256xbf16>, vector<19x256xf32> -> vector<19x256xf32>
    %148 = arith.addf %142, %147 : vector<19x256xf32>
    %c0_143 = arith.constant 0 : index
    %c0_144 = arith.constant 0 : index
    %149 = vector.load %arg9[%c0_143, %c0_144] : memref<1x256xf32, #tpu.memory_space<vmem>>, vector<1x256xf32>
    %150 = vector.broadcast %149 : vector<1x256xf32> to vector<19x256xf32>
    %151 = arith.addf %148, %150 : vector<19x256xf32>
    %cst_145 = arith.constant 0.000000e+00 : f32
    %152 = vector.broadcast %cst_145 : f32 to vector<19x256xf32>
    %153 = arith.maximumf %151, %152 : vector<19x256xf32>
    %cst_146 = arith.constant dense<0.000000e+00> : vector<256xf32>
    %154 = vector.multi_reduction <add>, %153, %cst_146 [0] : vector<19x256xf32> to vector<256xf32>
    %155 = vector.shape_cast %154 : vector<256xf32> to vector<1x256xf32>
    %c1_147 = arith.constant 1 : index
    %c0_148 = arith.constant 0 : index
    %c0_149 = arith.constant 0 : index
    %156 = vector.load %arg1[%c1_147, %c0_148, %c0_149] : memref<2x300x8xf32, #tpu.memory_space<vmem>>, vector<1x300x8xf32>
    %157 = vector.shape_cast %156 : vector<1x300x8xf32> to vector<300x8xf32>
    %c8_150 = arith.constant 8 : index
    %c0_151 = arith.constant 0 : index
    %158 = vector.load %arg19[%c8_150, %c0_151] : memref<316x8xf32, #tpu.memory_space<vmem>>, vector<300x8xf32>
    tpu.vector_store %arg19[%c8_150, %c0_151], %157 {strides = array<i32>} : memref<316x8xf32, #tpu.memory_space<vmem>>, vector<300x8xf32>,
    %c5_152 = arith.constant 5 : index
    %c0_153 = arith.constant 0 : index
    %159 = tpu.strided_load %arg19[%c5_152, %c0_153] {strides = array<i32: 2, 1>} : memref<316x8xf32, #tpu.memory_space<vmem>>, vector<150x8xf32>
    %160 = arith.truncf %159 : vector<150x8xf32> to vector<150x8xbf16>
    %c0_154 = arith.constant 0 : index
    %c0_155 = arith.constant 0 : index
    %c0_156 = arith.constant 0 : index
    %161 = vector.load %arg2[%c0_154, %c0_155, %c0_156] : memref<7x8x64xbf16, #tpu.memory_space<vmem>>, vector<1x8x64xbf16>
    %162 = vector.shape_cast %161 : vector<1x8x64xbf16> to vector<8x64xbf16>
    %cst_157 = arith.constant dense<0.000000e+00> : vector<150x64xf32>
    %163 = tpu.matmul %160, %162, %cst_157 {dimension_numbers = #tpu.dot_dimension_numbers<[1], [0], [0], [1], [0, 0, 1, 1], [], []>} : vector<150x8xbf16>, vector<8x64xbf16>, vector<150x64xf32> -> vector<150x64xf32>
    %c6_158 = arith.constant 6 : index
    %c0_159 = arith.constant 0 : index
    %164 = tpu.strided_load %arg19[%c6_158, %c0_159] {strides = array<i32: 2, 1>} : memref<316x8xf32, #tpu.memory_space<vmem>>, vector<150x8xf32>
    %165 = arith.truncf %164 : vector<150x8xf32> to vector<150x8xbf16>
    %c1_160 = arith.constant 1 : index
    %c0_161 = arith.constant 0 : index
    %c0_162 = arith.constant 0 : index
    %166 = vector.load %arg2[%c1_160, %c0_161, %c0_162] : memref<7x8x64xbf16, #tpu.memory_space<vmem>>, vector<1x8x64xbf16>
    %167 = vector.shape_cast %166 : vector<1x8x64xbf16> to vector<8x64xbf16>
    %cst_163 = arith.constant dense<0.000000e+00> : vector<150x64xf32>
    %168 = tpu.matmul %165, %167, %cst_163 {dimension_numbers = #tpu.dot_dimension_numbers<[1], [0], [0], [1], [0, 0, 1, 1], [], []>} : vector<150x8xbf16>, vector<8x64xbf16>, vector<150x64xf32> -> vector<150x64xf32>
    %169 = arith.addf %163, %168 : vector<150x64xf32>
    %c7_164 = arith.constant 7 : index
    %c0_165 = arith.constant 0 : index
    %170 = tpu.strided_load %arg19[%c7_164, %c0_165] {strides = array<i32: 2, 1>} : memref<316x8xf32, #tpu.memory_space<vmem>>, vector<150x8xf32>
    %171 = arith.truncf %170 : vector<150x8xf32> to vector<150x8xbf16>
    %c2_166 = arith.constant 2 : index
    %c0_167 = arith.constant 0 : index
    %c0_168 = arith.constant 0 : index
    %172 = vector.load %arg2[%c2_166, %c0_167, %c0_168] : memref<7x8x64xbf16, #tpu.memory_space<vmem>>, vector<1x8x64xbf16>
    %173 = vector.shape_cast %172 : vector<1x8x64xbf16> to vector<8x64xbf16>
    %cst_169 = arith.constant dense<0.000000e+00> : vector<150x64xf32>
    %174 = tpu.matmul %171, %173, %cst_169 {dimension_numbers = #tpu.dot_dimension_numbers<[1], [0], [0], [1], [0, 0, 1, 1], [], []>} : vector<150x8xbf16>, vector<8x64xbf16>, vector<150x64xf32> -> vector<150x64xf32>
    %175 = arith.addf %169, %174 : vector<150x64xf32>
    %c8_170 = arith.constant 8 : index
    %c0_171 = arith.constant 0 : index
    %176 = tpu.strided_load %arg19[%c8_170, %c0_171] {strides = array<i32: 2, 1>} : memref<316x8xf32, #tpu.memory_space<vmem>>, vector<150x8xf32>
    %177 = arith.truncf %176 : vector<150x8xf32> to vector<150x8xbf16>
    %c3_172 = arith.constant 3 : index
    %c0_173 = arith.constant 0 : index
    %c0_174 = arith.constant 0 : index
    %178 = vector.load %arg2[%c3_172, %c0_173, %c0_174] : memref<7x8x64xbf16, #tpu.memory_space<vmem>>, vector<1x8x64xbf16>
    %179 = vector.shape_cast %178 : vector<1x8x64xbf16> to vector<8x64xbf16>
    %cst_175 = arith.constant dense<0.000000e+00> : vector<150x64xf32>
    %180 = tpu.matmul %177, %179, %cst_175 {dimension_numbers = #tpu.dot_dimension_numbers<[1], [0], [0], [1], [0, 0, 1, 1], [], []>} : vector<150x8xbf16>, vector<8x64xbf16>, vector<150x64xf32> -> vector<150x64xf32>
    %181 = arith.addf %175, %180 : vector<150x64xf32>
    %c9_176 = arith.constant 9 : index
    %c0_177 = arith.constant 0 : index
    %182 = tpu.strided_load %arg19[%c9_176, %c0_177] {strides = array<i32: 2, 1>} : memref<316x8xf32, #tpu.memory_space<vmem>>, vector<150x8xf32>
    %183 = arith.truncf %182 : vector<150x8xf32> to vector<150x8xbf16>
    %c4_178 = arith.constant 4 : index
    %c0_179 = arith.constant 0 : index
    %c0_180 = arith.constant 0 : index
    %184 = vector.load %arg2[%c4_178, %c0_179, %c0_180] : memref<7x8x64xbf16, #tpu.memory_space<vmem>>, vector<1x8x64xbf16>
    %185 = vector.shape_cast %184 : vector<1x8x64xbf16> to vector<8x64xbf16>
    %cst_181 = arith.constant dense<0.000000e+00> : vector<150x64xf32>
    %186 = tpu.matmul %183, %185, %cst_181 {dimension_numbers = #tpu.dot_dimension_numbers<[1], [0], [0], [1], [0, 0, 1, 1], [], []>} : vector<150x8xbf16>, vector<8x64xbf16>, vector<150x64xf32> -> vector<150x64xf32>
    %187 = arith.addf %181, %186 : vector<150x64xf32>
    %c10_182 = arith.constant 10 : index
    %c0_183 = arith.constant 0 : index
    %188 = tpu.strided_load %arg19[%c10_182, %c0_183] {strides = array<i32: 2, 1>} : memref<316x8xf32, #tpu.memory_space<vmem>>, vector<150x8xf32>
    %189 = arith.truncf %188 : vector<150x8xf32> to vector<150x8xbf16>
    %c5_184 = arith.constant 5 : index
    %c0_185 = arith.constant 0 : index
    %c0_186 = arith.constant 0 : index
    %190 = vector.load %arg2[%c5_184, %c0_185, %c0_186] : memref<7x8x64xbf16, #tpu.memory_space<vmem>>, vector<1x8x64xbf16>
    %191 = vector.shape_cast %190 : vector<1x8x64xbf16> to vector<8x64xbf16>
    %cst_187 = arith.constant dense<0.000000e+00> : vector<150x64xf32>
    %192 = tpu.matmul %189, %191, %cst_187 {dimension_numbers = #tpu.dot_dimension_numbers<[1], [0], [0], [1], [0, 0, 1, 1], [], []>} : vector<150x8xbf16>, vector<8x64xbf16>, vector<150x64xf32> -> vector<150x64xf32>
    %193 = arith.addf %187, %192 : vector<150x64xf32>
    %c11_188 = arith.constant 11 : index
    %c0_189 = arith.constant 0 : index
    %194 = tpu.strided_load %arg19[%c11_188, %c0_189] {strides = array<i32: 2, 1>} : memref<316x8xf32, #tpu.memory_space<vmem>>, vector<150x8xf32>
    %195 = arith.truncf %194 : vector<150x8xf32> to vector<150x8xbf16>
    %c6_190 = arith.constant 6 : index
    %c0_191 = arith.constant 0 : index
    %c0_192 = arith.constant 0 : index
    %196 = vector.load %arg2[%c6_190, %c0_191, %c0_192] : memref<7x8x64xbf16, #tpu.memory_space<vmem>>, vector<1x8x64xbf16>
    %197 = vector.shape_cast %196 : vector<1x8x64xbf16> to vector<8x64xbf16>
    %cst_193 = arith.constant dense<0.000000e+00> : vector<150x64xf32>
    %198 = tpu.matmul %195, %197, %cst_193 {dimension_numbers = #tpu.dot_dimension_numbers<[1], [0], [0], [1], [0, 0, 1, 1], [], []>} : vector<150x8xbf16>, vector<8x64xbf16>, vector<150x64xf32> -> vector<150x64xf32>
    %199 = arith.addf %193, %198 : vector<150x64xf32>
    %c0_194 = arith.constant 0 : index
    %c0_195 = arith.constant 0 : index
    %200 = vector.load %arg3[%c0_194, %c0_195] : memref<1x64xf32, #tpu.memory_space<vmem>>, vector<1x64xf32>
    %201 = vector.broadcast %200 : vector<1x64xf32> to vector<150x64xf32>
    %202 = arith.addf %199, %201 : vector<150x64xf32>
    %cst_196 = arith.constant 0.000000e+00 : f32
    %203 = vector.broadcast %cst_196 : f32 to vector<150x64xf32>
    %204 = arith.maximumf %202, %203 : vector<150x64xf32>
    %c8_197 = arith.constant 8 : index
    %c0_198 = arith.constant 0 : index
    %205 = vector.load %arg20[%c8_197, %c0_198] : memref<166x64xf32, #tpu.memory_space<vmem>>, vector<150x64xf32>
    tpu.vector_store %arg20[%c8_197, %c0_198], %204 {strides = array<i32>} : memref<166x64xf32, #tpu.memory_space<vmem>>, vector<150x64xf32>,
    %c6_199 = arith.constant 6 : index
    %c0_200 = arith.constant 0 : index
    %206 = tpu.strided_load %arg20[%c6_199, %c0_200] {strides = array<i32: 2, 1>} : memref<166x64xf32, #tpu.memory_space<vmem>>, vector<75x64xf32>
    %207 = arith.truncf %206 : vector<75x64xf32> to vector<75x64xbf16>
    %c0_201 = arith.constant 0 : index
    %c0_202 = arith.constant 0 : index
    %c0_203 = arith.constant 0 : index
    %208 = vector.load %arg4[%c0_201, %c0_202, %c0_203] : memref<5x64x64xbf16, #tpu.memory_space<vmem>>, vector<1x64x64xbf16>
    %209 = vector.shape_cast %208 : vector<1x64x64xbf16> to vector<64x64xbf16>
    %cst_204 = arith.constant dense<0.000000e+00> : vector<75x64xf32>
    %210 = tpu.matmul %207, %209, %cst_204 {dimension_numbers = #tpu.dot_dimension_numbers<[1], [0], [0], [1], [0, 0, 1, 1], [], []>} : vector<75x64xbf16>, vector<64x64xbf16>, vector<75x64xf32> -> vector<75x64xf32>
    %c7_205 = arith.constant 7 : index
    %c0_206 = arith.constant 0 : index
    %211 = tpu.strided_load %arg20[%c7_205, %c0_206] {strides = array<i32: 2, 1>} : memref<166x64xf32, #tpu.memory_space<vmem>>, vector<75x64xf32>
    %212 = arith.truncf %211 : vector<75x64xf32> to vector<75x64xbf16>
    %c1_207 = arith.constant 1 : index
    %c0_208 = arith.constant 0 : index
    %c0_209 = arith.constant 0 : index
    %213 = vector.load %arg4[%c1_207, %c0_208, %c0_209] : memref<5x64x64xbf16, #tpu.memory_space<vmem>>, vector<1x64x64xbf16>
    %214 = vector.shape_cast %213 : vector<1x64x64xbf16> to vector<64x64xbf16>
    %cst_210 = arith.constant dense<0.000000e+00> : vector<75x64xf32>
    %215 = tpu.matmul %212, %214, %cst_210 {dimension_numbers = #tpu.dot_dimension_numbers<[1], [0], [0], [1], [0, 0, 1, 1], [], []>} : vector<75x64xbf16>, vector<64x64xbf16>, vector<75x64xf32> -> vector<75x64xf32>
    %216 = arith.addf %210, %215 : vector<75x64xf32>
    %c8_211 = arith.constant 8 : index
    %c0_212 = arith.constant 0 : index
    %217 = tpu.strided_load %arg20[%c8_211, %c0_212] {strides = array<i32: 2, 1>} : memref<166x64xf32, #tpu.memory_space<vmem>>, vector<75x64xf32>
    %218 = arith.truncf %217 : vector<75x64xf32> to vector<75x64xbf16>
    %c2_213 = arith.constant 2 : index
    %c0_214 = arith.constant 0 : index
    %c0_215 = arith.constant 0 : index
    %219 = vector.load %arg4[%c2_213, %c0_214, %c0_215] : memref<5x64x64xbf16, #tpu.memory_space<vmem>>, vector<1x64x64xbf16>
    %220 = vector.shape_cast %219 : vector<1x64x64xbf16> to vector<64x64xbf16>
    %cst_216 = arith.constant dense<0.000000e+00> : vector<75x64xf32>
    %221 = tpu.matmul %218, %220, %cst_216 {dimension_numbers = #tpu.dot_dimension_numbers<[1], [0], [0], [1], [0, 0, 1, 1], [], []>} : vector<75x64xbf16>, vector<64x64xbf16>, vector<75x64xf32> -> vector<75x64xf32>
    %222 = arith.addf %216, %221 : vector<75x64xf32>
    %c9_217 = arith.constant 9 : index
    %c0_218 = arith.constant 0 : index
    %223 = tpu.strided_load %arg20[%c9_217, %c0_218] {strides = array<i32: 2, 1>} : memref<166x64xf32, #tpu.memory_space<vmem>>, vector<75x64xf32>
    %224 = arith.truncf %223 : vector<75x64xf32> to vector<75x64xbf16>
    %c3_219 = arith.constant 3 : index
    %c0_220 = arith.constant 0 : index
    %c0_221 = arith.constant 0 : index
    %225 = vector.load %arg4[%c3_219, %c0_220, %c0_221] : memref<5x64x64xbf16, #tpu.memory_space<vmem>>, vector<1x64x64xbf16>
    %226 = vector.shape_cast %225 : vector<1x64x64xbf16> to vector<64x64xbf16>
    %cst_222 = arith.constant dense<0.000000e+00> : vector<75x64xf32>
    %227 = tpu.matmul %224, %226, %cst_222 {dimension_numbers = #tpu.dot_dimension_numbers<[1], [0], [0], [1], [0, 0, 1, 1], [], []>} : vector<75x64xbf16>, vector<64x64xbf16>, vector<75x64xf32> -> vector<75x64xf32>
    %228 = arith.addf %222, %227 : vector<75x64xf32>
    %c10_223 = arith.constant 10 : index
    %c0_224 = arith.constant 0 : index
    %229 = tpu.strided_load %arg20[%c10_223, %c0_224] {strides = array<i32: 2, 1>} : memref<166x64xf32, #tpu.memory_space<vmem>>, vector<75x64xf32>
    %230 = arith.truncf %229 : vector<75x64xf32> to vector<75x64xbf16>
    %c4_225 = arith.constant 4 : index
    %c0_226 = arith.constant 0 : index
    %c0_227 = arith.constant 0 : index
    %231 = vector.load %arg4[%c4_225, %c0_226, %c0_227] : memref<5x64x64xbf16, #tpu.memory_space<vmem>>, vector<1x64x64xbf16>
    %232 = vector.shape_cast %231 : vector<1x64x64xbf16> to vector<64x64xbf16>
    %cst_228 = arith.constant dense<0.000000e+00> : vector<75x64xf32>
    %233 = tpu.matmul %230, %232, %cst_228 {dimension_numbers = #tpu.dot_dimension_numbers<[1], [0], [0], [1], [0, 0, 1, 1], [], []>} : vector<75x64xbf16>, vector<64x64xbf16>, vector<75x64xf32> -> vector<75x64xf32>
    %234 = arith.addf %228, %233 : vector<75x64xf32>
    %c0_229 = arith.constant 0 : index
    %c0_230 = arith.constant 0 : index
    %235 = vector.load %arg5[%c0_229, %c0_230] : memref<1x64xf32, #tpu.memory_space<vmem>>, vector<1x64xf32>
    %236 = vector.broadcast %235 : vector<1x64xf32> to vector<75x64xf32>
    %237 = arith.addf %234, %236 : vector<75x64xf32>
    %cst_231 = arith.constant 0.000000e+00 : f32
    %238 = vector.broadcast %cst_231 : f32 to vector<75x64xf32>
    %239 = arith.maximumf %237, %238 : vector<75x64xf32>
    %c8_232 = arith.constant 8 : index
    %c0_233 = arith.constant 0 : index
    %240 = vector.load %arg21[%c8_232, %c0_233] : memref<91x64xf32, #tpu.memory_space<vmem>>, vector<75x64xf32>
    tpu.vector_store %arg21[%c8_232, %c0_233], %239 {strides = array<i32>} : memref<91x64xf32, #tpu.memory_space<vmem>>, vector<75x64xf32>,
    %c6_234 = arith.constant 6 : index
    %c0_235 = arith.constant 0 : index
    %241 = tpu.strided_load %arg21[%c6_234, %c0_235] {strides = array<i32: 2, 1>} : memref<91x64xf32, #tpu.memory_space<vmem>>, vector<38x64xf32>
    %242 = arith.truncf %241 : vector<38x64xf32> to vector<38x64xbf16>
    %c0_236 = arith.constant 0 : index
    %c0_237 = arith.constant 0 : index
    %c0_238 = arith.constant 0 : index
    %243 = vector.load %arg6[%c0_236, %c0_237, %c0_238] : memref<5x64x128xbf16, #tpu.memory_space<vmem>>, vector<1x64x128xbf16>
    %244 = vector.shape_cast %243 : vector<1x64x128xbf16> to vector<64x128xbf16>
    %cst_239 = arith.constant dense<0.000000e+00> : vector<38x128xf32>
    %245 = tpu.matmul %242, %244, %cst_239 {dimension_numbers = #tpu.dot_dimension_numbers<[1], [0], [0], [1], [0, 0, 1, 1], [], []>} : vector<38x64xbf16>, vector<64x128xbf16>, vector<38x128xf32> -> vector<38x128xf32>
    %c7_240 = arith.constant 7 : index
    %c0_241 = arith.constant 0 : index
    %246 = tpu.strided_load %arg21[%c7_240, %c0_241] {strides = array<i32: 2, 1>} : memref<91x64xf32, #tpu.memory_space<vmem>>, vector<38x64xf32>
    %247 = arith.truncf %246 : vector<38x64xf32> to vector<38x64xbf16>
    %c1_242 = arith.constant 1 : index
    %c0_243 = arith.constant 0 : index
    %c0_244 = arith.constant 0 : index
    %248 = vector.load %arg6[%c1_242, %c0_243, %c0_244] : memref<5x64x128xbf16, #tpu.memory_space<vmem>>, vector<1x64x128xbf16>
    %249 = vector.shape_cast %248 : vector<1x64x128xbf16> to vector<64x128xbf16>
    %cst_245 = arith.constant dense<0.000000e+00> : vector<38x128xf32>
    %250 = tpu.matmul %247, %249, %cst_245 {dimension_numbers = #tpu.dot_dimension_numbers<[1], [0], [0], [1], [0, 0, 1, 1], [], []>} : vector<38x64xbf16>, vector<64x128xbf16>, vector<38x128xf32> -> vector<38x128xf32>
    %251 = arith.addf %245, %250 : vector<38x128xf32>
    %c8_246 = arith.constant 8 : index
    %c0_247 = arith.constant 0 : index
    %252 = tpu.strided_load %arg21[%c8_246, %c0_247] {strides = array<i32: 2, 1>} : memref<91x64xf32, #tpu.memory_space<vmem>>, vector<38x64xf32>
    %253 = arith.truncf %252 : vector<38x64xf32> to vector<38x64xbf16>
    %c2_248 = arith.constant 2 : index
    %c0_249 = arith.constant 0 : index
    %c0_250 = arith.constant 0 : index
    %254 = vector.load %arg6[%c2_248, %c0_249, %c0_250] : memref<5x64x128xbf16, #tpu.memory_space<vmem>>, vector<1x64x128xbf16>
    %255 = vector.shape_cast %254 : vector<1x64x128xbf16> to vector<64x128xbf16>
    %cst_251 = arith.constant dense<0.000000e+00> : vector<38x128xf32>
    %256 = tpu.matmul %253, %255, %cst_251 {dimension_numbers = #tpu.dot_dimension_numbers<[1], [0], [0], [1], [0, 0, 1, 1], [], []>} : vector<38x64xbf16>, vector<64x128xbf16>, vector<38x128xf32> -> vector<38x128xf32>
    %257 = arith.addf %251, %256 : vector<38x128xf32>
    %c9_252 = arith.constant 9 : index
    %c0_253 = arith.constant 0 : index
    %258 = tpu.strided_load %arg21[%c9_252, %c0_253] {strides = array<i32: 2, 1>} : memref<91x64xf32, #tpu.memory_space<vmem>>, vector<38x64xf32>
    %259 = arith.truncf %258 : vector<38x64xf32> to vector<38x64xbf16>
    %c3_254 = arith.constant 3 : index
    %c0_255 = arith.constant 0 : index
    %c0_256 = arith.constant 0 : index
    %260 = vector.load %arg6[%c3_254, %c0_255, %c0_256] : memref<5x64x128xbf16, #tpu.memory_space<vmem>>, vector<1x64x128xbf16>
    %261 = vector.shape_cast %260 : vector<1x64x128xbf16> to vector<64x128xbf16>
    %cst_257 = arith.constant dense<0.000000e+00> : vector<38x128xf32>
    %262 = tpu.matmul %259, %261, %cst_257 {dimension_numbers = #tpu.dot_dimension_numbers<[1], [0], [0], [1], [0, 0, 1, 1], [], []>} : vector<38x64xbf16>, vector<64x128xbf16>, vector<38x128xf32> -> vector<38x128xf32>
    %263 = arith.addf %257, %262 : vector<38x128xf32>
    %c10_258 = arith.constant 10 : index
    %c0_259 = arith.constant 0 : index
    %264 = tpu.strided_load %arg21[%c10_258, %c0_259] {strides = array<i32: 2, 1>} : memref<91x64xf32, #tpu.memory_space<vmem>>, vector<38x64xf32>
    %265 = arith.truncf %264 : vector<38x64xf32> to vector<38x64xbf16>
    %c4_260 = arith.constant 4 : index
    %c0_261 = arith.constant 0 : index
    %c0_262 = arith.constant 0 : index
    %266 = vector.load %arg6[%c4_260, %c0_261, %c0_262] : memref<5x64x128xbf16, #tpu.memory_space<vmem>>, vector<1x64x128xbf16>
    %267 = vector.shape_cast %266 : vector<1x64x128xbf16> to vector<64x128xbf16>
    %cst_263 = arith.constant dense<0.000000e+00> : vector<38x128xf32>
    %268 = tpu.matmul %265, %267, %cst_263 {dimension_numbers = #tpu.dot_dimension_numbers<[1], [0], [0], [1], [0, 0, 1, 1], [], []>} : vector<38x64xbf16>, vector<64x128xbf16>, vector<38x128xf32> -> vector<38x128xf32>
    %269 = arith.addf %263, %268 : vector<38x128xf32>
    %c0_264 = arith.constant 0 : index
    %c0_265 = arith.constant 0 : index
    %270 = vector.load %arg7[%c0_264, %c0_265] : memref<1x128xf32, #tpu.memory_space<vmem>>, vector<1x128xf32>
    %271 = vector.broadcast %270 : vector<1x128xf32> to vector<38x128xf32>
    %272 = arith.addf %269, %271 : vector<38x128xf32>
    %cst_266 = arith.constant 0.000000e+00 : f32
    %273 = vector.broadcast %cst_266 : f32 to vector<38x128xf32>
    %274 = arith.maximumf %272, %273 : vector<38x128xf32>
    %c8_267 = arith.constant 8 : index
    %c0_268 = arith.constant 0 : index
    %275 = vector.load %arg22[%c8_267, %c0_268] : memref<54x128xf32, #tpu.memory_space<vmem>>, vector<38x128xf32>
    tpu.vector_store %arg22[%c8_267, %c0_268], %274 {strides = array<i32>} : memref<54x128xf32, #tpu.memory_space<vmem>>, vector<38x128xf32>,
    %c7_269 = arith.constant 7 : index
    %c0_270 = arith.constant 0 : index
    %276 = tpu.strided_load %arg22[%c7_269, %c0_270] {strides = array<i32: 2, 1>} : memref<54x128xf32, #tpu.memory_space<vmem>>, vector<19x128xf32>
    %277 = arith.truncf %276 : vector<19x128xf32> to vector<19x128xbf16>
    %c0_271 = arith.constant 0 : index
    %c0_272 = arith.constant 0 : index
    %c0_273 = arith.constant 0 : index
    %278 = vector.load %arg8[%c0_271, %c0_272, %c0_273] : memref<3x128x256xbf16, #tpu.memory_space<vmem>>, vector<1x128x256xbf16>
    %279 = vector.shape_cast %278 : vector<1x128x256xbf16> to vector<128x256xbf16>
    %cst_274 = arith.constant dense<0.000000e+00> : vector<19x256xf32>
    %280 = tpu.matmul %277, %279, %cst_274 {dimension_numbers = #tpu.dot_dimension_numbers<[1], [0], [0], [1], [0, 0, 1, 1], [], []>} : vector<19x128xbf16>, vector<128x256xbf16>, vector<19x256xf32> -> vector<19x256xf32>
    %c8_275 = arith.constant 8 : index
    %c0_276 = arith.constant 0 : index
    %281 = tpu.strided_load %arg22[%c8_275, %c0_276] {strides = array<i32: 2, 1>} : memref<54x128xf32, #tpu.memory_space<vmem>>, vector<19x128xf32>
    %282 = arith.truncf %281 : vector<19x128xf32> to vector<19x128xbf16>
    %c1_277 = arith.constant 1 : index
    %c0_278 = arith.constant 0 : index
    %c0_279 = arith.constant 0 : index
    %283 = vector.load %arg8[%c1_277, %c0_278, %c0_279] : memref<3x128x256xbf16, #tpu.memory_space<vmem>>, vector<1x128x256xbf16>
    %284 = vector.shape_cast %283 : vector<1x128x256xbf16> to vector<128x256xbf16>
    %cst_280 = arith.constant dense<0.000000e+00> : vector<19x256xf32>
    %285 = tpu.matmul %282, %284, %cst_280 {dimension_numbers = #tpu.dot_dimension_numbers<[1], [0], [0], [1], [0, 0, 1, 1], [], []>} : vector<19x128xbf16>, vector<128x256xbf16>, vector<19x256xf32> -> vector<19x256xf32>
    %286 = arith.addf %280, %285 : vector<19x256xf32>
    %c9_281 = arith.constant 9 : index
    %c0_282 = arith.constant 0 : index
    %287 = tpu.strided_load %arg22[%c9_281, %c0_282] {strides = array<i32: 2, 1>} : memref<54x128xf32, #tpu.memory_space<vmem>>, vector<19x128xf32>
    %288 = arith.truncf %287 : vector<19x128xf32> to vector<19x128xbf16>
    %c2_283 = arith.constant 2 : index
    %c0_284 = arith.constant 0 : index
    %c0_285 = arith.constant 0 : index
    %289 = vector.load %arg8[%c2_283, %c0_284, %c0_285] : memref<3x128x256xbf16, #tpu.memory_space<vmem>>, vector<1x128x256xbf16>
    %290 = vector.shape_cast %289 : vector<1x128x256xbf16> to vector<128x256xbf16>
    %cst_286 = arith.constant dense<0.000000e+00> : vector<19x256xf32>
    %291 = tpu.matmul %288, %290, %cst_286 {dimension_numbers = #tpu.dot_dimension_numbers<[1], [0], [0], [1], [0, 0, 1, 1], [], []>} : vector<19x128xbf16>, vector<128x256xbf16>, vector<19x256xf32> -> vector<19x256xf32>
    %292 = arith.addf %286, %291 : vector<19x256xf32>
    %c0_287 = arith.constant 0 : index
    %c0_288 = arith.constant 0 : index
    %293 = vector.load %arg9[%c0_287, %c0_288] : memref<1x256xf32, #tpu.memory_space<vmem>>, vector<1x256xf32>
    %294 = vector.broadcast %293 : vector<1x256xf32> to vector<19x256xf32>
    %295 = arith.addf %292, %294 : vector<19x256xf32>
    %cst_289 = arith.constant 0.000000e+00 : f32
    %296 = vector.broadcast %cst_289 : f32 to vector<19x256xf32>
    %297 = arith.maximumf %295, %296 : vector<19x256xf32>
    %cst_290 = arith.constant dense<0.000000e+00> : vector<256xf32>
    %298 = vector.multi_reduction <add>, %297, %cst_290 [0] : vector<19x256xf32> to vector<256xf32>
    %299 = vector.shape_cast %298 : vector<256xf32> to vector<1x256xf32>
    %300 = tpu.concatenate %155, %299 in 0 : vector<1x256xf32>, vector<1x256xf32> -> vector<2x256xf32>
    %301 = arith.truncf %300 : vector<2x256xf32> to vector<2x256xbf16>
    %c0_291 = arith.constant 0 : index
    %c0_292 = arith.constant 0 : index
    %302 = vector.load %arg10[%c0_291, %c0_292] : memref<256x128xbf16, #tpu.memory_space<vmem>>, vector<256x128xbf16>
    %cst_293 = arith.constant dense<0.000000e+00> : vector<2x128xf32>
    %303 = tpu.matmul %301, %302, %cst_293 {dimension_numbers = #tpu.dot_dimension_numbers<[1], [0], [0], [1], [0, 0, 1, 1], [], []>} : vector<2x256xbf16>, vector<256x128xbf16>, vector<2x128xf32> -> vector<2x128xf32>
    %c0_294 = arith.constant 0 : index
    %c0_295 = arith.constant 0 : index
    %304 = vector.load %arg11[%c0_294, %c0_295] : memref<1x128xf32, #tpu.memory_space<vmem>>, vector<1x128xf32>
    %305 = vector.broadcast %304 : vector<1x128xf32> to vector<2x128xf32>
    %306 = arith.addf %303, %305 : vector<2x128xf32>
    %cst_296 = arith.constant 0.000000e+00 : f32
    %307 = vector.broadcast %cst_296 : f32 to vector<2x128xf32>
    %308 = arith.maximumf %306, %307 : vector<2x128xf32>
    %309 = arith.truncf %308 : vector<2x128xf32> to vector<2x128xbf16>
    %c0_297 = arith.constant 0 : index
    %c0_298 = arith.constant 0 : index
    %310 = vector.load %arg12[%c0_297, %c0_298] : memref<128x64xbf16, #tpu.memory_space<vmem>>, vector<128x64xbf16>
    %cst_299 = arith.constant dense<0.000000e+00> : vector<2x64xf32>
    %311 = tpu.matmul %309, %310, %cst_299 {dimension_numbers = #tpu.dot_dimension_numbers<[1], [0], [0], [1], [0, 0, 1, 1], [], []>} : vector<2x128xbf16>, vector<128x64xbf16>, vector<2x64xf32> -> vector<2x64xf32>
    %c0_300 = arith.constant 0 : index
    %c0_301 = arith.constant 0 : index
    %312 = vector.load %arg13[%c0_300, %c0_301] : memref<1x64xf32, #tpu.memory_space<vmem>>, vector<1x64xf32>
    %313 = vector.broadcast %312 : vector<1x64xf32> to vector<2x64xf32>
    %314 = arith.addf %311, %313 : vector<2x64xf32>
    %cst_302 = arith.constant 0.000000e+00 : f32
    %315 = vector.broadcast %cst_302 : f32 to vector<2x64xf32>
    %316 = arith.maximumf %314, %315 : vector<2x64xf32>
    %317 = arith.truncf %316 : vector<2x64xf32> to vector<2x64xbf16>
    %c0_303 = arith.constant 0 : index
    %c0_304 = arith.constant 0 : index
    %318 = vector.load %arg14[%c0_303, %c0_304] : memref<64x32xbf16, #tpu.memory_space<vmem>>, vector<64x32xbf16>
    %cst_305 = arith.constant dense<0.000000e+00> : vector<2x32xf32>
    %319 = tpu.matmul %317, %318, %cst_305 {dimension_numbers = #tpu.dot_dimension_numbers<[1], [0], [0], [1], [0, 0, 1, 1], [], []>} : vector<2x64xbf16>, vector<64x32xbf16>, vector<2x32xf32> -> vector<2x32xf32>
    %c0_306 = arith.constant 0 : index
    %c0_307 = arith.constant 0 : index
    %320 = vector.load %arg15[%c0_306, %c0_307] : memref<1x32xf32, #tpu.memory_space<vmem>>, vector<1x32xf32>
    %321 = vector.broadcast %320 : vector<1x32xf32> to vector<2x32xf32>
    %322 = arith.addf %319, %321 : vector<2x32xf32>
    %cst_308 = arith.constant 0.000000e+00 : f32
    %323 = vector.broadcast %cst_308 : f32 to vector<2x32xf32>
    %324 = arith.maximumf %322, %323 : vector<2x32xf32>
    %325 = arith.truncf %324 : vector<2x32xf32> to vector<2x32xbf16>
    %c0_309 = arith.constant 0 : index
    %c0_310 = arith.constant 0 : index
    %326 = vector.load %arg16[%c0_309, %c0_310] : memref<32x1xbf16, #tpu.memory_space<vmem>>, vector<32x1xbf16>
    %cst_311 = arith.constant dense<0.000000e+00> : vector<2x1xf32>
    %327 = tpu.matmul %325, %326, %cst_311 {dimension_numbers = #tpu.dot_dimension_numbers<[1], [0], [0], [1], [0, 0, 1, 1], [], []>} : vector<2x32xbf16>, vector<32x1xbf16>, vector<2x1xf32> -> vector<2x1xf32>
    %c0_312 = arith.constant 0 : index
    %c0_313 = arith.constant 0 : index
    %328 = vector.load %arg17[%c0_312, %c0_313] : memref<1x1xf32, #tpu.memory_space<vmem>>, vector<1x1xf32>
    %329 = vector.broadcast %328 : vector<1x1xf32> to vector<2x1xf32>
    %330 = arith.addf %327, %329 : vector<2x1xf32>
    %331 = arith.negf %330 : vector<2x1xf32>
    %332 = math.exp %331 : vector<2x1xf32>
    %cst_314 = arith.constant 1.000000e+00 : f32
    %333 = vector.broadcast %cst_314 : f32 to vector<2x1xf32>
    %334 = arith.addf %333, %332 : vector<2x1xf32>
    %335 = arith.divf %333, %334 : vector<2x1xf32>
    %c0_315 = arith.constant 0 : index
    %c0_316 = arith.constant 0 : index
    %c0_317 = arith.constant 0 : index
    %336 = vector.load %arg18[%c0_315, %c0_316, %c0_317] : memref<1x2x1xf32, #tpu.memory_space<vmem>>, vector<1x2x1xf32>
    %337 = vector.shape_cast %336 : vector<1x2x1xf32> to vector<2x1xf32>
    %338 = vector.shape_cast %335 : vector<2x1xf32> to vector<1x2x1xf32>
    tpu.vector_store %arg18[%c0_315, %c0_316, %c0_317], %338 {strides = array<i32>} : memref<1x2x1xf32, #tpu.memory_space<vmem>>, vector<1x2x1xf32>,
    return
  }
  func.func @transform_0(%arg0: i32) -> (i32, i32, i32) {
    %c0_i32 = arith.constant 0 : i32
    %c0_i32_0 = arith.constant 0 : i32
    %c0_i32_1 = arith.constant 0 : i32
    return %arg0, %c0_i32, %c0_i32_0 : i32, i32, i32
  }
  func.func @transform_1(%arg0: i32) -> (i32, i32, i32) {
    %c0_i32 = arith.constant 0 : i32
    %c0_i32_0 = arith.constant 0 : i32
    %c0_i32_1 = arith.constant 0 : i32
    %c0_i32_2 = arith.constant 0 : i32
    return %c0_i32, %c0_i32_0, %c0_i32_1 : i32, i32, i32
  }
  func.func @transform_2(%arg0: i32) -> (i32, i32) {
    %c0_i32 = arith.constant 0 : i32
    %c0_i32_0 = arith.constant 0 : i32
    %c0_i32_1 = arith.constant 0 : i32
    return %c0_i32, %c0_i32_0 : i32, i32
  }
  func.func @transform_3(%arg0: i32) -> (i32, i32, i32) {
    %c0_i32 = arith.constant 0 : i32
    %c0_i32_0 = arith.constant 0 : i32
    %c0_i32_1 = arith.constant 0 : i32
    %c0_i32_2 = arith.constant 0 : i32
    return %c0_i32, %c0_i32_0, %c0_i32_1 : i32, i32, i32
  }
  func.func @transform_4(%arg0: i32) -> (i32, i32) {
    %c0_i32 = arith.constant 0 : i32
    %c0_i32_0 = arith.constant 0 : i32
    %c0_i32_1 = arith.constant 0 : i32
    return %c0_i32, %c0_i32_0 : i32, i32
  }
  func.func @transform_5(%arg0: i32) -> (i32, i32, i32) {
    %c0_i32 = arith.constant 0 : i32
    %c0_i32_0 = arith.constant 0 : i32
    %c0_i32_1 = arith.constant 0 : i32
    %c0_i32_2 = arith.constant 0 : i32
    return %c0_i32, %c0_i32_0, %c0_i32_1 : i32, i32, i32
  }
  func.func @transform_6(%arg0: i32) -> (i32, i32) {
    %c0_i32 = arith.constant 0 : i32
    %c0_i32_0 = arith.constant 0 : i32
    %c0_i32_1 = arith.constant 0 : i32
    return %c0_i32, %c0_i32_0 : i32, i32
  }
  func.func @transform_7(%arg0: i32) -> (i32, i32, i32) {
    %c0_i32 = arith.constant 0 : i32
    %c0_i32_0 = arith.constant 0 : i32
    %c0_i32_1 = arith.constant 0 : i32
    %c0_i32_2 = arith.constant 0 : i32
    return %c0_i32, %c0_i32_0, %c0_i32_1 : i32, i32, i32
  }
  func.func @transform_8(%arg0: i32) -> (i32, i32) {
    %c0_i32 = arith.constant 0 : i32
    %c0_i32_0 = arith.constant 0 : i32
    %c0_i32_1 = arith.constant 0 : i32
    return %c0_i32, %c0_i32_0 : i32, i32
  }
  func.func @transform_9(%arg0: i32) -> (i32, i32) {
    %c0_i32 = arith.constant 0 : i32
    %c0_i32_0 = arith.constant 0 : i32
    %c0_i32_1 = arith.constant 0 : i32
    return %c0_i32, %c0_i32_0 : i32, i32
  }
  func.func @transform_10(%arg0: i32) -> (i32, i32) {
    %c0_i32 = arith.constant 0 : i32
    %c0_i32_0 = arith.constant 0 : i32
    %c0_i32_1 = arith.constant 0 : i32
    return %c0_i32, %c0_i32_0 : i32, i32
  }
  func.func @transform_11(%arg0: i32) -> (i32, i32) {
    %c0_i32 = arith.constant 0 : i32
    %c0_i32_0 = arith.constant 0 : i32
    %c0_i32_1 = arith.constant 0 : i32
    return %c0_i32, %c0_i32_0 : i32, i32
  }
  func.func @transform_12(%arg0: i32) -> (i32, i32) {
    %c0_i32 = arith.constant 0 : i32
    %c0_i32_0 = arith.constant 0 : i32
    %c0_i32_1 = arith.constant 0 : i32
    return %c0_i32, %c0_i32_0 : i32, i32
  }
  func.func @transform_13(%arg0: i32) -> (i32, i32) {
    %c0_i32 = arith.constant 0 : i32
    %c0_i32_0 = arith.constant 0 : i32
    %c0_i32_1 = arith.constant 0 : i32
    return %c0_i32, %c0_i32_0 : i32, i32
  }
  func.func @transform_14(%arg0: i32) -> (i32, i32) {
    %c0_i32 = arith.constant 0 : i32
    %c0_i32_0 = arith.constant 0 : i32
    %c0_i32_1 = arith.constant 0 : i32
    return %c0_i32, %c0_i32_0 : i32, i32
  }
  func.func @transform_15(%arg0: i32) -> (i32, i32) {
    %c0_i32 = arith.constant 0 : i32
    %c0_i32_0 = arith.constant 0 : i32
    %c0_i32_1 = arith.constant 0 : i32
    return %c0_i32, %c0_i32_0 : i32, i32
  }
  func.func @transform_16(%arg0: i32) -> (i32, i32) {
    %c0_i32 = arith.constant 0 : i32
    %c0_i32_0 = arith.constant 0 : i32
    %c0_i32_1 = arith.constant 0 : i32
    return %c0_i32, %c0_i32_0 : i32, i32
  }
  func.func @transform_17(%arg0: i32) -> (i32, i32, i32) {
    %c0_i32 = arith.constant 0 : i32
    %c0_i32_0 = arith.constant 0 : i32
    %c0_i32_1 = arith.constant 0 : i32
    return %arg0, %c0_i32, %c0_i32_0 : i32, i32, i32
  }
}

</mosaic_0001>

<bundles_post_ra>
// kernel: nyst_classifier_forward.1
= control target key start
LH: loop header
LB: loop body
LE: loop exit
PB: predicated region body
PF: predicated region fallthrough
CT: control target
= control target key end

     0   :  { %vm276_vm0 = vcmask 1043456   ;;  %vm59_vm1 = vcmask 59392   ;;  %vm107_vm2 = vcmask 64512   ;;  %v9649_v1 = vmov 0.0   ;;  %s11525_s1 = inlined_call_operand.vmem [shape: bf16[7,8,64], index: 1, kind: input, shape index: {}]   ;;  %s11526_s0 = inlined_call_operand.vmem [shape: f32[2,300,8], index: 0, kind: input, shape index: {}]   ;;  %s11527_s3 = inlined_call_operand.vmem [shape: bf16[5,64,64], index: 3, kind: input, shape index: {}]   ;;  %s11528_s2 = inlined_call_operand.vmem [shape: f32[1,64], index: 2, kind: input, shape index: {}]   ;;  %s11529_s5 = inlined_call_operand.vmem [shape: bf16[5,64,128], index: 5, kind: input, shape index: {}]   ;;  %s11530_s4 = inlined_call_operand.vmem [shape: f32[1,64], index: 4, kind: input, shape index: {}]   ;;  %s11531_s7 = inlined_call_operand.vmem [shape: bf16[3,128,256], index: 7, kind: input, shape index: {}]   ;;  %s11532_s6 = inlined_call_operand.vmem [shape: f32[1,128], index: 6, kind: input, shape index: {}]   ;;  %s11533_s8 = inlined_call_operand.vmem [shape: f32[1,256], index: 8, kind: input, shape index: {}]   ;;  %s11534_s9 = inlined_call_operand.vmem [shape: bf16[256,128], index: 9, kind: input, shape index: {}]   ;;  %s11535_s11 = inlined_call_operand.vmem [shape: bf16[128,64], index: 11, kind: input, shape index: {}]   ;;  %s11536_s13 = inlined_call_operand.vmem [shape: bf16[64,32], index: 13, kind: input, shape index: {}]   ;;  %s11537_s10 = inlined_call_operand.vmem [shape: f32[1,128], index: 10, kind: input, shape index: {}]   ;;  %s11538_s15 = inlined_call_operand.vmem [shape: bf16[32,1], index: 15, kind: input, shape index: {}]   ;;  %s11539_s12 = inlined_call_operand.vmem [shape: f32[1,64], index: 12, kind: input, shape index: {}]   ;;  %s11540_s16 = inlined_call_operand.<no memory space> [shape: f32[1,1], index: 16, kind: input, shape index: {}]   ;;  %s11541_s14 = inlined_call_operand.vmem [shape: f32[1,32], index: 14, kind: input, shape index: {}]   ;;  %s11542_s17 = inlined_call_operand.vmem [shape: f32[1,2,1], index: 17, kind: output, shape index: {}]  }
   0x1   :  { %11545 = sst [smem:[#allocation7_spill]] %s11525_s1  ;;  %60 = vst.msk [vmem:[#allocation2 + $0x5] sm:$0x7] %vm59_vm1, %v9649_v1  ;;  %61 = vst.msk [vmem:[#allocation2 + $0x134] sm:$0x7] %vm59_vm1, %v9649_v1  ;;  %8492 = vmatprep.subr.bf16.mxu1 %v9649_v1  ;;  %vm145_vm3 = vcmask 60416  }
   0x2   :  { %11546 = sst [smem:[#allocation8_spill]] %s11526_s0  ;;  %s11547_s26 = sld [smem:[#allocation7_spill]]  ;;  %67 = vst [vmem:[#allocation5 + $0x7] sm:$0x1] %v9649_v1  ;;  %vm62_vm4 = vcmask 517120   ;;  %vm9650_vm5 = vmmov 0  }
   0x3   :  { %s11548_s29 = sld [smem:[#allocation8_spill]]  ;;  %63 = vst.msk [vmem:[#allocation3 + $0x6] sm:$0x3] %vm62_vm4, %v9649_v1  ;;  %65 = vst.msk [vmem:[#allocation4 + $0x6] sm:$0x3] %vm62_vm4, %v9649_v1  ;;  %8500 = vmatprep.mubr.msk.bf16.mxu1 %vm9650_vm5, %v9649_v1  ;;  %vm1652_vm6 = vcmask 523264  }
   0x4   :  { %64 = vst.msk [vmem:[#allocation3 + $0x9e] sm:$0x3] %vm62_vm4, %v9649_v1  ;;  %66 = vst.msk [vmem:[#allocation4 + $0x53] sm:$0x3] %vm62_vm4, %v9649_v1  ;;  %vm1671_vm7 = vcmask 521216   ;;  %vm2468_vm8 = vcmask 518144  }
   0x5   :  { %vm3559_vm9 = vcmask 1042432   ;;  %vm6846_vm10 = vcmask 1040384   ;;  %vm7248_vm11 = vcmask 261120   ;;  %vm7298_vm12 = vcmask 1024  }
   0x8   :  { %v7304_v0 = vld [vmem:[%s11547_s26 + $0x4] sm:$0xf]  ;;  %v195_v7 = vld [vmem:[%s11547_s26] sm:$0xf]  ;;  %v7325_v57 = vld [vmem:[%s11547_s26 + $0x8] sm:$0xf] }
   0x9   :  { %v69_v2 = vld [vmem:[%s11548_s29] sm:$0xff]  ;;  %v70_v3 = vld [vmem:[%s11548_s29 + $0x8] sm:$0xff]  ;;  %9374 = vmatprep.subr.msk.bf16.mxu0 %vm276_vm0, %v7304_v0  ;;  %v278_v4 = vsel %vm276_vm0, %v7304_v0, 0  ;;  %v71_v5 = vld [vmem:[%s11548_s29 + $0x10] sm:$0xff]  ;;  %v423_v40 = vsel %vm276_vm0, %v195_v7, 0 }
   0xa   :  { %v72_v6 = vld [vmem:[%s11548_s29 + $0x18] sm:$0xff]  ;;  %108 = vst.msk [vmem:[#allocation2 + $0x8] sm:$0xff] %vm107_vm2, %v69_v2  ;;  %109 = vst.msk [vmem:[#allocation2 + $0x10] sm:$0xff] %vm107_vm2, %v70_v3  ;;  %8339 = vmatpush3.bf16.msra.mxu0 %v278_v4  ;;  %v73_v8 = vld [vmem:[%s11548_s29 + $0x20] sm:$0xff] }
   0xb   :  { %110 = vst.msk [vmem:[#allocation2 + $0x18] sm:$0xff] %vm107_vm2, %v71_v5  ;;  %111 = vst.msk [vmem:[#allocation2 + $0x20] sm:$0xff] %vm107_vm2, %v72_v6  ;;  %v74_v9 = vld [vmem:[%s11548_s29 + $0x28] sm:$0xff]  ;;  %v75_v10 = vld [vmem:[%s11548_s29 + $0x30] sm:$0xff]  ;;  %9375 = vmatprep.subr.msk.bf16.mxu0 %vm276_vm0, %v195_v7 }
   0xc   :  { %v76_v11 = vld [vmem:[%s11548_s29 + $0x38] sm:$0xff]  ;;  %112 = vst.msk [vmem:[#allocation2 + $0x28] sm:$0xff] %vm107_vm2, %v73_v8  ;;  %113 = vst.msk [vmem:[#allocation2 + $0x30] sm:$0xff] %vm107_vm2, %v74_v9  ;;  %v77_v12 = vld [vmem:[%s11548_s29 + $0x40] sm:$0xff] }
   0xd   :  { %114 = vst.msk [vmem:[#allocation2 + $0x38] sm:$0xff] %vm107_vm2, %v75_v10  ;;  %v78_v13 = vld [vmem:[%s11548_s29 + $0x48] sm:$0xff]  ;;  %115 = vst.msk [vmem:[#allocation2 + $0x40] sm:$0xff] %vm107_vm2, %v76_v11  ;;  %v79_v14 = vld [vmem:[%s11548_s29 + $0x50] sm:$0xff] }
   0xe   :  { %v80_v15 = vld [vmem:[%s11548_s29 + $0x58] sm:$0xff]  ;;  %116 = vst.msk [vmem:[#allocation2 + $0x48] sm:$0xff] %vm107_vm2, %v77_v12  ;;  %117 = vst.msk [vmem:[#allocation2 + $0x50] sm:$0xff] %vm107_vm2, %v78_v13  ;;  %v81_v16 = vld [vmem:[%s11548_s29 + $0x60] sm:$0xff] }
   0xf   :  { %118 = vst.msk [vmem:[#allocation2 + $0x58] sm:$0xff] %vm107_vm2, %v79_v14  ;;  %119 = vst.msk [vmem:[#allocation2 + $0x60] sm:$0xff] %vm107_vm2, %v80_v15  ;;  %v82_v17 = vld [vmem:[%s11548_s29 + $0x68] sm:$0xff]  ;;  %v83_v18 = vld [vmem:[%s11548_s29 + $0x70] sm:$0xff] }
  0x10   :  { %v84_v19 = vld [vmem:[%s11548_s29 + $0x78] sm:$0xff]  ;;  %120 = vst.msk [vmem:[#allocation2 + $0x68] sm:$0xff] %vm107_vm2, %v81_v16  ;;  %121 = vst.msk [vmem:[#allocation2 + $0x70] sm:$0xff] %vm107_vm2, %v82_v17  ;;  %v85_v20 = vld [vmem:[%s11548_s29 + $0x80] sm:$0xff] }
  0x11   :  { %122 = vst.msk [vmem:[#allocation2 + $0x78] sm:$0xff] %vm107_vm2, %v83_v18  ;;  %123 = vst.msk [vmem:[#allocation2 + $0x80] sm:$0xff] %vm107_vm2, %v84_v19  ;;  %v86_v21 = vld [vmem:[%s11548_s29 + $0x88] sm:$0xff]  ;;  %v87_v22 = vld [vmem:[%s11548_s29 + $0x90] sm:$0xff]  ;;  %v618_v19 = vsel %vm276_vm0, %v7325_v57, 0 }
  0x12   :  { %v88_v23 = vld [vmem:[%s11548_s29 + $0x98] sm:$0xff]  ;;  %124 = vst.msk [vmem:[#allocation2 + $0x88] sm:$0xff] %vm107_vm2, %v85_v20  ;;  %125 = vst.msk [vmem:[#allocation2 + $0x90] sm:$0xff] %vm107_vm2, %v86_v21  ;;  %v89_v24 = vld [vmem:[%s11548_s29 + $0xa0] sm:$0xff] }
  0x13   :  { %126 = vst.msk [vmem:[#allocation2 + $0x98] sm:$0xff] %vm107_vm2, %v87_v22  ;;  %v90_v25 = vld [vmem:[%s11548_s29 + $0xa8] sm:$0xff]  ;;  %127 = vst.msk [vmem:[#allocation2 + $0xa0] sm:$0xff] %vm107_vm2, %v88_v23  ;;  %v91_v27 = vld [vmem:[%s11548_s29 + $0xb0] sm:$0xff] }
  0x14   :  { %v197_v26 = vld [vmem:[#allocation2 + $0x6] ss:$2 sm:$0xff]  ;;  %v92_v28 = vld [vmem:[%s11548_s29 + $0xb8] sm:$0xff]  ;;  %128 = vst.msk [vmem:[#allocation2 + $0xa8] sm:$0xff] %vm107_vm2, %v89_v24  ;;  %129 = vst.msk [vmem:[#allocation2 + $0xb0] sm:$0xff] %vm107_vm2, %v90_v25 }
  0x15   :  { %v199_v29 = vld [vmem:[#allocation2 + $0x16] ss:$2 sm:$0xff]  ;;  %130 = vst.msk [vmem:[#allocation2 + $0xb8] sm:$0xff] %vm107_vm2, %v91_v27  ;;  %131 = vst.msk [vmem:[#allocation2 + $0xc0] sm:$0xff] %vm107_vm2, %v92_v28  ;;  %v94_v31 = vld [vmem:[%s11548_s29 + $0xc8] sm:$0xff] }
  0x16   :  { %v93_v30 = vld [vmem:[%s11548_s29 + $0xc0] sm:$0xff]  ;;  %v234_v32 = vpack.c.bf16 %v199_v29, %v197_v26  ;;  %v95_v34 = vld [vmem:[%s11548_s29 + $0xd0] sm:$0xff]  ;;  %v96_v35 = vld [vmem:[%s11548_s29 + $0xd8] sm:$0xff]  ;;  %133 = vst.msk [vmem:[#allocation2 + $0xd0] sm:$0xff] %vm107_vm2, %v94_v31 }
  0x17   :  { %v201_v33 = vld [vmem:[#allocation2 + $0x26] ss:$2 sm:$0xff]  ;;  %132 = vst.msk [vmem:[#allocation2 + $0xc8] sm:$0xff] %vm107_vm2, %v93_v30  ;;  %v203_v36 = vld [vmem:[#allocation2 + $0x36] ss:$2 sm:$0xff]  ;;  %134 = vst.msk [vmem:[#allocation2 + $0xd8] sm:$0xff] %vm107_vm2, %v95_v34 }
  0x18   :  { %v205_v37 = vld [vmem:[#allocation2 + $0x46] ss:$2 sm:$0xff]  ;;  %135 = vst.msk [vmem:[#allocation2 + $0xe0] sm:$0xff] %vm107_vm2, %v96_v35  ;;  %8340 = vmatprep.mubr.msk.bf16.mxu0 %vm107_vm2, %v234_v32  ;;  %v235_v39 = vpack.c.bf16 %v203_v36, %v201_v33  ;;  %v207_v41 = vld [vmem:[#allocation2 + $0x56] ss:$2 sm:$0xff] }
  0x19   :  { %v97_v38 = vld [vmem:[%s11548_s29 + $0xe0] sm:$0xff]  ;;  %v98_v42 = vld [vmem:[%s11548_s29 + $0xe8] sm:$0xff]  ;;  %v99_v43 = vld [vmem:[%s11548_s29 + $0xf0] sm:$0xff]  ;;  %v236_v44 = vpack.c.bf16 %v207_v41, %v205_v37 }
  0x1a   :  { %136 = vst.msk [vmem:[#allocation2 + $0xe8] sm:$0xff] %vm107_vm2, %v97_v38  ;;  %v100_v45 = vld [vmem:[%s11548_s29 + $0xf8] sm:$0xff]  ;;  %137 = vst.msk [vmem:[#allocation2 + $0xf0] sm:$0xff] %vm107_vm2, %v98_v42  ;;  %8341 = vmatmul.mubr.msk.bf16.vlgmr.msra.gmra.mrb[0].mxu0 %vm107_vm2, %v235_v39  ;;  %v209_v46 = vld [vmem:[#allocation2 + $0x66] ss:$2 sm:$0xff] }
  0x1b   :  { %138 = vst.msk [vmem:[#allocation2 + $0xf8] sm:$0xff] %vm107_vm2, %v99_v43  ;;  %139 = vst.msk [vmem:[#allocation2 + $0x100] sm:$0xff] %vm107_vm2, %v100_v45  ;;  %v101_v47 = vld [vmem:[%s11548_s29 + $0x100] sm:$0xff]  ;;  %v102_v48 = vld [vmem:[%s11548_s29 + $0x108] sm:$0xff]  ;;  %8361 = vmatpush3.bf16.msra.mxu0 %v423_v40  ;;  %8344 = vmatprep.mubr.msk.bf16.mxu0 %vm107_vm2, %v236_v44 }
  0x1c   :  { %v211_v49 = vld [vmem:[#allocation2 + $0x76] ss:$2 sm:$0xff]  ;;  %v213_v50 = vld [vmem:[#allocation2 + $0x86] ss:$2 sm:$0xff]  ;;  %140 = vst.msk [vmem:[#allocation2 + $0x108] sm:$0xff] %vm107_vm2, %v101_v47  ;;  %141 = vst.msk [vmem:[#allocation2 + $0x110] sm:$0xff] %vm107_vm2, %v102_v48  ;;  %9376 = vmatprep.subr.msk.bf16.mxu0 %vm276_vm0, %v7325_v57 }
  0x1d   :  { %v103_v51 = vld [vmem:[%s11548_s29 + $0x110] sm:$0xff]  ;;  %v104_v53 = vld [vmem:[%s11548_s29 + $0x118] sm:$0xff]  ;;  %v105_v54 = vld [vmem:[%s11548_s29 + $0x120] sm:$0xff]  ;;  %v237_v56 = vpack.c.bf16 %v211_v49, %v209_v46 }
  0x1e   :  { %v215_v52 = vld [vmem:[#allocation2 + $0x96] ss:$2 sm:$0xff]  ;;  %142 = vst.msk [vmem:[#allocation2 + $0x118] sm:$0xff] %vm107_vm2, %v103_v51  ;;  %143 = vst.msk [vmem:[#allocation2 + $0x120] sm:$0xff] %vm107_vm2, %v104_v53  ;;  %v106_v55 = vld [vmem:[%s11548_s29 + $0x128] sm:$0xf] }
  0x1f   :  { %144 = vst.msk [vmem:[#allocation2 + $0x128] sm:$0xff] %vm107_vm2, %v105_v54  ;;  %v238_v58 = vpack.c.bf16 %v215_v52, %v213_v50  ;;  %v217_v59 = vld [vmem:[#allocation2 + $0xa6] ss:$2 sm:$0xff]  ;;  %v219_v60 = vld [vmem:[#allocation2 + $0xb6] ss:$2 sm:$0xff] }
  0x20   :  { %146 = vst.msk [vmem:[#allocation2 + $0x130] sm:$0xf] %vm145_vm3, %v106_v55  ;;  %v221_v61 = vld [vmem:[#allocation2 + $0xc6] ss:$2 sm:$0xff]  ;;  %v223_v62 = vld [vmem:[#allocation2 + $0xd6] ss:$2 sm:$0xff]  ;;  %v239_v63 = vpack.c.bf16 %v219_v60, %v217_v59 }
  0x21   :  { %v240_v0 = vpack.c.bf16 %v223_v62, %v221_v61  ;;  %v225_v2 = vld [vmem:[#allocation2 + $0xe6] ss:$2 sm:$0xff]  ;;  %v148_v9 = vld [vmem:[#allocation2 + $0x5] ss:$2 sm:$0xff]  ;;  %v150_v10 = vld [vmem:[#allocation2 + $0x15] ss:$2 sm:$0xff] }
  0x22   :  { %8345 = vmatmul.mubr.msk.bf16.gmra.mrb[4].mxu0 %vm107_vm2, %v237_v56  ;;  %v227_v3 = vld [vmem:[#allocation2 + $0xf6] ss:$2 sm:$0xff]  ;;  %v185_v12 = vpack.c.bf16 %v150_v10, %v148_v9  ;;  %v152_v13 = vld [vmem:[#allocation2 + $0x25] ss:$2 sm:$0xff]  ;;  %v154_v14 = vld [vmem:[#allocation2 + $0x35] ss:$2 sm:$0xff] }
  0x23   :  { %8348 = vmatprep.mubr.msk.bf16.mxu0 %vm107_vm2, %v238_v58  ;;  %v229_v4 = vld [vmem:[#allocation2 + $0x106] ss:$2 sm:$0xff]  ;;  %v241_v6 = vpack.c.bf16 %v227_v3, %v225_v2  ;;  %v156_v15 = vld [vmem:[#allocation2 + $0x45] ss:$2 sm:$0xff]  ;;  %v158_v16 = vld [vmem:[#allocation2 + $0x55] ss:$2 sm:$0xff]  ;;  %v186_v17 = vpack.c.bf16 %v154_v14, %v152_v13 }
  0x24   :  { %v187_v18 = vpack.c.bf16 %v158_v16, %v156_v15  ;;  %v7336_v20 = vld [vmem:[%s11547_s26 + $0xc] sm:$0xf]  ;;  %v162_v22 = vld [vmem:[#allocation2 + $0x75] ss:$2 sm:$0xff]  ;;  %v7347_v51 = vld [vmem:[%s11547_s26 + $0x10] sm:$0xf] }
  0x25   :  { %v231_v5 = vld [vmem:[#allocation2 + $0x116] ss:$2 sm:$0xff]  ;;  %v160_v21 = vld [vmem:[#allocation2 + $0x65] ss:$2 sm:$0xff]  ;;  %v166_v24 = vld [vmem:[#allocation2 + $0x95] ss:$2 sm:$0xff] }
  0x26   :  { %v242_v7 = vpack.c.bf16 %v231_v5, %v229_v4  ;;  %v164_v23 = vld [vmem:[#allocation2 + $0x85] ss:$2 sm:$0xff]  ;;  %v188_v25 = vpack.c.bf16 %v162_v22, %v160_v21  ;;  %v170_v28 = vld [vmem:[#allocation2 + $0xb5] ss:$2 sm:$0xff]  ;;  %v832_v50 = vsel %vm276_vm0, %v7336_v20, 0  ;;  %v1046_v22 = vsel %vm276_vm0, %v7347_v51, 0 }
  0x27   :  { %v233_v8 = vld [vmem:[#allocation2 + $0x126] ss:$2 sm:$0x3f]  ;;  %v189_v26 = vpack.c.bf16 %v166_v24, %v164_v23  ;;  %v168_v27 = vld [vmem:[#allocation2 + $0xa5] ss:$2 sm:$0xff] }
  0x28   :  { %v243_v11 = vpack.c.bf16 %v233_v8, %v233_v8  ;;  %v172_v29 = vld [vmem:[#allocation2 + $0xc5] ss:$2 sm:$0xff]  ;;  %v174_v30 = vld [vmem:[#allocation2 + $0xd5] ss:$2 sm:$0xff]  ;;  %v190_v31 = vpack.c.bf16 %v170_v28, %v168_v27  ;;  %v752_v8 = vld [vmem:[#allocation2 + $0x8] ss:$2 sm:$0xff] }
  0x29   :  { %v191_v32 = vpack.c.bf16 %v174_v30, %v172_v29  ;;  %v176_v33 = vld [vmem:[#allocation2 + $0xe5] ss:$2 sm:$0xff]  ;;  %v178_v34 = vld [vmem:[#allocation2 + $0xf5] ss:$2 sm:$0xff]  ;;  %v9951_v10 = vld [vmem:[#allocation2 + $0xa] ss:$2 sm:$0xff] }
  0x2a   :  { %8349 = vmatmul.mubr.msk.bf16.gmra.mrb[8].mxu0 %vm107_vm2, %v239_v63  ;;  %v180_v35 = vld [vmem:[#allocation2 + $0x105] ss:$2 sm:$0xff]  ;;  %v182_v36 = vld [vmem:[#allocation2 + $0x115] ss:$2 sm:$0xff]  ;;  %v192_v37 = vpack.c.bf16 %v178_v34, %v176_v33  ;;  %v754_v13 = vld [vmem:[#allocation2 + $0x18] ss:$2 sm:$0xff] }
  0x2b   :  { %8352 = vmatprep.mubr.msk.bf16.mxu0 %vm107_vm2, %v240_v0  ;;  %v193_v38 = vpack.c.bf16 %v182_v36, %v180_v35  ;;  %v184_v39 = vld [vmem:[#allocation2 + $0x125] ss:$2 sm:$0x3f]  ;;  %v789_v15 = vpack.c.bf16 %v754_v13, %v752_v8  ;;  %v756_v16 = vld [vmem:[#allocation2 + $0x28] ss:$2 sm:$0xff] }
  0x2c   :  { %v538_v40 = vld [vmem:[#allocation2 + $0x7] ss:$2 sm:$0xff]  ;;  %v540_v41 = vld [vmem:[#allocation2 + $0x17] ss:$2 sm:$0xff]  ;;  %v194_v42 = vpack.c.bf16 %v184_v39, %v184_v39  ;;  %v764_v24 = vld [vmem:[#allocation2 + $0x68] ss:$2 sm:$0xff] }
  0x2d   :  { %v575_v43 = vpack.c.bf16 %v540_v41, %v538_v40  ;;  %v542_v44 = vld [vmem:[#allocation2 + $0x27] ss:$2 sm:$0xff]  ;;  %v544_v45 = vld [vmem:[#allocation2 + $0x37] ss:$2 sm:$0xff]  ;;  %v770_v27 = vld [vmem:[#allocation2 + $0x98] ss:$2 sm:$0xff] }
  0x2e   :  { %v546_v46 = vld [vmem:[#allocation2 + $0x47] ss:$2 sm:$0xff]  ;;  %v548_v47 = vld [vmem:[#allocation2 + $0x57] ss:$2 sm:$0xff]  ;;  %v576_v48 = vpack.c.bf16 %v544_v45, %v542_v44  ;;  %v772_v30 = vld [vmem:[#allocation2 + $0xa8] ss:$2 sm:$0xff] }
  0x2f   :  { %v577_v49 = vpack.c.bf16 %v548_v47, %v546_v46  ;;  %v550_v52 = vld [vmem:[#allocation2 + $0x67] ss:$2 sm:$0xff]  ;;  %v552_v53 = vld [vmem:[#allocation2 + $0x77] ss:$2 sm:$0xff]  ;;  %v778_v33 = vld [vmem:[#allocation2 + $0xd8] ss:$2 sm:$0xff] }
  0x30   :  { %v554_v54 = vld [vmem:[#allocation2 + $0x87] ss:$2 sm:$0xff]  ;;  %v556_v55 = vld [vmem:[#allocation2 + $0x97] ss:$2 sm:$0xff]  ;;  %v578_v56 = vpack.c.bf16 %v552_v53, %v550_v52  ;;  %v780_v36 = vld [vmem:[#allocation2 + $0xe8] ss:$2 sm:$0xff] }
  0x31   :  { %v579_v57 = vpack.c.bf16 %v556_v55, %v554_v54  ;;  %v558_v58 = vld [vmem:[#allocation2 + $0xa7] ss:$2 sm:$0xff]  ;;  %v560_v59 = vld [vmem:[#allocation2 + $0xb7] ss:$2 sm:$0xff]  ;;  %v786_v39 = vld [vmem:[#allocation2 + $0x118] ss:$2 sm:$0xff] }
  0x32   :  { %8353 = vmatmul.mubr.msk.bf16.gmra.mrb[12].mxu0 %vm107_vm2, %v241_v6  ;;  %v562_v60 = vld [vmem:[#allocation2 + $0xc7] ss:$2 sm:$0xff]  ;;  %v564_v61 = vld [vmem:[#allocation2 + $0xd7] ss:$2 sm:$0xff]  ;;  %v580_v62 = vpack.c.bf16 %v560_v59, %v558_v58 }
  0x33   :  { %8356 = vmatprep.mubr.msk.bf16.mxu0 %vm107_vm2, %v242_v7  ;;  %v581_v63 = vpack.c.bf16 %v564_v61, %v562_v60  ;;  %v566_v0 = vld [vmem:[#allocation2 + $0xe7] ss:$2 sm:$0xff]  ;;  %v568_v2 = vld [vmem:[#allocation2 + $0xf7] ss:$2 sm:$0xff] }
  0x34   :  { %v570_v3 = vld [vmem:[#allocation2 + $0x107] ss:$2 sm:$0xff]  ;;  %v572_v4 = vld [vmem:[#allocation2 + $0x117] ss:$2 sm:$0xff]  ;;  %v582_v5 = vpack.c.bf16 %v568_v2, %v566_v0 }
  0x35   :  { %v583_v6 = vpack.c.bf16 %v572_v4, %v570_v3  ;;  %v574_v7 = vld [vmem:[#allocation2 + $0x127] ss:$2 sm:$0x3f]  ;;  %v7358_v23 = vld [vmem:[%s11547_s26 + $0x14] sm:$0xf] }
  0x36   :  { %v966_v9 = vld [vmem:[#allocation2 + $0x9] ss:$2 sm:$0xff]  ;;  %v584_v14 = vpack.c.bf16 %v574_v7, %v574_v7  ;;  %v9972_v44 = vld [vmem:[#allocation2 + $0x12a] ss:$2 sm:$0x3f] }
  0x37   :  { %v9975_v45 = vld [vmem:[#allocation2 + $0x12b] ss:$2 sm:$0x3f]  ;;  %v7644_v46 = vld [vmem:[%s11548_s29 + $0x258] sm:$0xf] }
  0x38   :  { %v968_v47 = vld [vmem:[#allocation2 + $0x19] ss:$2 sm:$0xff]  ;;  %v974_v52 = vld [vmem:[#allocation2 + $0x49] ss:$2 sm:$0xff] }
  0x39   :  { %v976_v53 = vld [vmem:[#allocation2 + $0x59] ss:$2 sm:$0xff]  ;;  %v978_v58 = vld [vmem:[#allocation2 + $0x69] ss:$2 sm:$0xff] }
  0x3a   :  { %8357 = vmatmul.mubr.msk.bf16.gmra.mrb[16].mxu0 %vm107_vm2, %v243_v11  ;;  %v9953_v11 = vld [vmem:[#allocation2 + $0xb] ss:$2 sm:$0xff]  ;;  %v1005_v55 = vpack.c.bf16 %v976_v53, %v974_v52 }
  0x3b   :  { %8362 = vmatprep.mubr.msk.bf16.mxu0 %vm107_vm2, %v185_v12  ;;  %v7607_v12 = vld [vmem:[%s11548_s29 + $0x130] sm:$0xff]  ;;  %v980_v59 = vld [vmem:[#allocation2 + $0x79] ss:$2 sm:$0xff] }
  0x3c   :  { %3616 = vst.msk [vmem:[#allocation2 + $0x8] sm:$0xff] %vm107_vm2, %v7607_v12  ;;  %v982_v60 = vld [vmem:[#allocation2 + $0x89] ss:$2 sm:$0xff]  ;;  %v984_v61 = vld [vmem:[#allocation2 + $0x99] ss:$2 sm:$0xff] }
  0x3d   :  { %v986_v0 = vld [vmem:[#allocation2 + $0xa9] ss:$2 sm:$0xff]  ;;  %v988_v2 = vld [vmem:[#allocation2 + $0xb9] ss:$2 sm:$0xff] }
  0x3e   :  { %v990_v3 = vld [vmem:[#allocation2 + $0xc9] ss:$2 sm:$0xff]  ;;  %v992_v4 = vld [vmem:[#allocation2 + $0xd9] ss:$2 sm:$0xff] }
  0x3f   :  { %v994_v7 = vld [vmem:[#allocation2 + $0xe9] ss:$2 sm:$0xff]  ;;  %v996_v8 = vld [vmem:[#allocation2 + $0xf9] ss:$2 sm:$0xff] }
  0x40   :  { %v1000_v12 = vld [vmem:[#allocation2 + $0x119] ss:$2 sm:$0xff]  ;;  %v1010_v13 = vpack.c.bf16 %v996_v8, %v994_v7 }
  0x41   :  { %v1406_v53 = vld [vmem:[#allocation2 + $0x6b] ss:$2 sm:$0xff]  ;;  %v1428_v7 = vld [vmem:[#allocation2 + $0x11b] ss:$2 sm:$0xff] }
  0x42   :  { %8363 = vmatmul.mubr.msk.bf16.vlgmr.msra.gmra.mrb[0].mxu0 %vm107_vm2, %v186_v17  ;;  %v758_v17 = vld [vmem:[#allocation2 + $0x38] ss:$2 sm:$0xff] }
  0x43   :  { %8383 = vmatpush3.bf16.msra.mxu0 %v618_v19  ;;  %8366 = vmatprep.mubr.msk.bf16.mxu0 %vm107_vm2, %v187_v18  ;;  %v760_v18 = vld [vmem:[#allocation2 + $0x48] ss:$2 sm:$0xff]  ;;  %v762_v19 = vld [vmem:[#allocation2 + $0x58] ss:$2 sm:$0xff] }
  0x44   :  { %9377 = vmatprep.subr.msk.bf16.mxu0 %vm276_vm0, %v7336_v20  ;;  %v790_v20 = vpack.c.bf16 %v758_v17, %v756_v16  ;;  %v791_v21 = vpack.c.bf16 %v762_v19, %v760_v18  ;;  %v1184_v18 = vld [vmem:[#allocation2 + $0x2a] ss:$2 sm:$0xff]  ;;  %v1186_v19 = vld [vmem:[#allocation2 + $0x3a] ss:$2 sm:$0xff] }
  0x4a   :  { %8367 = vmatmul.mubr.msk.bf16.gmra.mrb[4].mxu0 %vm107_vm2, %v188_v25  ;;  %v766_v25 = vld [vmem:[#allocation2 + $0x78] ss:$2 sm:$0xff] }
  0x4b   :  { %8370 = vmatprep.mubr.msk.bf16.mxu0 %vm107_vm2, %v189_v26  ;;  %v768_v26 = vld [vmem:[#allocation2 + $0x88] ss:$2 sm:$0xff]  ;;  %v792_v28 = vpack.c.bf16 %v766_v25, %v764_v24 }
  0x4c   :  { %v793_v29 = vpack.c.bf16 %v770_v27, %v768_v26  ;;  %v1192_v25 = vld [vmem:[#allocation2 + $0x6a] ss:$2 sm:$0xff]  ;;  %v1194_v26 = vld [vmem:[#allocation2 + $0x7a] ss:$2 sm:$0xff] }
  0x4d   :  { %v1198_v27 = vld [vmem:[#allocation2 + $0x9a] ss:$2 sm:$0xff] }
  0x52   :  { %8371 = vmatmul.mubr.msk.bf16.gmra.mrb[8].mxu0 %vm107_vm2, %v190_v31  ;;  %v774_v31 = vld [vmem:[#allocation2 + $0xb8] ss:$2 sm:$0xff] }
  0x53   :  { %8374 = vmatprep.mubr.msk.bf16.mxu0 %vm107_vm2, %v191_v32  ;;  %v776_v32 = vld [vmem:[#allocation2 + $0xc8] ss:$2 sm:$0xff]  ;;  %v794_v34 = vpack.c.bf16 %v774_v31, %v772_v30 }
  0x54   :  { %v795_v35 = vpack.c.bf16 %v778_v33, %v776_v32  ;;  %v1200_v30 = vld [vmem:[#allocation2 + $0xaa] ss:$2 sm:$0xff]  ;;  %v1202_v31 = vld [vmem:[#allocation2 + $0xba] ss:$2 sm:$0xff] }
  0x55   :  { %v1204_v32 = vld [vmem:[#allocation2 + $0xca] ss:$2 sm:$0xff]  ;;  %v1206_v33 = vld [vmem:[#allocation2 + $0xda] ss:$2 sm:$0xff] }
  0x5a   :  { %8375 = vmatmul.mubr.msk.bf16.gmra.mrb[12].mxu0 %vm107_vm2, %v192_v37  ;;  %v782_v37 = vld [vmem:[#allocation2 + $0xf8] ss:$2 sm:$0xff] }
  0x5b   :  { %8378 = vmatprep.mubr.msk.bf16.mxu0 %vm107_vm2, %v193_v38  ;;  %v784_v38 = vld [vmem:[#allocation2 + $0x108] ss:$2 sm:$0xff]  ;;  %v796_v40 = vpack.c.bf16 %v782_v37, %v780_v36 }
  0x5c   :  { %v797_v41 = vpack.c.bf16 %v786_v39, %v784_v38  ;;  %v1208_v36 = vld [vmem:[#allocation2 + $0xea] ss:$2 sm:$0xff]  ;;  %v1210_v37 = vld [vmem:[#allocation2 + $0xfa] ss:$2 sm:$0xff] }
  0x5d   :  { %v1212_v38 = vld [vmem:[#allocation2 + $0x10a] ss:$2 sm:$0xff]  ;;  %v1214_v39 = vld [vmem:[#allocation2 + $0x11a] ss:$2 sm:$0xff] }
  0x62   :  { %8379 = vmatmul.mubr.msk.bf16.gmra.mrb[20].mxu0 %vm107_vm2, %v194_v42  ;;  %v788_v42 = vld [vmem:[#allocation2 + $0x128] ss:$2 sm:$0x3f] }
  0x63   :  { %8384 = vmatprep.mubr.msk.bf16.mxu0 %vm107_vm2, %v575_v43  ;;  %v1002_v43 = vld [vmem:[#allocation2 + $0x129] ss:$2 sm:$0x3f] }
  0x64   :  { %3653 = vst.msk [vmem:[#allocation2 + $0x130] sm:$0xf] %vm145_vm3, %v7644_v46  ;;  %v1012_v16 = vpack.c.bf16 %v1002_v43, %v1002_v43  ;;  %v1226_v43 = vpack.c.bf16 %v9972_v44, %v9972_v44  ;;  %v1412_v44 = vld [vmem:[#allocation2 + $0x9b] ss:$2 sm:$0xff] }
  0x6a   :  { %8385 = vmatmul.mubr.msk.bf16.vlgmr.msra.gmra.mrb[0].mxu0 %vm107_vm2, %v576_v48  ;;  %v798_v48 = vpack.c.bf16 %v788_v42, %v788_v42  ;;  %v1396_v42 = vld [vmem:[#allocation2 + $0x1b] ss:$2 sm:$0xff] }
  0x6b   :  { %8405 = vmatpush3.bf16.msra.mxu0 %v832_v50  ;;  %8388 = vmatprep.mubr.msk.bf16.mxu0 %vm107_vm2, %v577_v49  ;;  %v1003_v49 = vpack.c.bf16 %v968_v47, %v966_v9  ;;  %v970_v50 = vld [vmem:[#allocation2 + $0x29] ss:$2 sm:$0xff]  ;;  %v1431_v46 = vpack.c.bf16 %v1396_v42, %v9953_v11 }
  0x6c   :  { %9378 = vmatprep.subr.msk.bf16.mxu0 %vm276_vm0, %v7347_v51  ;;  %v972_v51 = vld [vmem:[#allocation2 + $0x39] ss:$2 sm:$0xff]  ;;  %v998_v9 = vld [vmem:[#allocation2 + $0x109] ss:$2 sm:$0xff] }
  0x6d   :  { %v1004_v54 = vpack.c.bf16 %v972_v51, %v970_v50  ;;  %v1398_v47 = vld [vmem:[#allocation2 + $0x2b] ss:$2 sm:$0xff]  ;;  %v1404_v50 = vld [vmem:[#allocation2 + $0x5b] ss:$2 sm:$0xff] }
  0x72   :  { %8389 = vmatmul.mubr.msk.bf16.gmra.mrb[4].mxu0 %vm107_vm2, %v578_v56  ;;  %v1260_v56 = vsel %vm276_vm0, %v7358_v23, 0 }
  0x73   :  { %8392 = vmatprep.mubr.msk.bf16.mxu0 %vm107_vm2, %v579_v57  ;;  %v7369_v57 = vld [vmem:[%s11547_s26 + $0x18] sm:$0xf] }
  0x74   :  { %v1474_v24 = vsel %vm276_vm0, %v7369_v57, 0 }
  0x7a   :  { %8393 = vmatmul.mubr.msk.bf16.gmra.mrb[8].mxu0 %vm107_vm2, %v580_v62  ;;  %v1006_v62 = vpack.c.bf16 %v980_v59, %v978_v58 }
  0x7b   :  { %8396 = vmatprep.mubr.msk.bf16.mxu0 %vm107_vm2, %v581_v63  ;;  %v1007_v63 = vpack.c.bf16 %v984_v61, %v982_v60  ;;  %v1414_v61 = vld [vmem:[#allocation2 + $0xab] ss:$2 sm:$0xff] }
  0x82   :  { %8397 = vmatmul.mubr.msk.bf16.gmra.mrb[12].mxu0 %vm107_vm2, %v582_v5  ;;  %v1008_v5 = vpack.c.bf16 %v988_v2, %v986_v0  ;;  %v1420_v0 = vld [vmem:[#allocation2 + $0xdb] ss:$2 sm:$0xff] }
  0x83   :  { %8400 = vmatprep.mubr.msk.bf16.mxu0 %vm107_vm2, %v583_v6  ;;  %v1009_v6 = vpack.c.bf16 %v992_v4, %v990_v3  ;;  %v1422_v4 = vld [vmem:[#allocation2 + $0xeb] ss:$2 sm:$0xff] }
  0x8a   :  { %8401 = vmatmul.mubr.msk.bf16.gmra.mrb[24].mxu0 %vm107_vm2, %v584_v14  ;;  %v1011_v14 = vpack.c.bf16 %v1000_v12, %v998_v9  ;;  %v1440_v12 = vpack.c.bf16 %v9975_v45, %v9975_v45 }
  0x8b   :  { %8406 = vmatprep.mubr.msk.bf16.mxu0 %vm107_vm2, %v789_v15  ;;  %v1182_v15 = vld [vmem:[#allocation2 + $0x1a] ss:$2 sm:$0xff] }
  0x8c   :  { %v1217_v17 = vpack.c.bf16 %v1182_v15, %v9951_v10  ;;  %v1196_v10 = vld [vmem:[#allocation2 + $0x8a] ss:$2 sm:$0xff] }
  0x92   :  { %8407 = vmatmul.mubr.msk.bf16.vlgmr.msra.gmra.mrb[0].mxu0 %vm107_vm2, %v790_v20  ;;  %v1188_v20 = vld [vmem:[#allocation2 + $0x4a] ss:$2 sm:$0xff] }
  0x93   :  { %8427 = vmatpush3.bf16.msra.mxu0 %v1046_v22  ;;  %8410 = vmatprep.mubr.msk.bf16.mxu0 %vm107_vm2, %v791_v21  ;;  %v1190_v21 = vld [vmem:[#allocation2 + $0x5a] ss:$2 sm:$0xff]  ;;  %v1218_v22 = vpack.c.bf16 %v1186_v19, %v1184_v18 }
  0x94   :  { %9379 = vmatprep.subr.msk.bf16.mxu0 %vm276_vm0, %v7358_v23  ;;  %v1219_v23 = vpack.c.bf16 %v1190_v21, %v1188_v20 }
  0x9a   :  { %8411 = vmatmul.mubr.msk.bf16.gmra.mrb[4].mxu0 %vm107_vm2, %v792_v28  ;;  %v1220_v28 = vpack.c.bf16 %v1194_v26, %v1192_v25 }
  0x9b   :  { %8414 = vmatprep.mubr.msk.bf16.mxu0 %vm107_vm2, %v793_v29  ;;  %v1221_v29 = vpack.c.bf16 %v1198_v27, %v1196_v10  ;;  %v9392_v10 = vld [vmem:[%s11527_s3 + $0x28] sm:$0xff]   ;;  %v9393_v27 = vld [vmem:[%s11527_s3 + $0x30] sm:$0xff]  }
  0xa2   :  { %8415 = vmatmul.mubr.msk.bf16.gmra.mrb[8].mxu0 %vm107_vm2, %v794_v34  ;;  %v1222_v34 = vpack.c.bf16 %v1202_v31, %v1200_v30 }
  0xa3   :  { %8418 = vmatprep.mubr.msk.bf16.mxu0 %vm107_vm2, %v795_v35  ;;  %v1223_v35 = vpack.c.bf16 %v1206_v33, %v1204_v32 }
  0xaa   :  { %8419 = vmatmul.mubr.msk.bf16.gmra.mrb[12].mxu0 %vm107_vm2, %v796_v40  ;;  %v1224_v40 = vpack.c.bf16 %v1210_v37, %v1208_v36 }
  0xab   :  { %8422 = vmatprep.mubr.msk.bf16.mxu0 %vm107_vm2, %v797_v41  ;;  %v1225_v41 = vpack.c.bf16 %v1214_v39, %v1212_v38 }
  0xb2   :  { %8423 = vmatmul.mubr.msk.bf16.gmra.mrb[28].mxu0 %vm107_vm2, %v798_v48  ;;  %v1400_v48 = vld [vmem:[#allocation2 + $0x3b] ss:$2 sm:$0xff] }
  0xb3   :  { %8428 = vmatprep.mubr.msk.bf16.mxu0 %vm107_vm2, %v1003_v49  ;;  %v1402_v49 = vld [vmem:[#allocation2 + $0x4b] ss:$2 sm:$0xff]  ;;  %v1432_v51 = vpack.c.bf16 %v1400_v48, %v1398_v47 }
  0xb4   :  { %v1433_v52 = vpack.c.bf16 %v1404_v50, %v1402_v49 }
  0xba   :  { %8429 = vmatmul.mubr.msk.bf16.vlgmr.msra.gmra.mrb[0].mxu0 %vm107_vm2, %v1004_v54  ;;  %v1408_v54 = vld [vmem:[#allocation2 + $0x7b] ss:$2 sm:$0xff] }
  0xbb   :  { %8449 = vmatpush3.bf16.msra.mxu0 %v1260_v56  ;;  %8432 = vmatprep.mubr.msk.bf16.mxu0 %vm107_vm2, %v1005_v55  ;;  %v1410_v55 = vld [vmem:[#allocation2 + $0x8b] ss:$2 sm:$0xff] }
  0xbc   :  { %9380 = vmatprep.subr.msk.bf16.mxu0 %vm276_vm0, %v7369_v57  ;;  %v1434_v57 = vpack.c.bf16 %v1408_v54, %v1406_v53  ;;  %v1435_v59 = vpack.c.bf16 %v1412_v44, %v1410_v55 }
  0xc2   :  { %8433 = vmatmul.mubr.msk.bf16.gmra.mrb[4].mxu0 %vm107_vm2, %v1006_v62  ;;  %v1416_v62 = vld [vmem:[#allocation2 + $0xbb] ss:$2 sm:$0xff] }
  0xc3   :  { %8436 = vmatprep.mubr.msk.bf16.mxu0 %vm107_vm2, %v1007_v63  ;;  %v1418_v63 = vld [vmem:[#allocation2 + $0xcb] ss:$2 sm:$0xff]  ;;  %v1436_v2 = vpack.c.bf16 %v1416_v62, %v1414_v61 }
  0xc4   :  { %v1437_v3 = vpack.c.bf16 %v1420_v0, %v1418_v63 }
  0xca   :  { %8437 = vmatmul.mubr.msk.bf16.gmra.mrb[8].mxu0 %vm107_vm2, %v1008_v5  ;;  %v1424_v5 = vld [vmem:[#allocation2 + $0xfb] ss:$2 sm:$0xff] }
  0xcb   :  { %8440 = vmatprep.mubr.msk.bf16.mxu0 %vm107_vm2, %v1009_v6  ;;  %v1426_v6 = vld [vmem:[#allocation2 + $0x10b] ss:$2 sm:$0xff]  ;;  %v1438_v8 = vpack.c.bf16 %v1424_v5, %v1422_v4 }
  0xcc   :  { %v1439_v9 = vpack.c.bf16 %v1428_v7, %v1426_v6 }
  0xd2   :  { %8441 = vmatmul.mubr.msk.bf16.gmra.mrb[12].mxu0 %vm107_vm2, %v1010_v13 }
  0xd3   :  { %8444 = vmatprep.mubr.msk.bf16.mxu0 %vm107_vm2, %v1011_v14 }
  0xda   :  { %8445 = vmatmul.mubr.msk.bf16.gmra.mrb[32].mxu0 %vm107_vm2, %v1012_v16 }
  0xdb   :  { %8450 = vmatprep.mubr.msk.bf16.mxu0 %vm107_vm2, %v1217_v17 }
  0xe2   :  { %8451 = vmatmul.mubr.msk.bf16.vlgmr.msra.gmra.mrb[0].mxu0 %vm107_vm2, %v1218_v22 }
  0xe3   :  { %8471 = vmatpush3.bf16.msra.mxu0 %v1474_v24  ;;  %8454 = vmatprep.mubr.msk.bf16.mxu0 %vm107_vm2, %v1219_v23  ;;  %v9391_v23 = vld [vmem:[%s11527_s3 + $0x20] sm:$0xff]  }
  0xe4   :  { %8692 = vmatprep.subr.bf16.mxu0 %v9649_v1  ;;  %8493 = vmatpush3.bf16.msra.mxu1 %v9391_v23 }
  0xe5   :  { %8494 = vmatprep.subr.bf16.mxu1 %v9649_v1 }
  0xe8   :  { %8495 = vmatpush3.bf16.msra.mxu1 %v9392_v10 }
  0xe9   :  { %8496 = vmatprep.subr.bf16.mxu1 %v9649_v1 }
  0xea   :  { %8455 = vmatmul.mubr.msk.bf16.gmra.mrb[4].mxu0 %vm107_vm2, %v1220_v28  ;;  %v9394_v28 = vld [vmem:[%s11527_s3 + $0x38] sm:$0xff]  }
  0xeb   :  { %8458 = vmatprep.mubr.msk.bf16.mxu0 %vm107_vm2, %v1221_v29 }
  0xec   :  { %8497 = vmatpush3.bf16.msra.mxu1 %v9393_v27 }
  0xed   :  { %8498 = vmatprep.subr.bf16.mxu1 %v9649_v1 }
  0xf0   :  { %8499 = vmatpush3.bf16.msra.mxu1 %v9394_v28 }
  0xf1   :  { %8520 = vmatprep.subr.bf16.mxu1 %v9649_v1 }
  0xf2   :  { %8459 = vmatmul.mubr.msk.bf16.gmra.mrb[8].mxu0 %vm107_vm2, %v1222_v34 }
  0xf3   :  { %8462 = vmatprep.mubr.msk.bf16.mxu0 %vm107_vm2, %v1223_v35 }
  0xfa   :  { %8463 = vmatmul.mubr.msk.bf16.gmra.mrb[12].mxu0 %vm107_vm2, %v1224_v40 }
  0xfb   :  { %8466 = vmatprep.mubr.msk.bf16.mxu0 %vm107_vm2, %v1225_v41 }
 0x102   :  { %8467 = vmatmul.mubr.msk.bf16.gmra.mrb[36].mxu0 %vm107_vm2, %v1226_v43 }
 0x103   :  { %8472 = vmatprep.mubr.msk.bf16.mxu0 %vm107_vm2, %v1431_v46 }
 0x10a   :  { %8473 = vmatmul.mubr.msk.bf16.vlgmr.msra.gmra.mrb[0].mxu0 %vm107_vm2, %v1432_v51 }
 0x10b   :  { %8476 = vmatprep.mubr.msk.bf16.mxu0 %vm107_vm2, %v1433_v52  ;;  %v10059_v52 = vld [vmem:[%s11528_s2] ss:$0 sm:$0xff] }
 0x10d   :  { %v8358_v56 = vpop.f32.mrb[16].mxu0 }
 0x10e   :  { %v378_v11 = vpop.f32.mrb[17].mxu0 }
 0x10f   :  { %v8359_v58 = vpop.f32.mrb[18].mxu0 }
 0x110   :  { %v381_v60 = vpop.f32.mrb[19].mxu0 }
 0x112   :  { %8477 = vmatmul.mubr.msk.bf16.gmra.mrb[4].mxu0 %vm107_vm2, %v1434_v57 }
 0x113   :  { %8480 = vmatprep.mubr.msk.bf16.mxu0 %vm107_vm2, %v1435_v59 }
 0x11a   :  { %8481 = vmatmul.mubr.msk.bf16.gmra.mrb[8].mxu0 %vm107_vm2, %v1436_v2 }
 0x11b   :  { %8484 = vmatprep.mubr.msk.bf16.mxu0 %vm107_vm2, %v1437_v3 }
 0x122   :  { %8485 = vmatmul.mubr.msk.bf16.gmra.mrb[12].mxu0 %vm107_vm2, %v1438_v8 }
 0x123   :  { %8488 = vmatprep.mubr.msk.bf16.mxu0 %vm107_vm2, %v1439_v9 }
 0x12a   :  { %8489 = vmatmul.mubr.msk.bf16.gmra.mrb[40].mxu0 %vm107_vm2, %v1440_v12 }
 0x12b   :  { %8700 = vmatprep.mubr.msk.bf16.mxu0 %vm9650_vm5, %v9649_v1 }
 0x135   :  { %v8380_v13 = vpop.f32.mrb[20].mxu0 }
 0x136   :  { %v532_v14 = vadd.f32 %v8380_v13, %v8358_v56  ;;  %v523_v15 = vpop.f32.mrb[21].mxu0 }
 0x137   :  { %v524_v16 = vadd.f32 %v523_v15, %v378_v11  ;;  %v8381_v17 = vpop.f32.mrb[22].mxu0 }
 0x138   :  { %v526_v18 = vpop.f32.mrb[23].mxu0 }
 0x139   :  { %v527_v19 = vadd.f32 %v526_v18, %v381_v60 }
 0x15d   :  { %v8402_v20 = vpop.f32.mrb[24].mxu0 }
 0x15e   :  { %v750_v21 = vadd.f32 %v8402_v20, %v532_v14  ;;  %v718_v22 = vpop.f32.mrb[25].mxu0 }
 0x15f   :  { %v748_v24 = vadd.f32 %v718_v22, %v524_v16  ;;  %v8403_v25 = vpop.f32.mrb[26].mxu0  ;;  %v9395_v16 = vld [vmem:[%s11527_s3] sm:$0xff]  }
 0x160   :  { %v721_v26 = vpop.f32.mrb[27].mxu0 }
 0x161   :  { %v749_v45 = vadd.f32 %v721_v26, %v527_v19  ;;  %v9396_v26 = vld [vmem:[%s11527_s3 + $0x8] sm:$0xff]  }
 0x185   :  { %v8424_v29 = vpop.f32.mrb[28].mxu0 }
 0x186   :  { %v964_v30 = vadd.f32 %v8424_v29, %v750_v21  ;;  %v932_v31 = vpop.f32.mrb[29].mxu0 }
 0x187   :  { %v962_v32 = vadd.f32 %v932_v31, %v748_v24  ;;  %v8425_v33 = vpop.f32.mrb[30].mxu0  ;;  %v9397_v31 = vld [vmem:[%s11527_s3 + $0x10] sm:$0xff]  }
 0x188   :  { %v935_v34 = vpop.f32.mrb[31].mxu0 }
 0x189   :  { %v963_v35 = vadd.f32 %v935_v34, %v749_v45 }
 0x1ad   :  { %v8446_v36 = vpop.f32.mrb[32].mxu0 }
 0x1ae   :  { %v1178_v37 = vadd.f32 %v8446_v36, %v964_v30  ;;  %v1146_v38 = vpop.f32.mrb[33].mxu0 }
 0x1af   :  { %v1176_v39 = vadd.f32 %v1146_v38, %v962_v32  ;;  %v8447_v40 = vpop.f32.mrb[34].mxu0 }
 0x1b0   :  { %v1149_v41 = vpop.f32.mrb[35].mxu0 }
 0x1b1   :  { %v1177_v42 = vadd.f32 %v1149_v41, %v963_v35  ;;  %v9398_v41 = vld [vmem:[%s11527_s3 + $0x18] sm:$0xff]  }
 0x1d5   :  { %v8468_v43 = vpop.f32.mrb[36].mxu0 }
 0x1d6   :  { %v10050_v46 = vadd.f32 %v8468_v43, %v1178_v37  ;;  %v1360_v47 = vpop.f32.mrb[37].mxu0 }
 0x1d7   :  { %v10052_v48 = vadd.f32 %v1360_v47, %v1176_v39  ;;  %v8469_v49 = vpop.f32.mrb[38].mxu0 }
 0x1d8   :  { %v1363_v50 = vpop.f32.mrb[39].mxu0 }
 0x1d9   :  { %v10054_v51 = vadd.f32 %v1363_v50, %v1177_v42 }
 0x1dd   :  { %v8474_v53 = vpop.f32.mrb[0].mxu0 }
 0x1de   :  { %v1616_v54 = vadd.f32 %v8474_v53, %v10059_v52  ;;  %v1510_v55 = vpop.f32.mrb[1].mxu0 }
 0x1df   :  { %v1614_v44 = vadd.f32 %v10059_v52, %v1510_v55  ;;  %v8475_v56 = vpop.f32.mrb[2].mxu0 }
 0x1e0   :  { %v1635_v11 = vmax.f32 %v1616_v54, 0.0  ;;  %v1617_v57 = vadd.f32 %v8475_v56, %v10059_v52  ;;  %v1513_v58 = vpop.f32.mrb[3].mxu0 }
 0x1e1   :  { %v1633_v59 = vmax.f32 %v1614_v44, 0.0  ;;  %v1615_v60 = vadd.f32 %v10059_v52, %v1513_v58 }
 0x1e2   :  { %1655 = vst.msk [vmem:[#allocation3 + $0x18] sm:$0xff] %vm1652_vm6, %v1635_v11  ;;  %v1636_v61 = vmax.f32 %v1617_v57, 0.0 }
 0x1e3   :  { %1653 = vst.msk [vmem:[#allocation3 + $0x8] sm:$0xff] %vm1652_vm6, %v1633_v59  ;;  %v1634_v62 = vmax.f32 %v1615_v60, 0.0 }
 0x1e4   :  { %1656 = vst.msk [vmem:[#allocation3 + $0x20] sm:$0xff] %vm1652_vm6, %v1636_v61 }
 0x1e5   :  { %1654 = vst.msk [vmem:[#allocation3 + $0x10] sm:$0xff] %vm1652_vm6, %v1634_v62  ;;  %v8478_v63 = vpop.f32.mrb[4].mxu0 }
 0x1e6   :  { %v1620_v0 = vadd.f32 %v8478_v63, %v10059_v52  ;;  %v1526_v2 = vpop.f32.mrb[5].mxu0 }
 0x1e7   :  { %v1618_v3 = vadd.f32 %v10059_v52, %v1526_v2  ;;  %v8479_v4 = vpop.f32.mrb[6].mxu0 }
 0x1e8   :  { %v1639_v5 = vmax.f32 %v1620_v0, 0.0  ;;  %v1621_v6 = vadd.f32 %v8479_v4, %v10059_v52  ;;  %v1529_v7 = vpop.f32.mrb[7].mxu0 }
 0x1e9   :  { %v1637_v8 = vmax.f32 %v1618_v3, 0.0  ;;  %v1619_v9 = vadd.f32 %v10059_v52, %v1529_v7  ;;  %v9399_v7 = vld [vmem:[%s11527_s3 + $0x40] sm:$0xff]  }
 0x1ea   :  { %1659 = vst.msk [vmem:[#allocation3 + $0x38] sm:$0xff] %vm1652_vm6, %v1639_v5  ;;  %v1640_v12 = vmax.f32 %v1621_v6, 0.0 }
 0x1eb   :  { %1657 = vst.msk [vmem:[#allocation3 + $0x28] sm:$0xff] %vm1652_vm6, %v1637_v8  ;;  %v1638_v13 = vmax.f32 %v1619_v9, 0.0  ;;  %v9400_v9 = vld [vmem:[%s11527_s3 + $0x48] sm:$0xff]  }
 0x1ec   :  { %1660 = vst.msk [vmem:[#allocation3 + $0x40] sm:$0xff] %vm1652_vm6, %v1640_v12  ;;  %v1707_v14 = vld [vmem:[#allocation3 + $0x7] ss:$2 sm:$0xff]  ;;  %v1709_v15 = vld [vmem:[#allocation3 + $0x17] ss:$2 sm:$0xff] }
 0x1ed   :  { %1658 = vst.msk [vmem:[#allocation3 + $0x30] sm:$0xff] %vm1652_vm6, %v1638_v13  ;;  %v8482_v17 = vpop.f32.mrb[8].mxu0  ;;  %v1726_v18 = vpack.c.bf16 %v1709_v15, %v1707_v14  ;;  %v1676_v6 = vld [vmem:[#allocation3 + $0x16] ss:$2 sm:$0xff] }
 0x1ee   :  { %v1624_v19 = vadd.f32 %v8482_v17, %v10059_v52  ;;  %v1542_v20 = vpop.f32.mrb[9].mxu0  ;;  %v9401_v14 = vld [vmem:[%s11527_s3 + $0x50] sm:$0xff]  }
 0x1ef   :  { %v1622_v21 = vadd.f32 %v10059_v52, %v1542_v20  ;;  %v8483_v22 = vpop.f32.mrb[10].mxu0  ;;  %8501 = vmatmul.mubr.msk.bf16.vlgmr.msra.gmra.mrb[0].mxu1 %vm1652_vm6, %v1726_v18 }
 0x1f0   :  { %v1643_v23 = vmax.f32 %v1624_v19, 0.0  ;;  %v1625_v24 = vadd.f32 %v8483_v22, %v10059_v52  ;;  %v1545_v25 = vpop.f32.mrb[11].mxu0  ;;  %8521 = vmatpush3.bf16.msra.mxu1 %v9395_v16  ;;  %8504 = vmatprep.mubr.msk.bf16.mxu1 %vm9650_vm5, %v9649_v1  ;;  %v9402_v16 = vld [vmem:[%s11527_s3 + $0x58] sm:$0xff]  }
 0x1f1   :  { %v1641_v45 = vmax.f32 %v1622_v21, 0.0  ;;  %v1623_v10 = vadd.f32 %v10059_v52, %v1545_v25  ;;  %8522 = vmatprep.subr.bf16.mxu1 %v9649_v1 }
 0x1f2   :  { %1663 = vst.msk [vmem:[#allocation3 + $0x58] sm:$0xff] %vm1652_vm6, %v1643_v23  ;;  %v1644_v27 = vmax.f32 %v1625_v24, 0.0 }
 0x1f3   :  { %1661 = vst.msk [vmem:[#allocation3 + $0x48] sm:$0xff] %vm1652_vm6, %v1641_v45  ;;  %v1642_v28 = vmax.f32 %v1623_v10, 0.0  ;;  %v1967_v45 = vld [vmem:[#allocation3 + $0x18] ss:$2 sm:$0xff] }
 0x1f4   :  { %1664 = vst.msk [vmem:[#allocation3 + $0x60] sm:$0xff] %vm1652_vm6, %v1644_v27  ;;  %v1711_v29 = vld [vmem:[#allocation3 + $0x27] ss:$2 sm:$0xff]  ;;  %v1713_v30 = vld [vmem:[#allocation3 + $0x37] ss:$2 sm:$0xff]  ;;  %8523 = vmatpush3.bf16.msra.mxu1 %v9396_v26 }
 0x1f5   :  { %1662 = vst.msk [vmem:[#allocation3 + $0x50] sm:$0xff] %vm1652_vm6, %v1642_v28  ;;  %v8486_v32 = vpop.f32.mrb[12].mxu0  ;;  %v1727_v33 = vpack.c.bf16 %v1713_v30, %v1711_v29  ;;  %8524 = vmatprep.subr.bf16.mxu1 %v9649_v1  ;;  %v1678_v12 = vld [vmem:[#allocation3 + $0x26] ss:$2 sm:$0xff]  ;;  %v1680_v13 = vld [vmem:[#allocation3 + $0x36] ss:$2 sm:$0xff] }
 0x1f6   :  { %v1628_v34 = vadd.f32 %v8486_v32, %v10059_v52  ;;  %v1558_v35 = vpop.f32.mrb[13].mxu0  ;;  %v1694_v15 = vpack.c.bf16 %v1680_v13, %v1678_v12  ;;  %v1965_v26 = vld [vmem:[#allocation3 + $0x8] ss:$2 sm:$0xff]  ;;  %v9403_v10 = vld [vmem:[%s11527_s3 + $0x60] sm:$0xff]  }
 0x1f7   :  { %v1626_v36 = vadd.f32 %v10059_v52, %v1558_v35  ;;  %v8487_v37 = vpop.f32.mrb[14].mxu0  ;;  %8505 = vmatmul.mubr.msk.bf16.gmra.mrb[4].mxu1 %vm1652_vm6, %v1727_v33  ;;  %v1984_v27 = vpack.c.bf16 %v1967_v45, %v1965_v26  ;;  %v9404_v28 = vld [vmem:[%s11527_s3 + $0x68] sm:$0xff]   ;;  %v1971_v30 = vld [vmem:[#allocation3 + $0x38] ss:$2 sm:$0xff] }
 0x1f8   :  { %v1647_v38 = vmax.f32 %v1628_v34, 0.0  ;;  %v1629_v39 = vadd.f32 %v8487_v37, %v10059_v52  ;;  %v1561_v40 = vpop.f32.mrb[15].mxu0  ;;  %8508 = vmatprep.mubr.msk.bf16.mxu1 %vm9650_vm5, %v9649_v1  ;;  %8525 = vmatpush3.bf16.msra.mxu1 %v9397_v31  ;;  %v1969_v29 = vld [vmem:[#allocation3 + $0x28] ss:$2 sm:$0xff]  ;;  %v9406_v33 = vld [vmem:[%s11527_s3 + $0x78] sm:$0xff]  }
 0x1f9   :  { %v1645_v42 = vmax.f32 %v1626_v36, 0.0  ;;  %v1627_v43 = vadd.f32 %v10059_v52, %v1561_v40  ;;  %8526 = vmatprep.subr.bf16.mxu1 %v9649_v1  ;;  %v9405_v31 = vld [vmem:[%s11527_s3 + $0x70] sm:$0xff]   ;;  %v1985_v32 = vpack.c.bf16 %v1971_v30, %v1969_v29  ;;  %v9411_v30 = vld [vmem:[%s11529_s5 + $0x20] sm:$0xff]  }
 0x1fa   :  { %1667 = vst.msk [vmem:[#allocation3 + $0x78] sm:$0xff] %vm1652_vm6, %v1647_v38  ;;  %v1648_v47 = vmax.f32 %v1629_v39, 0.0 }
 0x1fb   :  { %1665 = vst.msk [vmem:[#allocation3 + $0x68] sm:$0xff] %vm1652_vm6, %v1645_v42  ;;  %v1646_v49 = vmax.f32 %v1627_v43, 0.0  ;;  %v1975_v35 = vld [vmem:[#allocation3 + $0x58] ss:$2 sm:$0xff]  ;;  %v2121_v43 = vld [vmem:[#allocation3 + $0x9] ss:$2 sm:$0xff] }
 0x1fc   :  { %1668 = vst.msk [vmem:[#allocation3 + $0x80] sm:$0xff] %vm1652_vm6, %v1648_v47  ;;  %v1715_v50 = vld [vmem:[#allocation3 + $0x47] ss:$2 sm:$0xff]  ;;  %v1717_v53 = vld [vmem:[#allocation3 + $0x57] ss:$2 sm:$0xff]  ;;  %8527 = vmatpush3.bf16.msra.mxu1 %v9398_v41 }
 0x1fd   :  { %1666 = vst.msk [vmem:[#allocation3 + $0x70] sm:$0xff] %vm1652_vm6, %v1646_v49  ;;  %v8490_v54 = vpop.f32.mrb[40].mxu0  ;;  %v1728_v55 = vpack.c.bf16 %v1717_v53, %v1715_v50  ;;  %8548 = vmatprep.subr.bf16.mxu1 %v9649_v1  ;;  %v1682_v17 = vld [vmem:[#allocation3 + $0x46] ss:$2 sm:$0xff]  ;;  %v1684_v18 = vld [vmem:[#allocation3 + $0x56] ss:$2 sm:$0xff] }
 0x1fe   :  { %v1606_v44 = vadd.f32 %v8490_v54, %v10050_v46  ;;  %v1574_v56 = vpop.f32.mrb[41].mxu0  ;;  %v1695_v19 = vpack.c.bf16 %v1684_v18, %v1682_v17  ;;  %v1973_v34 = vld [vmem:[#allocation3 + $0x48] ss:$2 sm:$0xff]  ;;  %v2123_v47 = vld [vmem:[#allocation3 + $0x19] ss:$2 sm:$0xff] }
 0x1ff   :  { %v1604_v11 = vadd.f32 %v1574_v56, %v10052_v48  ;;  %v8491_v57 = vpop.f32.mrb[42].mxu0  ;;  %8509 = vmatmul.mubr.msk.bf16.gmra.mrb[8].mxu1 %vm1652_vm6, %v1728_v55  ;;  %v1986_v36 = vpack.c.bf16 %v1975_v35, %v1973_v34  ;;  %v9407_v49 = vld [vmem:[%s11527_s3 + $0x80] sm:$0xff]   ;;  %v2140_v50 = vpack.c.bf16 %v2123_v47, %v2121_v43  ;;  %v9408_v53 = vld [vmem:[%s11527_s3 + $0x88] sm:$0xff]  }
 0x200   :  { %v1632_v58 = vadd.f32 %v10059_v52, %v1606_v44  ;;  %v1577_v59 = vpop.f32.mrb[43].mxu0  ;;  %8512 = vmatprep.mubr.msk.bf16.mxu1 %vm9650_vm5, %v9649_v1  ;;  %v2125_v54 = vld [vmem:[#allocation3 + $0x29] ss:$2 sm:$0xff]  ;;  %v2127_v55 = vld [vmem:[#allocation3 + $0x39] ss:$2 sm:$0xff] }
 0x201   :  { %v1630_v60 = vadd.f32 %v10059_v52, %v1604_v11  ;;  %v1605_v61 = vadd.f32 %v1577_v59, %v10054_v51  ;;  %v9409_v44 = vld [vmem:[%s11527_s3 + $0x90] sm:$0xff]   ;;  %v2141_v56 = vpack.c.bf16 %v2127_v55, %v2125_v54  ;;  %v9410_v11 = vld [vmem:[%s11527_s3 + $0x98] sm:$0xff]   ;;  %v9415_v47 = vld [vmem:[%s11529_s5 + $0x68] sm:$0xff]  }
 0x202   :  { %v1651_v62 = vmax.f32 %v1632_v58, 0.0  ;;  %v2129_v57 = vld [vmem:[#allocation3 + $0x49] ss:$2 sm:$0xff]  ;;  %v2131_v58 = vld [vmem:[#allocation3 + $0x59] ss:$2 sm:$0xff] }
 0x203   :  { %v1649_v63 = vmax.f32 %v1630_v60, 0.0  ;;  %v1631_v46 = vadd.f32 %v10059_v52, %v1605_v61  ;;  %v1674_v52 = vld [vmem:[#allocation3 + $0x6] ss:$2 sm:$0xff]  ;;  %v2142_v59 = vpack.c.bf16 %v2131_v58, %v2129_v57  ;;  %v2135_v61 = vld [vmem:[#allocation3 + $0x79] ss:$2 sm:$0xff] }
 0x204   :  { %1672 = vst.msk [vmem:[#allocation3 + $0x98] sm:$0x3f] %vm1671_vm7, %v1651_v62  ;;  %v1719_v48 = vld [vmem:[#allocation3 + $0x67] ss:$2 sm:$0xff]  ;;  %v1721_v0 = vld [vmem:[#allocation3 + $0x77] ss:$2 sm:$0xff]  ;;  %v1693_v8 = vpack.c.bf16 %v1676_v6, %v1674_v52 }
 0x205   :  { %1669 = vst.msk [vmem:[#allocation3 + $0x88] sm:$0xff] %vm1652_vm6, %v1649_v63  ;;  %v1650_v2 = vmax.f32 %v1631_v46, 0.0  ;;  %v1729_v3 = vpack.c.bf16 %v1721_v0, %v1719_v48  ;;  %v1686_v20 = vld [vmem:[#allocation3 + $0x66] ss:$2 sm:$0xff]  ;;  %v1688_v21 = vld [vmem:[#allocation3 + $0x76] ss:$2 sm:$0xff] }
 0x206   :  { %v1696_v22 = vpack.c.bf16 %v1688_v21, %v1686_v20  ;;  %v1977_v37 = vld [vmem:[#allocation3 + $0x68] ss:$2 sm:$0xff]  ;;  %v1979_v38 = vld [vmem:[#allocation3 + $0x78] ss:$2 sm:$0xff]  ;;  %v2133_v60 = vld [vmem:[#allocation3 + $0x69] ss:$2 sm:$0xff] }
 0x207   :  { %1670 = vst.msk [vmem:[#allocation3 + $0x90] sm:$0xff] %vm1652_vm6, %v1650_v2  ;;  %8513 = vmatmul.mubr.msk.bf16.gmra.mrb[12].mxu1 %vm1652_vm6, %v1729_v3  ;;  %v1987_v39 = vpack.c.bf16 %v1979_v38, %v1977_v37  ;;  %v2143_v62 = vpack.c.bf16 %v2135_v61, %v2133_v60  ;;  %v2279_v0 = vld [vmem:[#allocation3 + $0x1a] ss:$2 sm:$0xff]  ;;  %v2277_v2 = vld [vmem:[#allocation3 + $0xa] ss:$2 sm:$0xff] }
 0x208   :  { %8516 = vmatprep.mubr.msk.bf16.mxu1 %vm9650_vm5, %v9649_v1  ;;  %v2296_v3 = vpack.c.bf16 %v2279_v0, %v2277_v2  ;;  %v2287_v52 = vld [vmem:[#allocation3 + $0x5a] ss:$2 sm:$0xff]  ;;  %v2285_v6 = vld [vmem:[#allocation3 + $0x4a] ss:$2 sm:$0xff] }
 0x209   :  { %v9412_v38 = vld [vmem:[%s11529_s5 + $0x28] sm:$0xff]   ;;  %v9417_v57 = vld [vmem:[%s11529_s5 + $0x38] sm:$0xff]  }
 0x20a   :  { %v9418_v58 = vld [vmem:[%s11529_s5 + $0x78] sm:$0xff]  }
 0x20b   :  { %v1983_v41 = vld [vmem:[#allocation3 + $0x98] ss:$2 sm:$0x7]  ;;  %v2139_v46 = vld [vmem:[#allocation3 + $0x99] ss:$2 sm:$0x7] }
 0x20e   :  { %v1723_v51 = vld [vmem:[#allocation3 + $0x87] ss:$2 sm:$0xff]  ;;  %v1725_v4 = vld [vmem:[#allocation3 + $0x97] ss:$2 sm:$0x7] }
 0x20f   :  { %v1730_v5 = vpack.c.bf16 %v1725_v4, %v1723_v51  ;;  %v1690_v23 = vld [vmem:[#allocation3 + $0x86] ss:$2 sm:$0xff]  ;;  %v1692_v24 = vld [vmem:[#allocation3 + $0x96] ss:$2 sm:$0x7] }
 0x210   :  { %v1697_v25 = vpack.c.bf16 %v1692_v24, %v1690_v23  ;;  %v1981_v40 = vld [vmem:[#allocation3 + $0x88] ss:$2 sm:$0xff]  ;;  %v2137_v63 = vld [vmem:[#allocation3 + $0x89] ss:$2 sm:$0xff] }
 0x211   :  { %8517 = vmatmul.mubr.msk.bf16.gmra.mrb[16].mxu1 %vm1652_vm6, %v1730_v5  ;;  %v1988_v42 = vpack.c.bf16 %v1983_v41, %v1981_v40  ;;  %v2144_v48 = vpack.c.bf16 %v2139_v46, %v2137_v63  ;;  %v2283_v51 = vld [vmem:[#allocation3 + $0x3a] ss:$2 sm:$0xff]  ;;  %v2281_v4 = vld [vmem:[#allocation3 + $0x2a] ss:$2 sm:$0xff] }
 0x212   :  { %8528 = vmatprep.mubr.msk.bf16.mxu1 %vm9650_vm5, %v9649_v1  ;;  %v2297_v5 = vpack.c.bf16 %v2283_v51, %v2281_v4  ;;  %v2293_v13 = vld [vmem:[#allocation3 + $0x8a] ss:$2 sm:$0xff] }
 0x219   :  { %8529 = vmatmul.mubr.msk.bf16.vlgmr.msra.gmra.mrb[20].mxu1 %vm1652_vm6, %v1693_v8  ;;  %v2291_v8 = vld [vmem:[#allocation3 + $0x7a] ss:$2 sm:$0xff] }
 0x21a   :  { %8549 = vmatpush3.bf16.msra.mxu1 %v9399_v7  ;;  %8532 = vmatprep.mubr.msk.bf16.mxu1 %vm9650_vm5, %v9649_v1  ;;  %v2298_v7 = vpack.c.bf16 %v2287_v52, %v2285_v6 }
 0x21b   :  { %8550 = vmatprep.subr.bf16.mxu1 %v9649_v1 }
 0x21e   :  { %8551 = vmatpush3.bf16.msra.mxu1 %v9400_v9  ;;  %v2289_v9 = vld [vmem:[#allocation3 + $0x6a] ss:$2 sm:$0xff] }
 0x21f   :  { %8552 = vmatprep.subr.bf16.mxu1 %v9649_v1  ;;  %v2299_v12 = vpack.c.bf16 %v2291_v8, %v2289_v9 }
 0x221   :  { %8533 = vmatmul.mubr.msk.bf16.gmra.mrb[24].mxu1 %vm1652_vm6, %v1694_v15 }
 0x222   :  { %8536 = vmatprep.mubr.msk.bf16.mxu1 %vm9650_vm5, %v9649_v1  ;;  %8553 = vmatpush3.bf16.msra.mxu1 %v9401_v14  ;;  %v2295_v14 = vld [vmem:[#allocation3 + $0x9a] ss:$2 sm:$0x7] }
 0x223   :  { %8554 = vmatprep.subr.bf16.mxu1 %v9649_v1  ;;  %v2300_v15 = vpack.c.bf16 %v2295_v14, %v2293_v13 }
 0x226   :  { %8555 = vmatpush3.bf16.msra.mxu1 %v9402_v16 }
 0x227   :  { %8576 = vmatprep.subr.bf16.mxu1 %v9649_v1 }
 0x229   :  { %8537 = vmatmul.mubr.msk.bf16.gmra.mrb[28].mxu1 %vm1652_vm6, %v1695_v19 }
 0x22a   :  { %8540 = vmatprep.mubr.msk.bf16.mxu1 %vm9650_vm5, %v9649_v1 }
 0x231   :  { %8541 = vmatmul.mubr.msk.bf16.gmra.mrb[32].mxu1 %vm1652_vm6, %v1696_v22 }
 0x232   :  { %8544 = vmatprep.mubr.msk.bf16.mxu1 %vm9650_vm5, %v9649_v1 }
 0x239   :  { %8545 = vmatmul.mubr.msk.bf16.gmra.mrb[36].mxu1 %vm1652_vm6, %v1697_v25 }
 0x23a   :  { %8556 = vmatprep.mubr.msk.bf16.mxu1 %vm9650_vm5, %v9649_v1 }
 0x241   :  { %8557 = vmatmul.mubr.msk.bf16.vlgmr.msra.gmra.mrb[40].mxu1 %vm1652_vm6, %v1984_v27 }
 0x242   :  { %8577 = vmatpush3.bf16.msra.mxu1 %v9403_v10  ;;  %8560 = vmatprep.mubr.msk.bf16.mxu1 %vm9650_vm5, %v9649_v1 }
 0x243   :  { %8578 = vmatprep.subr.bf16.mxu1 %v9649_v1 }
 0x246   :  { %8579 = vmatpush3.bf16.msra.mxu1 %v9404_v28 }
 0x247   :  { %8580 = vmatprep.subr.bf16.mxu1 %v9649_v1 }
 0x249   :  { %8561 = vmatmul.mubr.msk.bf16.gmra.mrb[44].mxu1 %vm1652_vm6, %v1985_v32 }
 0x24a   :  { %8564 = vmatprep.mubr.msk.bf16.mxu1 %vm9650_vm5, %v9649_v1  ;;  %8581 = vmatpush3.bf16.msra.mxu1 %v9405_v31 }
 0x24b   :  { %8582 = vmatprep.subr.bf16.mxu1 %v9649_v1 }
 0x24e   :  { %8583 = vmatpush3.bf16.msra.mxu1 %v9406_v33 }
 0x24f   :  { %8604 = vmatprep.subr.bf16.mxu1 %v9649_v1 }
 0x251   :  { %8565 = vmatmul.mubr.msk.bf16.gmra.mrb[48].mxu1 %vm1652_vm6, %v1986_v36 }
 0x252   :  { %8568 = vmatprep.mubr.msk.bf16.mxu1 %vm9650_vm5, %v9649_v1 }
 0x259   :  { %8569 = vmatmul.mubr.msk.bf16.gmra.mrb[52].mxu1 %vm1652_vm6, %v1987_v39 }
 0x25a   :  { %8572 = vmatprep.mubr.msk.bf16.mxu1 %vm9650_vm5, %v9649_v1 }
 0x261   :  { %8573 = vmatmul.mubr.msk.bf16.gmra.mrb[56].mxu1 %vm1652_vm6, %v1988_v42  ;;  %v9413_v42 = vld [vmem:[%s11529_s5 + $0x60] sm:$0xff]  }
 0x262   :  { %8584 = vmatprep.mubr.msk.bf16.mxu1 %vm9650_vm5, %v9649_v1  ;;  %8693 = vmatpush3.bf16.msra.mxu0 %v9413_v42 }
 0x263   :  { %8694 = vmatprep.subr.bf16.mxu0 %v9649_v1 }
 0x266   :  { %8695 = vmatpush3.bf16.msra.mxu0 %v9415_v47 }
 0x267   :  { %8696 = vmatprep.subr.bf16.mxu0 %v9649_v1 }
 0x269   :  { %8585 = vmatmul.mubr.msk.bf16.vlgmr.msra.gmra.mrb[60].mxu1 %vm1652_vm6, %v2140_v50 }
 0x26a   :  { %8605 = vmatpush3.bf16.msra.mxu1 %v9407_v49  ;;  %8588 = vmatprep.mubr.msk.bf16.mxu1 %vm9650_vm5, %v9649_v1 }
 0x26b   :  { %8606 = vmatprep.subr.bf16.mxu1 %v9649_v1 }
 0x26e   :  { %8607 = vmatpush3.bf16.msra.mxu1 %v9408_v53  ;;  %v9414_v53 = vld [vmem:[%s11529_s5 + $0x30] sm:$0xff]  }
 0x26f   :  { %8608 = vmatprep.subr.bf16.mxu1 %v9649_v1 }
 0x271   :  { %8589 = vmatmul.mubr.msk.bf16.gmra.mrb[64].mxu1 %vm1652_vm6, %v2141_v56  ;;  %v9416_v56 = vld [vmem:[%s11529_s5 + $0x70] sm:$0xff]  }
 0x272   :  { %8592 = vmatprep.mubr.msk.bf16.mxu1 %vm9650_vm5, %v9649_v1  ;;  %8609 = vmatpush3.bf16.msra.mxu1 %v9409_v44 }
 0x273   :  { %8610 = vmatprep.subr.bf16.mxu1 %v9649_v1  ;;  %8697 = vmatpush3.bf16.msra.mxu0 %v9416_v56 }
 0x274   :  { %8698 = vmatprep.subr.bf16.mxu0 %v9649_v1 }
 0x276   :  { %8611 = vmatpush3.bf16.msra.mxu1 %v9410_v11 }
 0x277   :  { %8632 = vmatprep.subr.bf16.mxu1 %v9649_v1  ;;  %8699 = vmatpush3.bf16.msra.mxu0 %v9418_v58 }
 0x279   :  { %8593 = vmatmul.mubr.msk.bf16.gmra.mrb[68].mxu1 %vm1652_vm6, %v2142_v59 }
 0x27a   :  { %8596 = vmatprep.mubr.msk.bf16.mxu1 %vm9650_vm5, %v9649_v1 }
 0x281   :  { %8597 = vmatmul.mubr.msk.bf16.gmra.mrb[72].mxu1 %vm1652_vm6, %v2143_v62 }
 0x282   :  { %8600 = vmatprep.mubr.msk.bf16.mxu1 %vm9650_vm5, %v9649_v1 }
 0x289   :  { %8601 = vmatmul.mubr.msk.bf16.gmra.mrb[76].mxu1 %vm1652_vm6, %v2144_v48 }
 0x28a   :  { %8612 = vmatprep.mubr.msk.bf16.mxu1 %vm9650_vm5, %v9649_v1 }
 0x291   :  { %8613 = vmatmul.mubr.msk.bf16.vlgmr.msra.gmra.mrb[80].mxu1 %vm1652_vm6, %v2296_v3 }
 0x292   :  { %8616 = vmatprep.mubr.msk.bf16.mxu1 %vm9650_vm5, %v9649_v1  ;;  %8633 = vmatpush3.bf16.msra.mxu1 %v9411_v30 }
 0x293   :  { %8634 = vmatprep.subr.bf16.mxu1 %v9649_v1 }
 0x296   :  { %8635 = vmatpush3.bf16.msra.mxu1 %v9412_v38 }
 0x297   :  { %8636 = vmatprep.subr.bf16.mxu1 %v9649_v1 }
 0x299   :  { %8617 = vmatmul.mubr.msk.bf16.gmra.mrb[84].mxu1 %vm1652_vm6, %v2297_v5 }
 0x29a   :  { %8620 = vmatprep.mubr.msk.bf16.mxu1 %vm9650_vm5, %v9649_v1  ;;  %8637 = vmatpush3.bf16.msra.mxu1 %v9414_v53 }
 0x29b   :  { %8638 = vmatprep.subr.bf16.mxu1 %v9649_v1 }
 0x29e   :  { %8639 = vmatpush3.bf16.msra.mxu1 %v9417_v57 }
 0x29f   :  { %8652 = vmatprep.subr.bf16.mxu1 %v9649_v1 }
 0x2a1   :  { %8621 = vmatmul.mubr.msk.bf16.gmra.mrb[88].mxu1 %vm1652_vm6, %v2298_v7 }
 0x2a2   :  { %8624 = vmatprep.mubr.msk.bf16.mxu1 %vm9650_vm5, %v9649_v1 }
 0x2a9   :  { %8625 = vmatmul.mubr.msk.bf16.gmra.mrb[92].mxu1 %vm1652_vm6, %v2299_v12 }
 0x2aa   :  { %8628 = vmatprep.mubr.msk.bf16.mxu1 %vm9650_vm5, %v9649_v1 }
 0x2b1   :  { %8629 = vmatmul.mubr.msk.bf16.gmra.mrb[96].mxu1 %vm1652_vm6, %v2300_v15 }
 0x2b2   :  { %8640 = vmatprep.mubr.msk.bf16.mxu1 %vm9650_vm5, %v9649_v1 }
 0x2c2   :  { %v1813_v16 = vpop.f32.mrb[0].mxu1 }
 0x2c3   :  { %v8502_v17 = vpop.f32.mrb[1].mxu1 }
 0x2c4   :  { %v1816_v18 = vpop.f32.mrb[2].mxu1 }
 0x2c5   :  { %v8503_v19 = vpop.f32.mrb[3].mxu1 }
 0x2ca   :  { %v1821_v20 = vpop.f32.mrb[4].mxu1 }
 0x2cb   :  { %v8506_v21 = vpop.f32.mrb[5].mxu1 }
 0x2cc   :  { %v1824_v22 = vpop.f32.mrb[6].mxu1 }
 0x2cd   :  { %v8507_v23 = vpop.f32.mrb[7].mxu1 }
 0x2d2   :  { %v1829_v24 = vpop.f32.mrb[8].mxu1 }
 0x2d3   :  { %v8510_v25 = vpop.f32.mrb[9].mxu1 }
 0x2d4   :  { %v1832_v26 = vpop.f32.mrb[10].mxu1 }
 0x2d5   :  { %v8511_v45 = vpop.f32.mrb[11].mxu1 }
 0x2da   :  { %v1837_v10 = vpop.f32.mrb[12].mxu1 }
 0x2db   :  { %v8514_v27 = vpop.f32.mrb[13].mxu1 }
 0x2dc   :  { %v1840_v28 = vpop.f32.mrb[14].mxu1 }
 0x2dd   :  { %v8515_v29 = vpop.f32.mrb[15].mxu1 }
 0x2e4   :  { %v1845_v31 = vpop.f32.mrb[16].mxu1 }
 0x2e5   :  { %v8518_v32 = vpop.f32.mrb[17].mxu1 }
 0x2e6   :  { %v1848_v33 = vpop.f32.mrb[18].mxu1 }
 0x2e7   :  { %v8519_v34 = vpop.f32.mrb[19].mxu1 }
 0x2ec   :  { %v1925_v35 = vpop.f32.mrb[20].mxu1 }
 0x2ed   :  { %v1926_v36 = vadd.f32 %v1925_v35, %v1813_v16  ;;  %v8530_v37 = vpop.f32.mrb[21].mxu1 }
 0x2ee   :  { %v1928_v39 = vpop.f32.mrb[22].mxu1 }
 0x2ef   :  { %v1929_v40 = vadd.f32 %v1928_v39, %v1816_v18  ;;  %v8531_v41 = vpop.f32.mrb[23].mxu1 }
 0x2f4   :  { %v1933_v43 = vpop.f32.mrb[24].mxu1 }
 0x2f5   :  { %v1934_v49 = vadd.f32 %v1933_v43, %v1821_v20  ;;  %v8534_v50 = vpop.f32.mrb[25].mxu1 }
 0x2f6   :  { %v1936_v54 = vpop.f32.mrb[26].mxu1 }
 0x2f7   :  { %v1937_v55 = vadd.f32 %v1936_v54, %v1824_v22  ;;  %v8535_v44 = vpop.f32.mrb[27].mxu1 }
 0x2fc   :  { %v1941_v11 = vpop.f32.mrb[28].mxu1 }
 0x2fd   :  { %v1942_v59 = vadd.f32 %v1941_v11, %v1829_v24  ;;  %v8538_v60 = vpop.f32.mrb[29].mxu1 }
 0x2fe   :  { %v1944_v61 = vpop.f32.mrb[30].mxu1 }
 0x2ff   :  { %v1945_v62 = vadd.f32 %v1944_v61, %v1832_v26  ;;  %v8539_v63 = vpop.f32.mrb[31].mxu1 }
 0x304   :  { %v1949_v46 = vpop.f32.mrb[32].mxu1 }
 0x305   :  { %v1950_v48 = vadd.f32 %v1949_v46, %v1837_v10  ;;  %v8542_v0 = vpop.f32.mrb[33].mxu1 }
 0x306   :  { %v1952_v2 = vpop.f32.mrb[34].mxu1 }
 0x307   :  { %v1953_v3 = vadd.f32 %v1952_v2, %v1840_v28  ;;  %v8543_v51 = vpop.f32.mrb[35].mxu1 }
 0x30c   :  { %v1957_v4 = vpop.f32.mrb[36].mxu1 }
 0x30d   :  { %v1958_v5 = vadd.f32 %v1957_v4, %v1845_v31  ;;  %v8546_v52 = vpop.f32.mrb[37].mxu1  ;;  %v7608_v4 = vld [vmem:[%s11548_s29 + $0x138] sm:$0xff] }
 0x30e   :  { %v1960_v6 = vpop.f32.mrb[38].mxu1  ;;  %v7610_v52 = vld [vmem:[%s11548_s29 + $0x148] sm:$0xff]  ;;  %3617 = vst.msk [vmem:[#allocation2 + $0x10] sm:$0xff] %vm107_vm2, %v7608_v4 }
 0x30f   :  { %v1961_v7 = vadd.f32 %v1960_v6, %v1848_v33  ;;  %v8547_v8 = vpop.f32.mrb[39].mxu1  ;;  %3619 = vst.msk [vmem:[#allocation2 + $0x20] sm:$0xff] %vm107_vm2, %v7610_v52  ;;  %v7637_v52 = vld [vmem:[%s11548_s29 + $0x220] sm:$0xff] }
 0x310   :  { %v7612_v8 = vld [vmem:[%s11548_s29 + $0x158] sm:$0xff]  ;;  %3646 = vst.msk [vmem:[#allocation2 + $0xf8] sm:$0xff] %vm107_vm2, %v7637_v52 }
 0x311   :  { %3621 = vst.msk [vmem:[#allocation2 + $0x30] sm:$0xff] %vm107_vm2, %v7612_v8 }
 0x314   :  { %v2071_v9 = vpop.f32.mrb[40].mxu1 }
 0x315   :  { %v2110_v12 = vadd.f32 %v2071_v9, %v1926_v36  ;;  %v8558_v13 = vpop.f32.mrb[41].mxu1  ;;  %v7613_v9 = vld [vmem:[%s11548_s29 + $0x160] sm:$0xff] }
 0x316   :  { %v2074_v14 = vpop.f32.mrb[42].mxu1  ;;  %3622 = vst.msk [vmem:[#allocation2 + $0x38] sm:$0xff] %vm107_vm2, %v7613_v9 }
 0x317   :  { %v2111_v15 = vadd.f32 %v2074_v14, %v1929_v40  ;;  %v8559_v16 = vpop.f32.mrb[43].mxu1  ;;  %v7614_v14 = vld [vmem:[%s11548_s29 + $0x168] sm:$0xff] }
 0x318   :  { %3623 = vst.msk [vmem:[#allocation2 + $0x40] sm:$0xff] %vm107_vm2, %v7614_v14  ;;  %v10319_v16 = vld [vmem:[%s11530_s4] ss:$0 sm:$0xff] }
 0x31c   :  { %v2079_v17 = vpop.f32.mrb[44].mxu1 }
 0x31d   :  { %v2112_v18 = vadd.f32 %v2079_v17, %v1934_v49  ;;  %v8562_v19 = vpop.f32.mrb[45].mxu1 }
 0x31e   :  { %v2082_v20 = vpop.f32.mrb[46].mxu1  ;;  %v7615_v19 = vld [vmem:[%s11548_s29 + $0x170] sm:$0xff] }
 0x31f   :  { %v2113_v21 = vadd.f32 %v2082_v20, %v1937_v55  ;;  %v8563_v22 = vpop.f32.mrb[47].mxu1  ;;  %3624 = vst.msk [vmem:[#allocation2 + $0x48] sm:$0xff] %vm107_vm2, %v7615_v19 }
 0x320   :  { %v7617_v22 = vld [vmem:[%s11548_s29 + $0x180] sm:$0xff] }
 0x321   :  { %3626 = vst.msk [vmem:[#allocation2 + $0x58] sm:$0xff] %vm107_vm2, %v7617_v22  ;;  %v7639_v22 = vld [vmem:[%s11548_s29 + $0x230] sm:$0xff] }
 0x322   :  { %3648 = vst.msk [vmem:[#allocation2 + $0x108] sm:$0xff] %vm107_vm2, %v7639_v22 }
 0x324   :  { %v2087_v23 = vpop.f32.mrb[48].mxu1 }
 0x325   :  { %v2114_v24 = vadd.f32 %v2087_v23, %v1942_v59  ;;  %v8566_v25 = vpop.f32.mrb[49].mxu1 }
 0x326   :  { %v2090_v26 = vpop.f32.mrb[50].mxu1 }
 0x327   :  { %v2115_v45 = vadd.f32 %v2090_v26, %v1945_v62  ;;  %v8567_v10 = vpop.f32.mrb[51].mxu1  ;;  %v7618_v26 = vld [vmem:[%s11548_s29 + $0x188] sm:$0xff] }
 0x328   :  { %3627 = vst.msk [vmem:[#allocation2 + $0x60] sm:$0xff] %vm107_vm2, %v7618_v26  ;;  %v7620_v10 = vld [vmem:[%s11548_s29 + $0x198] sm:$0xff] }
 0x329   :  { %3629 = vst.msk [vmem:[#allocation2 + $0x70] sm:$0xff] %vm107_vm2, %v7620_v10  ;;  %v7642_v10 = vld [vmem:[%s11548_s29 + $0x248] sm:$0xff] }
 0x32a   :  { %3651 = vst.msk [vmem:[#allocation2 + $0x120] sm:$0xff] %vm107_vm2, %v7642_v10 }
 0x32c   :  { %v2095_v27 = vpop.f32.mrb[52].mxu1 }
 0x32d   :  { %v2116_v28 = vadd.f32 %v2095_v27, %v1950_v48  ;;  %v8570_v29 = vpop.f32.mrb[53].mxu1  ;;  %v7621_v27 = vld [vmem:[%s11548_s29 + $0x1a0] sm:$0xff] }
 0x32e   :  { %v2098_v30 = vpop.f32.mrb[54].mxu1  ;;  %3630 = vst.msk [vmem:[#allocation2 + $0x78] sm:$0xff] %vm107_vm2, %v7621_v27  ;;  %v7643_v27 = vld [vmem:[%s11548_s29 + $0x250] sm:$0xff] }
 0x32f   :  { %v2117_v31 = vadd.f32 %v2098_v30, %v1953_v3  ;;  %v8571_v32 = vpop.f32.mrb[55].mxu1  ;;  %3652 = vst.msk [vmem:[#allocation2 + $0x128] sm:$0xff] %vm107_vm2, %v7643_v27 }
 0x334   :  { %v2103_v33 = vpop.f32.mrb[56].mxu1 }
 0x335   :  { %v2118_v34 = vadd.f32 %v2103_v33, %v1958_v5  ;;  %v8574_v35 = vpop.f32.mrb[57].mxu1  ;;  %v7609_v5 = vld [vmem:[%s11548_s29 + $0x140] sm:$0xff] }
 0x336   :  { %v2106_v36 = vpop.f32.mrb[58].mxu1  ;;  %3618 = vst.msk [vmem:[#allocation2 + $0x18] sm:$0xff] %vm107_vm2, %v7609_v5  ;;  %v7623_v35 = vld [vmem:[%s11548_s29 + $0x1b0] sm:$0xff] }
 0x337   :  { %v2119_v37 = vadd.f32 %v2106_v36, %v1961_v7  ;;  %v8575_v38 = vpop.f32.mrb[59].mxu1  ;;  %v7611_v7 = vld [vmem:[%s11548_s29 + $0x150] sm:$0xff]  ;;  %v7624_v36 = vld [vmem:[%s11548_s29 + $0x1b8] sm:$0xff]  ;;  %3632 = vst.msk [vmem:[#allocation2 + $0x88] sm:$0xff] %vm107_vm2, %v7623_v35 }
 0x338   :  { %3620 = vst.msk [vmem:[#allocation2 + $0x28] sm:$0xff] %vm107_vm2, %v7611_v7  ;;  %3633 = vst.msk [vmem:[#allocation2 + $0x90] sm:$0xff] %vm107_vm2, %v7624_v36 }
 0x33c   :  { %v2227_v39 = vpop.f32.mrb[60].mxu1 }
 0x33d   :  { %v2266_v40 = vadd.f32 %v2227_v39, %v2110_v12  ;;  %v8586_v41 = vpop.f32.mrb[61].mxu1  ;;  %v7626_v39 = vld [vmem:[%s11548_s29 + $0x1c8] sm:$0xff] }
 0x33e   :  { %v2230_v42 = vpop.f32.mrb[62].mxu1  ;;  %3635 = vst.msk [vmem:[#allocation2 + $0xa0] sm:$0xff] %vm107_vm2, %v7626_v39  ;;  %v9422_v39 = vld [vmem:[%s11529_s5 + $0x18] sm:$0xff]  }
 0x33f   :  { %v2267_v43 = vadd.f32 %v2230_v42, %v2111_v15  ;;  %v8587_v47 = vpop.f32.mrb[63].mxu1 }
 0x340   :  { %v7628_v47 = vld [vmem:[%s11548_s29 + $0x1d8] sm:$0xff] }
 0x341   :  { %3637 = vst.msk [vmem:[#allocation2 + $0xb0] sm:$0xff] %vm107_vm2, %v7628_v47 }
 0x344   :  { %v2235_v49 = vpop.f32.mrb[64].mxu1 }
 0x345   :  { %v10272_v50 = vadd.f32 %v2235_v49, %v2112_v18  ;;  %v8590_v53 = vpop.f32.mrb[65].mxu1  ;;  %v7629_v49 = vld [vmem:[%s11548_s29 + $0x1e0] sm:$0xff] }
 0x346   :  { %v2238_v54 = vpop.f32.mrb[66].mxu1  ;;  %3638 = vst.msk [vmem:[#allocation2 + $0xb8] sm:$0xff] %vm107_vm2, %v7629_v49 }
 0x347   :  { %v10274_v55 = vadd.f32 %v2238_v54, %v2113_v21  ;;  %v8591_v44 = vpop.f32.mrb[67].mxu1  ;;  %v7616_v21 = vld [vmem:[%s11548_s29 + $0x178] sm:$0xff] }
 0x348   :  { %3625 = vst.msk [vmem:[#allocation2 + $0x50] sm:$0xff] %vm107_vm2, %v7616_v21 }
 0x34c   :  { %v2243_v56 = vpop.f32.mrb[68].mxu1 }
 0x34d   :  { %v10276_v11 = vadd.f32 %v2243_v56, %v2114_v24  ;;  %v8594_v57 = vpop.f32.mrb[69].mxu1 }
 0x34e   :  { %v2246_v58 = vpop.f32.mrb[70].mxu1 }
 0x34f   :  { %v10278_v59 = vadd.f32 %v2246_v58, %v2115_v45  ;;  %v8595_v60 = vpop.f32.mrb[71].mxu1  ;;  %v7619_v45 = vld [vmem:[%s11548_s29 + $0x190] sm:$0xff] }
 0x350   :  { %3628 = vst.msk [vmem:[#allocation2 + $0x68] sm:$0xff] %vm107_vm2, %v7619_v45  ;;  %v7631_v58 = vld [vmem:[%s11548_s29 + $0x1f0] sm:$0xff] }
 0x351   :  { %3640 = vst.msk [vmem:[#allocation2 + $0xc8] sm:$0xff] %vm107_vm2, %v7631_v58 }
 0x354   :  { %v2251_v61 = vpop.f32.mrb[72].mxu1 }
 0x355   :  { %v10280_v62 = vadd.f32 %v2251_v61, %v2116_v28  ;;  %v8598_v63 = vpop.f32.mrb[73].mxu1  ;;  %v7622_v28 = vld [vmem:[%s11548_s29 + $0x1a8] sm:$0xff]  ;;  %v7632_v61 = vld [vmem:[%s11548_s29 + $0x1f8] sm:$0xff] }
 0x356   :  { %v2254_v46 = vpop.f32.mrb[74].mxu1  ;;  %3631 = vst.msk [vmem:[#allocation2 + $0x80] sm:$0xff] %vm107_vm2, %v7622_v28  ;;  %3641 = vst.msk [vmem:[#allocation2 + $0xd0] sm:$0xff] %vm107_vm2, %v7632_v61 }
 0x357   :  { %v10282_v48 = vadd.f32 %v2254_v46, %v2117_v31  ;;  %v8599_v0 = vpop.f32.mrb[75].mxu1 }
 0x35c   :  { %v2259_v2 = vpop.f32.mrb[76].mxu1 }
 0x35d   :  { %v10284_v3 = vadd.f32 %v2259_v2, %v2118_v34  ;;  %v8602_v51 = vpop.f32.mrb[77].mxu1  ;;  %v7634_v2 = vld [vmem:[%s11548_s29 + $0x208] sm:$0xff] }
 0x35e   :  { %v2262_v6 = vpop.f32.mrb[78].mxu1  ;;  %3643 = vst.msk [vmem:[#allocation2 + $0xe0] sm:$0xff] %vm107_vm2, %v7634_v2  ;;  %v7635_v51 = vld [vmem:[%s11548_s29 + $0x210] sm:$0xff] }
 0x35f   :  { %v10307_v12 = vadd.f32 %v2262_v6, %v2119_v37  ;;  %v8603_v13 = vpop.f32.mrb[79].mxu1  ;;  %v7625_v37 = vld [vmem:[%s11548_s29 + $0x1c0] sm:$0xff]  ;;  %v7638_v6 = vld [vmem:[%s11548_s29 + $0x228] sm:$0xff]  ;;  %3644 = vst.msk [vmem:[#allocation2 + $0xe8] sm:$0xff] %vm107_vm2, %v7635_v51 }
 0x360   :  { %3634 = vst.msk [vmem:[#allocation2 + $0x98] sm:$0xff] %vm107_vm2, %v7625_v37  ;;  %3647 = vst.msk [vmem:[#allocation2 + $0x100] sm:$0xff] %vm107_vm2, %v7638_v6  ;;  %v9428_v6 = vld [vmem:[%s11529_s5 + $0x88] sm:$0xff]  }
 0x364   :  { %v2383_v15 = vpop.f32.mrb[80].mxu1 }
 0x365   :  { %v2422_v17 = vadd.f32 %v2383_v15, %v2266_v40  ;;  %v8614_v18 = vpop.f32.mrb[81].mxu1  ;;  %v7627_v40 = vld [vmem:[%s11548_s29 + $0x1d0] sm:$0xff] }
 0x366   :  { %v2386_v20 = vpop.f32.mrb[82].mxu1  ;;  %3636 = vst.msk [vmem:[#allocation2 + $0xa8] sm:$0xff] %vm107_vm2, %v7627_v40 }
 0x367   :  { %v2439_v23 = vadd.f32 %v10319_v16, %v2422_v17  ;;  %v2423_v24 = vadd.f32 %v2386_v20, %v2267_v43  ;;  %v8615_v25 = vpop.f32.mrb[83].mxu1  ;;  %v9419_v17 = vld [vmem:[%s11529_s5] sm:$0xff]  }
 0x368   :  { %v7641_v25 = vld [vmem:[%s11548_s29 + $0x240] sm:$0xff] }
 0x369   :  { %v2449_v29 = vmax.f32 %v2439_v23, 0.0  ;;  %v2440_v30 = vadd.f32 %v10319_v16, %v2423_v24  ;;  %v7640_v24 = vld [vmem:[%s11548_s29 + $0x238] sm:$0xff]  ;;  %3650 = vst.msk [vmem:[#allocation2 + $0x118] sm:$0xff] %vm107_vm2, %v7641_v25 }
 0x36a   :  { %3649 = vst.msk [vmem:[#allocation2 + $0x110] sm:$0xff] %vm107_vm2, %v7640_v24 }
 0x36b   :  { %2459 = vst.msk [vmem:[#allocation4 + $0x8] sm:$0xff] %vm1652_vm6, %v2449_v29  ;;  %v2450_v31 = vmax.f32 %v2440_v30, 0.0 }
 0x36c   :  { %v2391_v32 = vpop.f32.mrb[84].mxu1 }
 0x36d   :  { %2460 = vst.msk [vmem:[#allocation4 + $0x10] sm:$0xff] %vm1652_vm6, %v2450_v31  ;;  %v2424_v33 = vadd.f32 %v2391_v32, %v10272_v50  ;;  %v8618_v34 = vpop.f32.mrb[85].mxu1  ;;  %v7630_v50 = vld [vmem:[%s11548_s29 + $0x1e8] sm:$0xff]  ;;  %v9421_v32 = vld [vmem:[%s11529_s5 + $0x10] sm:$0xff]  }
 0x36e   :  { %v2394_v38 = vpop.f32.mrb[86].mxu1  ;;  %3639 = vst.msk [vmem:[#allocation2 + $0xc0] sm:$0xff] %vm107_vm2, %v7630_v50 }
 0x36f   :  { %v2441_v41 = vadd.f32 %v10319_v16, %v2424_v33  ;;  %v2425_v42 = vadd.f32 %v2394_v38, %v10274_v55  ;;  %v8619_v43 = vpop.f32.mrb[87].mxu1 }
 0x371   :  { %v2451_v53 = vmax.f32 %v2441_v41, 0.0  ;;  %v2442_v54 = vadd.f32 %v10319_v16, %v2425_v42 }
 0x373   :  { %2461 = vst.msk [vmem:[#allocation4 + $0x18] sm:$0xff] %vm1652_vm6, %v2451_v53  ;;  %v2452_v55 = vmax.f32 %v2442_v54, 0.0 }
 0x374   :  { %v2399_v44 = vpop.f32.mrb[88].mxu1  ;;  %v2492_v8 = vld [vmem:[#allocation4 + $0x7] ss:$2 sm:$0xff] }
 0x375   :  { %2462 = vst.msk [vmem:[#allocation4 + $0x20] sm:$0xff] %vm1652_vm6, %v2452_v55  ;;  %v2426_v56 = vadd.f32 %v2399_v44, %v10276_v11  ;;  %v8622_v57 = vpop.f32.mrb[89].mxu1  ;;  %v7633_v11 = vld [vmem:[%s11548_s29 + $0x200] sm:$0xff]  ;;  %v2808_v9 = vld [vmem:[#allocation4 + $0x9] ss:$2 sm:$0xff] }
 0x376   :  { %v2402_v60 = vpop.f32.mrb[90].mxu1  ;;  %3642 = vst.msk [vmem:[#allocation2 + $0xd8] sm:$0xff] %vm107_vm2, %v7633_v11  ;;  %v9423_v57 = vld [vmem:[%s11529_s5 + $0x40] sm:$0xff]   ;;  %v9426_v11 = vld [vmem:[%s11529_s5 + $0x58] sm:$0xff]  }
 0x377   :  { %v2443_v63 = vadd.f32 %v10319_v16, %v2426_v56  ;;  %v2427_v46 = vadd.f32 %v2402_v60, %v10278_v59  ;;  %v8623_v0 = vpop.f32.mrb[91].mxu1  ;;  %v7636_v59 = vld [vmem:[%s11548_s29 + $0x218] sm:$0xff]  ;;  %v9424_v60 = vld [vmem:[%s11529_s5 + $0x48] sm:$0xff]  }
 0x378   :  { %3645 = vst.msk [vmem:[#allocation2 + $0xf0] sm:$0xff] %vm107_vm2, %v7636_v59  ;;  %v2471_v56 = vld [vmem:[#allocation4 + $0x6] ss:$2 sm:$0xff] }
 0x379   :  { %v2453_v4 = vmax.f32 %v2443_v63, 0.0  ;;  %v2444_v5 = vadd.f32 %v10319_v16, %v2427_v46  ;;  %v9425_v46 = vld [vmem:[%s11529_s5 + $0x50] sm:$0xff]  }
 0x37b   :  { %2463 = vst.msk [vmem:[#allocation4 + $0x28] sm:$0xff] %vm1652_vm6, %v2453_v4  ;;  %v2454_v7 = vmax.f32 %v2444_v5, 0.0  ;;  %v2692_v4 = vld [vmem:[#allocation4 + $0x8] ss:$2 sm:$0xff]  ;;  %v9427_v5 = vld [vmem:[%s11529_s5 + $0x80] sm:$0xff]  }
 0x37c   :  { %v2407_v13 = vpop.f32.mrb[92].mxu1  ;;  %v2494_v14 = vld [vmem:[#allocation4 + $0x17] ss:$2 sm:$0xff]  ;;  %v2473_v44 = vld [vmem:[#allocation4 + $0x16] ss:$2 sm:$0xff] }
 0x37d   :  { %v2810_v15 = vld [vmem:[#allocation4 + $0x19] ss:$2 sm:$0xff]  ;;  %2464 = vst.msk [vmem:[#allocation4 + $0x30] sm:$0xff] %vm1652_vm6, %v2454_v7  ;;  %v2428_v18 = vadd.f32 %v2407_v13, %v10280_v62  ;;  %v8626_v19 = vpop.f32.mrb[93].mxu1  ;;  %v2501_v20 = vpack.c.bf16 %v2494_v14, %v2492_v8  ;;  %v2480_v58 = vpack.c.bf16 %v2473_v44, %v2471_v56  ;;  %v2694_v59 = vld [vmem:[#allocation4 + $0x18] ss:$2 sm:$0xff] }
 0x37e   :  { %v2817_v21 = vpack.c.bf16 %v2810_v15, %v2808_v9  ;;  %v2410_v23 = vpop.f32.mrb[94].mxu1  ;;  %v2701_v52 = vpack.c.bf16 %v2694_v59, %v2692_v4  ;;  %v9429_v9 = vld [vmem:[%s11529_s5 + $0x90] sm:$0xff]   ;;  %v9430_v14 = vld [vmem:[%s11529_s5 + $0x98] sm:$0xff]   ;;  %v10582_v4 = vld [vmem:[%s11547_s26 + $0xc] sm:$0xf] }
 0x37f   :  { %v2445_v62 = vadd.f32 %v10319_v16, %v2428_v18  ;;  %v2429_v26 = vadd.f32 %v2410_v23, %v10282_v48  ;;  %v8627_v45 = vpop.f32.mrb[95].mxu1  ;;  %8641 = vmatmul.mubr.msk.bf16.vlgmr.msra.gmra.mrb[100].mxu1 %vm1652_vm6, %v2501_v20  ;;  %v9420_v48 = vld [vmem:[%s11529_s5 + $0x8] sm:$0xff]   ;;  %v2924_v20 = vld [vmem:[#allocation4 + $0xa] ss:$2 sm:$0xff] }
 0x380   :  { %8701 = vmatmul.mubr.msk.bf16.vlgmr.msra.gmra.mrb[44].mxu0 %vm1652_vm6, %v2817_v21  ;;  %8653 = vmatpush3.bf16.msra.mxu1 %v9419_v17  ;;  %v7645_v17 = vld [vmem:[%s11547_s26 + $0x4] sm:$0xf]  ;;  %v3683_v23 = vld [vmem:[%s11547_s26] sm:$0xf] }
 0x381   :  { %8644 = vmatprep.mubr.msk.bf16.mxu1 %vm9650_vm5, %v9649_v1  ;;  %v2455_v28 = vmax.f32 %v2445_v62, 0.0  ;;  %v2446_v29 = vadd.f32 %v10319_v16, %v2429_v26  ;;  %8654 = vmatprep.subr.bf16.mxu1 %v9649_v1  ;;  %v3745_v22 = vsel %vm276_vm0, %v7645_v17, 0  ;;  %v3684_v26 = vld [vmem:[#allocation2 + $0x6] ss:$2 sm:$0xff]  ;;  %v3685_v45 = vld [vmem:[#allocation2 + $0x16] ss:$2 sm:$0xff] }
 0x382   :  { %8704 = vmatprep.mubr.msk.bf16.mxu0 %vm9650_vm5, %v9649_v1  ;;  %v2926_v19 = vld [vmem:[#allocation4 + $0x1a] ss:$2 sm:$0xff]  ;;  %v3703_v27 = vpack.c.bf16 %v3685_v45, %v3684_v26  ;;  %v9436_v26 = vld [vmem:[%s11531_s7 + $0x94] ss:$8 sps:$4 sm:$0xff]  }
 0x383   :  { %2465 = vst.msk [vmem:[#allocation4 + $0x38] sm:$0xff] %vm1652_vm6, %v2455_v28  ;;  %v2456_v30 = vmax.f32 %v2446_v29, 0.0  ;;  %v2933_v21 = vpack.c.bf16 %v2926_v19, %v2924_v20  ;;  %v3686_v28 = vld [vmem:[#allocation2 + $0x26] ss:$2 sm:$0xff]  ;;  %v3687_v29 = vld [vmem:[#allocation2 + $0x36] ss:$2 sm:$0xff] }
 0x384   :  { %v2415_v31 = vpop.f32.mrb[96].mxu1  ;;  %8655 = vmatpush3.bf16.msra.mxu1 %v9420_v48  ;;  %v2496_v42 = vld [vmem:[#allocation4 + $0x27] ss:$2 sm:$0xff]  ;;  %v2475_v63 = vld [vmem:[#allocation4 + $0x26] ss:$2 sm:$0xff] }
 0x385   :  { %2466 = vst.msk [vmem:[#allocation4 + $0x40] sm:$0xff] %vm1652_vm6, %v2456_v30  ;;  %v2430_v33 = vadd.f32 %v2415_v31, %v10284_v3  ;;  %v8630_v34 = vpop.f32.mrb[97].mxu1  ;;  %8656 = vmatprep.subr.bf16.mxu1 %v9649_v1  ;;  %v2812_v47 = vld [vmem:[#allocation4 + $0x29] ss:$2 sm:$0xff]  ;;  %v2696_v8 = vld [vmem:[#allocation4 + $0x28] ss:$2 sm:$0xff] }
 0x386   :  { %v2418_v35 = vpop.f32.mrb[98].mxu1  ;;  %v3688_v30 = vld [vmem:[#allocation2 + $0x46] ss:$2 sm:$0xff]  ;;  %v3689_v31 = vld [vmem:[#allocation2 + $0x56] ss:$2 sm:$0xff]  ;;  %v3890_v34 = vsel %vm276_vm0, %v3683_v23, 0 }
 0x387   :  { %v2447_v36 = vadd.f32 %v10319_v16, %v2430_v33  ;;  %v2431_v37 = vadd.f32 %v2418_v35, %v10307_v12  ;;  %v8631_v38 = vpop.f32.mrb[99].mxu1  ;;  %v3705_v33 = vpack.c.bf16 %v3689_v31, %v3688_v30  ;;  %v7666_v35 = vld [vmem:[%s11547_s26 + $0x8] sm:$0xf]  ;;  %v4005_v30 = vld [vmem:[#allocation2 + $0x17] ss:$2 sm:$0xff] }
 0x388   :  { %8657 = vmatpush3.bf16.msra.mxu1 %v9421_v32  ;;  %v3704_v32 = vpack.c.bf16 %v3687_v29, %v3686_v28  ;;  %v3692_v38 = vld [vmem:[#allocation2 + $0x86] ss:$2 sm:$0xff]  ;;  %v4065_v59 = vsel %vm276_vm0, %v7666_v35, 0  ;;  %v3672_v28 = vld [vmem:[#allocation2 + $0x125] ss:$2 sm:$0x3f] }
 0x389   :  { %v2457_v40 = vmax.f32 %v2447_v36, 0.0  ;;  %v2448_v41 = vadd.f32 %v10319_v16, %v2431_v37  ;;  %8658 = vmatprep.subr.bf16.mxu1 %v9649_v1  ;;  %v3690_v36 = vld [vmem:[#allocation2 + $0x66] ss:$2 sm:$0xff]  ;;  %v3691_v37 = vld [vmem:[#allocation2 + $0x76] ss:$2 sm:$0xff] }
 0x38a   :  { %v2928_v25 = vld [vmem:[#allocation4 + $0x2a] ss:$2 sm:$0xff]  ;;  %v3702_v56 = vld [vmem:[#allocation2 + $0x126] ss:$2 sm:$0x3f] }
 0x38b   :  { %2467 = vst.msk [vmem:[#allocation4 + $0x48] sm:$0xff] %vm1652_vm6, %v2457_v40  ;;  %v2458_v3 = vmax.f32 %v2448_v41, 0.0  ;;  %v3706_v40 = vpack.c.bf16 %v3691_v37, %v3690_v36  ;;  %v9431_v20 = vld [vmem:[%s11531_s7 + $0x80] ss:$8 sps:$4 sm:$0xff]   ;;  %v9442_v31 = vld [vmem:[%s11531_s7 + $0xb4] ss:$8 sps:$4 sm:$0xff]  }
 0x38c   :  { %v2498_v43 = vld [vmem:[#allocation4 + $0x37] ss:$2 sm:$0xff]  ;;  %8659 = vmatpush3.bf16.msra.mxu1 %v9422_v39  ;;  %v2477_v61 = vld [vmem:[#allocation4 + $0x36] ss:$2 sm:$0xff] }
 0x38d   :  { %v2814_v49 = vld [vmem:[#allocation4 + $0x39] ss:$2 sm:$0xff]  ;;  %2469 = vst.msk [vmem:[#allocation4 + $0x50] sm:$0x7] %vm2468_vm8, %v2458_v3  ;;  %v2502_v12 = vpack.c.bf16 %v2498_v43, %v2496_v42  ;;  %8672 = vmatprep.subr.bf16.mxu1 %v9649_v1  ;;  %v2481_v0 = vpack.c.bf16 %v2477_v61, %v2475_v63  ;;  %v2698_v7 = vld [vmem:[#allocation4 + $0x38] ss:$2 sm:$0xff] }
 0x38e   :  { %v2818_v50 = vpack.c.bf16 %v2814_v49, %v2812_v47  ;;  %v2702_v13 = vpack.c.bf16 %v2698_v7, %v2696_v8  ;;  %v3693_v39 = vld [vmem:[#allocation2 + $0x96] ss:$2 sm:$0xff]  ;;  %v3694_v3 = vld [vmem:[#allocation2 + $0xa6] ss:$2 sm:$0xff]  ;;  %v3656_v63 = vld [vmem:[#allocation2 + $0x25] ss:$2 sm:$0xff] }
 0x38f   :  { %8645 = vmatmul.mubr.msk.bf16.gmra.mrb[104].mxu1 %vm1652_vm6, %v2502_v12  ;;  %v3707_v41 = vpack.c.bf16 %v3693_v39, %v3692_v38  ;;  %v3695_v42 = vld [vmem:[#allocation2 + $0xb6] ss:$2 sm:$0xff]  ;;  %v3696_v43 = vld [vmem:[#allocation2 + $0xc6] ss:$2 sm:$0xff]  ;;  %v3663_v7 = vld [vmem:[#allocation2 + $0x95] ss:$2 sm:$0xff] }
 0x390   :  { %8705 = vmatmul.mubr.msk.bf16.gmra.mrb[48].mxu0 %vm1652_vm6, %v2818_v50  ;;  %8648 = vmatprep.mubr.msk.bf16.mxu1 %vm9650_vm5, %v9649_v1  ;;  %v3697_v47 = vld [vmem:[#allocation2 + $0xd6] ss:$2 sm:$0xff]  ;;  %v3708_v49 = vpack.c.bf16 %v3695_v42, %v3694_v3  ;;  %v3698_v50 = vld [vmem:[#allocation2 + $0xe6] ss:$2 sm:$0xff]  ;;  %v4004_v29 = vld [vmem:[#allocation2 + $0x7] ss:$2 sm:$0xff] }
 0x391   :  { %8708 = vmatprep.mubr.msk.bf16.mxu0 %vm9650_vm5, %v9649_v1  ;;  %v3709_v12 = vpack.c.bf16 %v3697_v47, %v3696_v43  ;;  %v9443_v36 = vld [vmem:[%s11531_s7 + $0xc0] ss:$8 sps:$4 sm:$0xff]   ;;  %v9446_v3 = vld [vmem:[%s11531_s7 + $0xd0] ss:$8 sps:$4 sm:$0xff]   ;;  %v9451_v47 = vld [vmem:[%s11531_s7 + $0xe4] ss:$8 sps:$4 sm:$0xff]  }
 0x392   :  { %v2930_v24 = vld [vmem:[#allocation4 + $0x3a] ss:$2 sm:$0xff]  ;;  %v4006_v37 = vld [vmem:[#allocation2 + $0x27] ss:$2 sm:$0xff]  ;;  %v4007_v38 = vld [vmem:[#allocation2 + $0x37] ss:$2 sm:$0xff] }
 0x393   :  { %v2934_v62 = vpack.c.bf16 %v2930_v24, %v2928_v25  ;;  %v3670_v24 = vld [vmem:[#allocation2 + $0x105] ss:$2 sm:$0xff]  ;;  %v3671_v25 = vld [vmem:[#allocation2 + $0x115] ss:$2 sm:$0xff]  ;;  %v4024_v42 = vpack.c.bf16 %v4007_v38, %v4006_v37 }
 0x394   :  { %v2500_v16 = vld [vmem:[#allocation4 + $0x47] ss:$2 sm:$0x3f]  ;;  %v2479_v2 = vld [vmem:[#allocation4 + $0x46] ss:$2 sm:$0x3f] }
 0x395   :  { %v2816_v53 = vld [vmem:[#allocation4 + $0x49] ss:$2 sm:$0x3f]  ;;  %v2503_v54 = vpack.c.bf16 %v2500_v16, %v2500_v16  ;;  %v2482_v51 = vpack.c.bf16 %v2479_v2, %v2479_v2  ;;  %v2700_v15 = vld [vmem:[#allocation4 + $0x48] ss:$2 sm:$0x3f] }
 0x396   :  { %v2819_v55 = vpack.c.bf16 %v2816_v53, %v2816_v53  ;;  %v2703_v18 = vpack.c.bf16 %v2700_v15, %v2700_v15  ;;  %v2932_v10 = vld [vmem:[#allocation4 + $0x4a] ss:$2 sm:$0x3f]  ;;  %v3666_v15 = vld [vmem:[#allocation2 + $0xc5] ss:$2 sm:$0xff] }
 0x397   :  { %8649 = vmatmul.mubr.msk.bf16.gmra.mrb[108].mxu1 %vm1652_vm6, %v2503_v54  ;;  %v2935_v48 = vpack.c.bf16 %v2932_v10, %v2932_v10  ;;  %v3699_v16 = vld [vmem:[#allocation2 + $0xf6] ss:$2 sm:$0xff]  ;;  %v3700_v53 = vld [vmem:[#allocation2 + $0x106] ss:$2 sm:$0xff]  ;;  %v3681_v10 = vpack.c.bf16 %v3671_v25, %v3670_v24  ;;  %v4008_v39 = vld [vmem:[#allocation2 + $0x47] ss:$2 sm:$0xff] }
 0x398   :  { %8709 = vmatmul.mubr.msk.bf16.gmra.mrb[52].mxu0 %vm1652_vm6, %v2819_v55  ;;  %8660 = vmatprep.mubr.msk.bf16.mxu1 %vm9650_vm5, %v9649_v1  ;;  %v3701_v54 = vld [vmem:[#allocation2 + $0x116] ss:$2 sm:$0xff]  ;;  %v3710_v55 = vpack.c.bf16 %v3699_v16, %v3698_v50  ;;  %v4010_v50 = vld [vmem:[#allocation2 + $0x67] ss:$2 sm:$0xff]  ;;  %v4011_v16 = vld [vmem:[#allocation2 + $0x77] ss:$2 sm:$0xff] }
 0x399   :  { %v3711_v44 = vpack.c.bf16 %v3701_v54, %v3700_v53  ;;  %v7688_v53 = vld [vmem:[%s11547_s26 + $0x10] sm:$0xf] }
 0x39a   :  { %v4012_v54 = vld [vmem:[#allocation2 + $0x87] ss:$2 sm:$0xff]  ;;  %v4200_v25 = vld [vmem:[#allocation2 + $0x28] ss:$2 sm:$0xff] }
 0x39f   :  { %8661 = vmatmul.mubr.msk.bf16.vlgmr.msra.gmra.mrb[112].mxu1 %vm1652_vm6, %v2480_v58  ;;  %v3655_v58 = vld [vmem:[#allocation2 + $0x15] ss:$2 sm:$0xff] }
 0x3a0   :  { %8673 = vmatpush3.bf16.msra.mxu1 %v9423_v57  ;;  %8664 = vmatprep.mubr.msk.bf16.mxu1 %vm9650_vm5, %v9649_v1  ;;  %v3654_v57 = vld [vmem:[#allocation2 + $0x5] ss:$2 sm:$0xff] }
 0x3a1   :  { %8674 = vmatprep.subr.bf16.mxu1 %v9649_v1  ;;  %v3673_v61 = vpack.c.bf16 %v3655_v58, %v3654_v57  ;;  %v9651_v57 = vmov 0   ;;  %v9457_v58 = vld [vmem:[%s11531_s7 + $0x4] ss:$8 sps:$4 sm:$0xff]  }
 0x3a2   :  { %3222 = vmatprep.mubr.bf16.mxu0 %v9651_v57 }
 0x3a4   :  { %8675 = vmatpush3.bf16.msra.mxu1 %v9424_v60  ;;  %v3712_v60 = vpack.c.bf16 %v3702_v56, %v3702_v56  ;;  %v9452_v56 = vld [vmem:[%s11531_s7 + $0xf0] ss:$8 sps:$4 sm:$0xff]  }
 0x3a5   :  { %8676 = vmatprep.subr.bf16.mxu1 %v9649_v1 }
 0x3a7   :  { %8665 = vmatmul.mubr.msk.bf16.gmra.mrb[116].mxu1 %vm1652_vm6, %v2481_v0  ;;  %v3658_v0 = vld [vmem:[#allocation2 + $0x45] ss:$2 sm:$0xff] }
 0x3a8   :  { %8677 = vmatpush3.bf16.msra.mxu1 %v9425_v46  ;;  %8668 = vmatprep.mubr.msk.bf16.mxu1 %vm9650_vm5, %v9649_v1  ;;  %v3657_v46 = vld [vmem:[#allocation2 + $0x35] ss:$2 sm:$0xff] }
 0x3a9   :  { %8678 = vmatprep.subr.bf16.mxu1 %v9649_v1  ;;  %v3674_v2 = vpack.c.bf16 %v3657_v46, %v3656_v63  ;;  %v4014_v63 = vld [vmem:[#allocation2 + $0xa7] ss:$2 sm:$0xff]  ;;  %v4015_v46 = vld [vmem:[#allocation2 + $0xb7] ss:$2 sm:$0xff] }
 0x3ac   :  { %8679 = vmatpush3.bf16.msra.mxu1 %v9426_v11  ;;  %v3659_v11 = vld [vmem:[#allocation2 + $0x55] ss:$2 sm:$0xff] }
 0x3ad   :  { %8712 = vmatprep.subr.bf16.mxu1 %v9649_v1 }
 0x3af   :  { %8669 = vmatmul.mubr.msk.bf16.gmra.mrb[120].mxu1 %vm1652_vm6, %v2482_v51  ;;  %v3675_v51 = vpack.c.bf16 %v3659_v11, %v3658_v0  ;;  %v4016_v0 = vld [vmem:[#allocation2 + $0xc7] ss:$2 sm:$0xff]  ;;  %v4017_v11 = vld [vmem:[#allocation2 + $0xd7] ss:$2 sm:$0xff] }
 0x3b0   :  { %8680 = vmatprep.mubr.msk.bf16.mxu1 %vm9650_vm5, %v9649_v1 }
 0x3b7   :  { %8681 = vmatmul.mubr.msk.bf16.vlgmr.msra.gmra.mrb[124].mxu1 %vm1652_vm6, %v2701_v52  ;;  %v3661_v52 = vld [vmem:[#allocation2 + $0x75] ss:$2 sm:$0xff] }
 0x3b8   :  { %8713 = vmatpush3.bf16.msra.mxu1 %v9427_v5  ;;  %8684 = vmatprep.mubr.msk.bf16.mxu1 %vm9650_vm5, %v9649_v1  ;;  %v3660_v5 = vld [vmem:[#allocation2 + $0x65] ss:$2 sm:$0xff] }
 0x3b9   :  { %8714 = vmatprep.subr.bf16.mxu1 %v9649_v1  ;;  %v3676_v8 = vpack.c.bf16 %v3661_v52, %v3660_v5  ;;  %v4020_v5 = vld [vmem:[#allocation2 + $0x107] ss:$2 sm:$0xff]  ;;  %v4021_v52 = vld [vmem:[#allocation2 + $0x117] ss:$2 sm:$0xff] }
 0x3bc   :  { %8715 = vmatpush3.bf16.msra.mxu1 %v9428_v6  ;;  %v3662_v6 = vld [vmem:[#allocation2 + $0x85] ss:$2 sm:$0xff] }
 0x3bd   :  { %8716 = vmatprep.subr.bf16.mxu1 %v9649_v1 }
 0x3bf   :  { %8685 = vmatmul.mubr.msk.bf16.gmra.mrb[128].mxu1 %vm1652_vm6, %v2702_v13  ;;  %v3664_v13 = vld [vmem:[#allocation2 + $0xa5] ss:$2 sm:$0xff] }
 0x3c0   :  { %8717 = vmatpush3.bf16.msra.mxu1 %v9429_v9  ;;  %8688 = vmatprep.mubr.msk.bf16.mxu1 %vm9650_vm5, %v9649_v1  ;;  %v3677_v9 = vpack.c.bf16 %v3663_v7, %v3662_v6  ;;  %v4031_v7 = vpack.c.bf16 %v4021_v52, %v4020_v5 }
 0x3c1   :  { %8718 = vmatprep.subr.bf16.mxu1 %v9649_v1 }
 0x3c4   :  { %8719 = vmatpush3.bf16.msra.mxu1 %v9430_v14  ;;  %v3665_v14 = vld [vmem:[#allocation2 + $0xb5] ss:$2 sm:$0xff] }
 0x3c5   :  { %9381 = vmatprep.subr.msk.bf16.mxu1 %vm276_vm0, %v7645_v17  ;;  %v3667_v17 = vld [vmem:[#allocation2 + $0xd5] ss:$2 sm:$0xff] }
 0x3c6   :  { %v3679_v19 = vpack.c.bf16 %v3667_v17, %v3666_v15 }
 0x3c7   :  { %8689 = vmatmul.mubr.msk.bf16.gmra.mrb[132].mxu1 %vm1652_vm6, %v2703_v18  ;;  %v3678_v18 = vpack.c.bf16 %v3665_v14, %v3664_v13  ;;  %v4199_v13 = vld [vmem:[#allocation2 + $0x18] ss:$2 sm:$0xff] }
 0x3c8   :  { %8720 = vmatprep.mubr.msk.bf16.mxu1 %vm9650_vm5, %v9649_v1 }
 0x3cf   :  { %8721 = vmatmul.mubr.msk.bf16.vlgmr.msra.gmra.mrb[136].mxu1 %vm1652_vm6, %v2933_v21  ;;  %v9433_v21 = vld [vmem:[%s11531_s7 + $0x84] ss:$8 sps:$4 sm:$0xff]  }
 0x3d0   :  { %8733 = vmatpush3.bf16.msra.mxu1 %v3745_v22  ;;  %8724 = vmatprep.mubr.msk.bf16.mxu1 %vm9650_vm5, %v9649_v1  ;;  %v3668_v22 = vld [vmem:[#allocation2 + $0xe5] ss:$2 sm:$0xff] }
 0x3d1   :  { %9382 = vmatprep.subr.msk.bf16.mxu1 %vm276_vm0, %v3683_v23  ;;  %v3669_v23 = vld [vmem:[#allocation2 + $0xf5] ss:$2 sm:$0xff]  ;;  %3190 = vmatprep.subr.bf16.mxu0 %v9433_v21 }
 0x3d2   :  { %3191 = vmatpush1.bf16.msra.mxu0 %v9431_v20  ;;  %v3680_v45 = vpack.c.bf16 %v3669_v23, %v3668_v22 }
 0x3d3   :  { %3192 = vmatprep.subr.bf16.mxu0 %v9436_v26  ;;  %v4202_v26 = vld [vmem:[#allocation2 + $0x48] ss:$2 sm:$0xff] }
 0x3d7   :  { %8725 = vmatmul.mubr.msk.bf16.gmra.mrb[140].mxu1 %vm1652_vm6, %v2934_v62  ;;  %v9434_v62 = vld [vmem:[%s11531_s7 + $0x90] ss:$8 sps:$4 sm:$0xff]  }
 0x3d8   :  { %8728 = vmatprep.mubr.msk.bf16.mxu1 %vm9650_vm5, %v9649_v1  ;;  %3193 = vmatpush1.bf16.msra.mxu0 %v9434_v62  ;;  %v4201_v62 = vld [vmem:[#allocation2 + $0x38] ss:$2 sm:$0xff] }
 0x3df   :  { %8729 = vmatmul.mubr.msk.bf16.gmra.mrb[144].mxu1 %vm1652_vm6, %v2935_v48  ;;  %v9437_v48 = vld [vmem:[%s11531_s7 + $0xa0] ss:$8 sps:$4 sm:$0xff]  }
 0x3e0   :  { %8734 = vmatprep.mubr.msk.bf16.mxu1 %vm107_vm2, %v3703_v27  ;;  %v9439_v27 = vld [vmem:[%s11531_s7 + $0xa4] ss:$8 sps:$4 sm:$0xff]  }
 0x3e1   :  { %3194 = vmatprep.subr.bf16.mxu0 %v9439_v27 }
 0x3e2   :  { %3195 = vmatpush1.bf16.msra.mxu0 %v9437_v48  ;;  %v4453_v48 = vsel %vm276_vm0, %v7688_v53, 0 }
 0x3e3   :  { %3196 = vmatprep.subr.bf16.mxu0 %v9442_v31  ;;  %v4206_v31 = vld [vmem:[#allocation2 + $0x88] ss:$2 sm:$0xff] }
 0x3e7   :  { %8735 = vmatmul.mubr.msk.bf16.vlgmr.msra.gmra.mrb[148].mxu1 %vm107_vm2, %v3704_v32  ;;  %v9440_v32 = vld [vmem:[%s11531_s7 + $0xb0] ss:$8 sps:$4 sm:$0xff]  }
 0x3e8   :  { %8755 = vmatpush3.bf16.msra.mxu1 %v3890_v34  ;;  %8738 = vmatprep.mubr.msk.bf16.mxu1 %vm107_vm2, %v3705_v33  ;;  %v3682_v33 = vpack.c.bf16 %v3672_v28, %v3672_v28  ;;  %v4023_v34 = vpack.c.bf16 %v4005_v30, %v4004_v29  ;;  %v10672_v28 = vld [vmem:[%s11547_s26 + $0x14] sm:$0xf]  ;;  %v4205_v30 = vld [vmem:[#allocation2 + $0x78] ss:$2 sm:$0xff] }
 0x3e9   :  { %9383 = vmatprep.subr.msk.bf16.mxu1 %vm276_vm0, %v7666_v35  ;;  %3197 = vmatpush1.bf16.msra.mxu0 %v9440_v32  ;;  %v9445_v35 = vld [vmem:[%s11531_s7 + $0xc4] ss:$8 sps:$4 sm:$0xff]  }
 0x3ea   :  { %3198 = vmatprep.subr.bf16.mxu0 %v9445_v35  ;;  %v4204_v29 = vld [vmem:[#allocation2 + $0x68] ss:$2 sm:$0xff]  ;;  %v4207_v32 = vld [vmem:[#allocation2 + $0x98] ss:$2 sm:$0xff] }
 0x3eb   :  { %v4220_v37 = vpack.c.bf16 %v4205_v30, %v4204_v29 }
 0x3ed   :  { %3199 = vmatpush1.bf16.msra.mxu0 %v9443_v36 }
 0x3ef   :  { %8739 = vmatmul.mubr.msk.bf16.gmra.mrb[152].mxu1 %vm107_vm2, %v3706_v40  ;;  %v4009_v40 = vld [vmem:[#allocation2 + $0x57] ss:$2 sm:$0xff] }
 0x3f0   :  { %8742 = vmatprep.mubr.msk.bf16.mxu1 %vm107_vm2, %v3707_v41  ;;  %v9448_v41 = vld [vmem:[%s11531_s7 + $0xd4] ss:$8 sps:$4 sm:$0xff]   ;;  %v4025_v43 = vpack.c.bf16 %v4009_v40, %v4008_v39  ;;  %v4221_v40 = vpack.c.bf16 %v4207_v32, %v4206_v31  ;;  %v4647_v32 = vsel %vm276_vm0, %v10672_v28, 0 }
 0x3f1   :  { %3200 = vmatprep.subr.bf16.mxu0 %v9448_v41 }
 0x3f2   :  { %3201 = vmatpush1.bf16.msra.mxu0 %v9446_v3 }
 0x3f3   :  { %3202 = vmatprep.subr.bf16.mxu0 %v9451_v47  ;;  %v4210_v47 = vld [vmem:[#allocation2 + $0xc8] ss:$2 sm:$0xff] }
 0x3f7   :  { %8743 = vmatmul.mubr.msk.bf16.gmra.mrb[156].mxu1 %vm107_vm2, %v3708_v49  ;;  %v4259_v49 = vsel %vm276_vm0, %v10582_v4, 0 }
 0x3f8   :  { %8746 = vmatprep.mubr.msk.bf16.mxu1 %vm107_vm2, %v3709_v12  ;;  %v9449_v12 = vld [vmem:[%s11531_s7 + $0xe0] ss:$8 sps:$4 sm:$0xff]  }
 0x3f9   :  { %3203 = vmatpush1.bf16.msra.mxu0 %v9449_v12 }
 0x3ff   :  { %8747 = vmatmul.mubr.msk.bf16.gmra.mrb[160].mxu1 %vm107_vm2, %v3710_v55  ;;  %v9454_v55 = vld [vmem:[%s11531_s7 + $0xf4] ss:$8 sps:$4 sm:$0xff]  }
 0x400   :  { %8750 = vmatprep.mubr.msk.bf16.mxu1 %vm107_vm2, %v3711_v44  ;;  %v4013_v44 = vld [vmem:[#allocation2 + $0x97] ss:$2 sm:$0xff]  ;;  %3204 = vmatprep.subr.bf16.mxu0 %v9454_v55 }
 0x401   :  { %3205 = vmatpush1.bf16.msra.mxu0 %v9452_v56 }
 0x402   :  { %3321 = vmatprep.subr.bf16.mxu0 %v9457_v58 }
 0x407   :  { %8751 = vmatmul.mubr.msk.bf16.gmra.mrb[164].mxu1 %vm107_vm2, %v3712_v60  ;;  %v4026_v60 = vpack.c.bf16 %v4011_v16, %v4010_v50 }
 0x408   :  { %8756 = vmatprep.mubr.msk.bf16.mxu1 %vm107_vm2, %v3673_v61  ;;  %v4027_v61 = vpack.c.bf16 %v4013_v44, %v4012_v54 }
 0x40f   :  { %8757 = vmatmul.mubr.msk.bf16.vlgmr.msra.gmra.mrb[148].mxu1 %vm107_vm2, %v3674_v2  ;;  %v4028_v2 = vpack.c.bf16 %v4015_v46, %v4014_v63  ;;  %v4213_v63 = vld [vmem:[#allocation2 + $0xf8] ss:$2 sm:$0xff]  ;;  %v4214_v46 = vld [vmem:[#allocation2 + $0x108] ss:$2 sm:$0xff] }
 0x410   :  { %8777 = vmatpush3.bf16.msra.mxu1 %v4065_v59  ;;  %8760 = vmatprep.mubr.msk.bf16.mxu1 %vm107_vm2, %v3675_v51  ;;  %v4029_v51 = vpack.c.bf16 %v4017_v11, %v4016_v0  ;;  %v4018_v59 = vld [vmem:[#allocation2 + $0xe7] ss:$2 sm:$0xff]  ;;  %v4215_v0 = vld [vmem:[#allocation2 + $0x118] ss:$2 sm:$0xff] }
 0x411   :  { %9384 = vmatprep.subr.msk.bf16.mxu1 %vm276_vm0, %v10582_v4  ;;  %v4019_v4 = vld [vmem:[#allocation2 + $0xf7] ss:$2 sm:$0xff]  ;;  %v4225_v5 = vpack.c.bf16 %v4215_v0, %v4214_v46 }
 0x412   :  { %v4030_v6 = vpack.c.bf16 %v4019_v4, %v4018_v59 }
 0x417   :  { %8761 = vmatmul.mubr.msk.bf16.gmra.mrb[152].mxu1 %vm107_vm2, %v3676_v8  ;;  %v4022_v8 = vld [vmem:[#allocation2 + $0x127] ss:$2 sm:$0x3f] }
 0x418   :  { %8764 = vmatprep.mubr.msk.bf16.mxu1 %vm107_vm2, %v3677_v9  ;;  %v4198_v9 = vld [vmem:[#allocation2 + $0x8] ss:$2 sm:$0xff] }
 0x419   :  { %v4217_v22 = vpack.c.bf16 %v4199_v13, %v4198_v9  ;;  %v4393_v9 = vld [vmem:[#allocation2 + $0x19] ss:$2 sm:$0xff] }
 0x41f   :  { %8765 = vmatmul.mubr.msk.bf16.gmra.mrb[156].mxu1 %vm107_vm2, %v3678_v18 }
 0x420   :  { %8768 = vmatprep.mubr.msk.bf16.mxu1 %vm107_vm2, %v3679_v19  ;;  %v4032_v19 = vpack.c.bf16 %v4022_v8, %v4022_v8  ;;  %v4392_v8 = vld [vmem:[#allocation2 + $0x9] ss:$2 sm:$0xff] }
 0x427   :  { %8769 = vmatmul.mubr.msk.bf16.gmra.mrb[160].mxu1 %vm107_vm2, %v3680_v45  ;;  %v4203_v45 = vld [vmem:[#allocation2 + $0x58] ss:$2 sm:$0xff] }
 0x428   :  { %8772 = vmatprep.mubr.msk.bf16.mxu1 %vm107_vm2, %v3681_v10  ;;  %v4218_v10 = vpack.c.bf16 %v4201_v62, %v4200_v25  ;;  %v4219_v27 = vpack.c.bf16 %v4203_v45, %v4202_v26  ;;  %v4395_v25 = vld [vmem:[#allocation2 + $0x39] ss:$2 sm:$0xff]  ;;  %v4396_v62 = vld [vmem:[#allocation2 + $0x49] ss:$2 sm:$0xff] }
 0x429   :  { %v4397_v26 = vld [vmem:[#allocation2 + $0x59] ss:$2 sm:$0xff] }
 0x42a   :  { %v4413_v30 = vpack.c.bf16 %v4397_v26, %v4396_v62 }
 0x42f   :  { %8773 = vmatmul.mubr.msk.bf16.gmra.mrb[168].mxu1 %vm107_vm2, %v3682_v33 }
 0x430   :  { %8778 = vmatprep.mubr.msk.bf16.mxu1 %vm107_vm2, %v4023_v34 }
 0x437   :  { %8779 = vmatmul.mubr.msk.bf16.vlgmr.msra.gmra.mrb[148].mxu1 %vm107_vm2, %v4024_v42  ;;  %v4208_v42 = vld [vmem:[#allocation2 + $0xa8] ss:$2 sm:$0xff] }
 0x438   :  { %8799 = vmatpush3.bf16.msra.mxu1 %v4259_v49  ;;  %8782 = vmatprep.mubr.msk.bf16.mxu1 %vm107_vm2, %v4025_v43  ;;  %v4209_v43 = vld [vmem:[#allocation2 + $0xb8] ss:$2 sm:$0xff] }
 0x439   :  { %9385 = vmatprep.subr.msk.bf16.mxu1 %vm276_vm0, %v7688_v53  ;;  %v4211_v49 = vld [vmem:[#allocation2 + $0xd8] ss:$2 sm:$0xff]  ;;  %v4222_v54 = vpack.c.bf16 %v4209_v43, %v4208_v42 }
 0x43a   :  { %v4223_v56 = vpack.c.bf16 %v4211_v49, %v4210_v47 }
 0x43f   :  { %8783 = vmatmul.mubr.msk.bf16.gmra.mrb[152].mxu1 %vm107_vm2, %v4026_v60 }
 0x440   :  { %8786 = vmatprep.mubr.msk.bf16.mxu1 %vm107_vm2, %v4027_v61  ;;  %v4212_v61 = vld [vmem:[#allocation2 + $0xe8] ss:$2 sm:$0xff] }
 0x441   :  { %v4224_v59 = vpack.c.bf16 %v4213_v63, %v4212_v61 }
 0x447   :  { %8787 = vmatmul.mubr.msk.bf16.gmra.mrb[156].mxu1 %vm107_vm2, %v4028_v2 }
 0x448   :  { %8790 = vmatprep.mubr.msk.bf16.mxu1 %vm107_vm2, %v4029_v51 }
 0x44f   :  { %8791 = vmatmul.mubr.msk.bf16.gmra.mrb[160].mxu1 %vm107_vm2, %v4030_v6 }
 0x450   :  { %8794 = vmatprep.mubr.msk.bf16.mxu1 %vm107_vm2, %v4031_v7  ;;  %v4216_v7 = vld [vmem:[#allocation2 + $0x128] ss:$2 sm:$0x3f] }
 0x452   :  { %v2580_v14 = vpop.f32.mrb[100].mxu1 }
 0x453   :  { %v10662_v15 = vpop.f32.mrb[44].mxu0  ;;  %v8642_v17 = vpop.f32.mrb[101].mxu1 }
 0x454   :  { %v8702_v18 = vpop.f32.mrb[45].mxu0  ;;  %v2583_v20 = vpop.f32.mrb[102].mxu1 }
 0x455   :  { %v10664_v21 = vpop.f32.mrb[46].mxu0  ;;  %v8643_v23 = vpop.f32.mrb[103].mxu1 }
 0x456   :  { %v8703_v24 = vpop.f32.mrb[47].mxu0  ;;  %v4411_v23 = vpack.c.bf16 %v4393_v9, %v4392_v8 }
 0x457   :  { %8795 = vmatmul.mubr.msk.bf16.gmra.mrb[172].mxu1 %vm107_vm2, %v4032_v19  ;;  %v4226_v19 = vpack.c.bf16 %v4216_v7, %v4216_v7 }
 0x458   :  { %8800 = vmatprep.mubr.msk.bf16.mxu1 %vm107_vm2, %v4217_v22 }
 0x45f   :  { %8801 = vmatmul.mubr.msk.bf16.vlgmr.msra.gmra.mrb[148].mxu1 %vm107_vm2, %v4218_v10 }
 0x460   :  { %8821 = vmatpush3.bf16.msra.mxu1 %v4453_v48  ;;  %8804 = vmatprep.mubr.msk.bf16.mxu1 %vm107_vm2, %v4219_v27 }
 0x461   :  { %9386 = vmatprep.subr.msk.bf16.mxu1 %vm276_vm0, %v10672_v28 }
 0x462   :  { %v2588_v33 = vpop.f32.mrb[104].mxu1 }
 0x463   :  { %v10678_v34 = vpop.f32.mrb[48].mxu0  ;;  %v8646_v35 = vpop.f32.mrb[105].mxu1 }
 0x464   :  { %v8706_v36 = vpop.f32.mrb[49].mxu0  ;;  %v2591_v38 = vpop.f32.mrb[106].mxu1  ;;  %v4398_v35 = vld [vmem:[#allocation2 + $0x69] ss:$2 sm:$0xff] }
 0x465   :  { %v10680_v39 = vpop.f32.mrb[50].mxu0  ;;  %v8647_v41 = vpop.f32.mrb[107].mxu1  ;;  %v4399_v36 = vld [vmem:[#allocation2 + $0x79] ss:$2 sm:$0xff] }
 0x466   :  { %v8707_v3 = vpop.f32.mrb[51].mxu0 }
 0x467   :  { %8805 = vmatmul.mubr.msk.bf16.gmra.mrb[152].mxu1 %vm107_vm2, %v4220_v37  ;;  %v4400_v37 = vld [vmem:[#allocation2 + $0x89] ss:$2 sm:$0xff]  ;;  %v4414_v3 = vpack.c.bf16 %v4399_v36, %v4398_v35 }
 0x468   :  { %8808 = vmatprep.mubr.msk.bf16.mxu1 %vm107_vm2, %v4221_v40 }
 0x46a   :  { %v2596_v12 = vpop.f32.mrb[108].mxu1 }
 0x46b   :  { %v10684_v50 = vpop.f32.mrb[52].mxu0  ;;  %v8650_v16 = vpop.f32.mrb[109].mxu1 }
 0x46c   :  { %v8710_v53 = vpop.f32.mrb[53].mxu0  ;;  %v2599_v55 = vpop.f32.mrb[110].mxu1 }
 0x46d   :  { %v2915_v44 = vpop.f32.mrb[54].mxu0  ;;  %v8651_v58 = vpop.f32.mrb[111].mxu1  ;;  %v4402_v53 = vld [vmem:[#allocation2 + $0xa9] ss:$2 sm:$0xff] }
 0x46e   :  { %v8711_v60 = vpop.f32.mrb[55].mxu0  ;;  %v4404_v55 = vld [vmem:[#allocation2 + $0xc9] ss:$2 sm:$0xff]  ;;  %v4405_v44 = vld [vmem:[#allocation2 + $0xd9] ss:$2 sm:$0xff] }
 0x46f   :  { %8809 = vmatmul.mubr.msk.bf16.gmra.mrb[156].mxu1 %vm107_vm2, %v4222_v54  ;;  %v4403_v54 = vld [vmem:[#allocation2 + $0xb9] ss:$2 sm:$0xff]  ;;  %v4417_v46 = vpack.c.bf16 %v4405_v44, %v4404_v55 }
 0x470   :  { %8812 = vmatprep.mubr.msk.bf16.mxu1 %vm107_vm2, %v4223_v56  ;;  %v4416_v61 = vpack.c.bf16 %v4403_v54, %v4402_v53  ;;  %v4594_v53 = vld [vmem:[#allocation2 + $0x8a] ss:$2 sm:$0xff]  ;;  %v4595_v54 = vld [vmem:[#allocation2 + $0x9a] ss:$2 sm:$0xff] }
 0x472   :  { %v2669_v11 = vpop.f32.mrb[112].mxu1 }
 0x473   :  { %v2670_v2 = vadd.f32 %v2669_v11, %v2580_v14  ;;  %v8662_v51 = vpop.f32.mrb[113].mxu1 }
 0x474   :  { %v2672_v4 = vpop.f32.mrb[114].mxu1  ;;  %v4407_v51 = vld [vmem:[#allocation2 + $0xf9] ss:$2 sm:$0xff] }
 0x475   :  { %v2673_v52 = vadd.f32 %v2672_v4, %v2583_v20  ;;  %v8663_v6 = vpop.f32.mrb[115].mxu1  ;;  %v4394_v20 = vld [vmem:[#allocation2 + $0x29] ss:$2 sm:$0xff]  ;;  %v4409_v4 = vld [vmem:[#allocation2 + $0x119] ss:$2 sm:$0xff] }
 0x476   :  { %v4412_v48 = vpack.c.bf16 %v4395_v25, %v4394_v20 }
 0x477   :  { %8813 = vmatmul.mubr.msk.bf16.gmra.mrb[160].mxu1 %vm107_vm2, %v4224_v59  ;;  %v4408_v59 = vld [vmem:[#allocation2 + $0x109] ss:$2 sm:$0xff] }
 0x478   :  { %8816 = vmatprep.mubr.msk.bf16.mxu1 %vm107_vm2, %v4225_v5  ;;  %v4419_v9 = vpack.c.bf16 %v4409_v4, %v4408_v59 }
 0x47a   :  { %v2677_v13 = vpop.f32.mrb[116].mxu1 }
 0x47b   :  { %v2678_v17 = vadd.f32 %v2677_v13, %v2588_v33  ;;  %v8666_v18 = vpop.f32.mrb[117].mxu1  ;;  %v10697_v33 = vld [vmem:[%s11547_s26 + $0x18] sm:$0xf] }
 0x47c   :  { %v2680_v22 = vpop.f32.mrb[118].mxu1  ;;  %v4587_v18 = vld [vmem:[#allocation2 + $0x1a] ss:$2 sm:$0xff] }
 0x47d   :  { %v2681_v14 = vadd.f32 %v2680_v22, %v2591_v38  ;;  %v8667_v24 = vpop.f32.mrb[119].mxu1  ;;  %v4401_v38 = vld [vmem:[#allocation2 + $0x99] ss:$2 sm:$0xff]  ;;  %v7526_v22 = vld [vmem:[%s11532_s6] ss:$0 sm:$0xff] }
 0x47e   :  { %v4415_v43 = vpack.c.bf16 %v4401_v38, %v4400_v37 }
 0x47f   :  { %8817 = vmatmul.mubr.msk.bf16.gmra.mrb[176].mxu1 %vm107_vm2, %v4226_v19 }
 0x480   :  { %8822 = vmatprep.mubr.msk.bf16.mxu1 %vm107_vm2, %v4411_v23 }
 0x482   :  { %v2685_v45 = vpop.f32.mrb[120].mxu1 }
 0x483   :  { %v2686_v10 = vadd.f32 %v2685_v45, %v2596_v12  ;;  %v8670_v27 = vpop.f32.mrb[121].mxu1 }
 0x484   :  { %v2688_v29 = vpop.f32.mrb[122].mxu1  ;;  %v4588_v27 = vld [vmem:[#allocation2 + $0x2a] ss:$2 sm:$0xff] }
 0x485   :  { %v8671_v31 = vpop.f32.mrb[123].mxu1 }
 0x486   :  { %v4591_v31 = vld [vmem:[#allocation2 + $0x5a] ss:$2 sm:$0xff] }
 0x487   :  { %8823 = vmatmul.mubr.msk.bf16.vlgmr.msra.gmra.mrb[148].mxu1 %vm107_vm2, %v4412_v48  ;;  %v4589_v48 = vld [vmem:[#allocation2 + $0x3a] ss:$2 sm:$0xff] }
 0x488   :  { %8843 = vmatpush3.bf16.msra.mxu1 %v4647_v32  ;;  %8826 = vmatprep.mubr.msk.bf16.mxu1 %vm107_vm2, %v4413_v30  ;;  %v4590_v30 = vld [vmem:[#allocation2 + $0x4a] ss:$2 sm:$0xff]  ;;  %v4606_v37 = vpack.c.bf16 %v4589_v48, %v4588_v27 }
 0x489   :  { %9387 = vmatprep.subr.msk.bf16.mxu1 %vm276_vm0, %v10697_v33  ;;  %v9470_v48 = vld [vmem:[%s11531_s7 + $0x50] ss:$8 sps:$4 sm:$0xff]  }
 0x48a   :  { %v2780_v40 = vpop.f32.mrb[124].mxu1 }
 0x48b   :  { %v2802_v41 = vadd.f32 %v2780_v40, %v2670_v2  ;;  %v8682_v28 = vpop.f32.mrb[125].mxu1  ;;  %v4406_v2 = vld [vmem:[#allocation2 + $0xe9] ss:$2 sm:$0xff]  ;;  %v4607_v40 = vpack.c.bf16 %v4591_v31, %v4590_v30 }
 0x48c   :  { %v2783_v42 = vpop.f32.mrb[126].mxu1  ;;  %v4418_v7 = vpack.c.bf16 %v4407_v51, %v4406_v2  ;;  %v9455_v2 = vld [vmem:[%s11531_s7] ss:$8 sps:$4 sm:$0xff]  }
 0x48d   :  { %v2803_v47 = vadd.f32 %v2783_v42, %v2673_v52  ;;  %v8683_v49 = vpop.f32.mrb[127].mxu1  ;;  %v2918_v12 = vadd.f32 %v10662_v15, %v2802_v41  ;;  %v4841_v42 = vsel %vm276_vm0, %v10697_v33, 0  ;;  %v4782_v30 = vld [vmem:[#allocation2 + $0x2b] ss:$2 sm:$0xff]  ;;  %v4783_v31 = vld [vmem:[#allocation2 + $0x3b] ss:$2 sm:$0xff] }
 0x48e   :  { %v4592_v49 = vld [vmem:[#allocation2 + $0x6a] ss:$2 sm:$0xff] }
 0x48f   :  { %8827 = vmatmul.mubr.msk.bf16.gmra.mrb[152].mxu1 %vm107_vm2, %v4414_v3  ;;  %v2919_v16 = vadd.f32 %v10664_v21, %v2803_v47 }
 0x490   :  { %8830 = vmatprep.mubr.msk.bf16.mxu1 %vm107_vm2, %v4415_v43 }
 0x492   :  { %v2788_v56 = vpop.f32.mrb[128].mxu1 }
 0x493   :  { %v2804_v58 = vadd.f32 %v2788_v56, %v2678_v17  ;;  %v8686_v60 = vpop.f32.mrb[129].mxu1 }
 0x494   :  { %v2791_v63 = vpop.f32.mrb[130].mxu1  ;;  %v4609_v60 = vpack.c.bf16 %v4595_v54, %v4594_v53  ;;  %v9479_v53 = vld [vmem:[%s11531_s7 + $0x100] ss:$8 sps:$4 sm:$0xff]  }
 0x495   :  { %v2805_v0 = vadd.f32 %v2791_v63, %v2681_v14  ;;  %v8687_v11 = vpop.f32.mrb[131].mxu1  ;;  %v2920_v15 = vadd.f32 %v10678_v34, %v2804_v58  ;;  %v4410_v34 = vld [vmem:[#allocation2 + $0x129] ss:$2 sm:$0x3f] }
 0x496   :  { %v4420_v24 = vpack.c.bf16 %v4410_v34, %v4410_v34  ;;  %v4597_v11 = vld [vmem:[#allocation2 + $0xba] ss:$2 sm:$0xff]  ;;  %v4602_v34 = vld [vmem:[#allocation2 + $0x10a] ss:$2 sm:$0xff] }
 0x497   :  { %8831 = vmatmul.mubr.msk.bf16.gmra.mrb[156].mxu1 %vm107_vm2, %v4416_v61  ;;  %v2921_v21 = vadd.f32 %v10680_v39, %v2805_v0  ;;  %v4586_v39 = vld [vmem:[#allocation2 + $0xa] ss:$2 sm:$0xff] }
 0x498   :  { %8834 = vmatprep.mubr.msk.bf16.mxu1 %vm107_vm2, %v4417_v46  ;;  %v4605_v25 = vpack.c.bf16 %v4587_v18, %v4586_v39  ;;  %v4596_v0 = vld [vmem:[#allocation2 + $0xaa] ss:$2 sm:$0xff]  ;;  %v4603_v39 = vld [vmem:[#allocation2 + $0x11a] ss:$2 sm:$0xff] }
 0x499   :  { %v9461_v18 = vld [vmem:[%s11531_s7 + $0x20] ss:$8 sps:$4 sm:$0xff]  }
 0x49a   :  { %v2796_v5 = vpop.f32.mrb[132].mxu1 }
 0x49b   :  { %v2806_v52 = vadd.f32 %v2796_v5, %v2686_v10  ;;  %v8690_v6 = vpop.f32.mrb[133].mxu1  ;;  %v4610_v5 = vpack.c.bf16 %v4597_v11, %v4596_v0  ;;  %v4791_v11 = vld [vmem:[#allocation2 + $0xbb] ss:$2 sm:$0xff] }
 0x49c   :  { %v2799_v8 = vpop.f32.mrb[134].mxu1 }
 0x49d   :  { %v8691_v13 = vpop.f32.mrb[135].mxu1  ;;  %v2922_v17 = vadd.f32 %v10684_v50, %v2806_v52  ;;  %v9460_v52 = vld [vmem:[%s11531_s7 + $0x14] ss:$8 sps:$4 sm:$0xff]   ;;  %v9463_v8 = vld [vmem:[%s11531_s7 + $0x24] ss:$8 sps:$4 sm:$0xff]  }
 0x49f   :  { %8835 = vmatmul.mubr.msk.bf16.gmra.mrb[160].mxu1 %vm107_vm2, %v4418_v7  ;;  %v9458_v7 = vld [vmem:[%s11531_s7 + $0x10] ss:$8 sps:$4 sm:$0xff]  }
 0x4a0   :  { %8838 = vmatprep.mubr.msk.bf16.mxu1 %vm107_vm2, %v4419_v9  ;;  %v4600_v9 = vld [vmem:[#allocation2 + $0xea] ss:$2 sm:$0xff] }
 0x4a2   :  { %v3012_v19 = vpop.f32.mrb[136].mxu1 }
 0x4a3   :  { %v3034_v23 = vadd.f32 %v3012_v19, %v2918_v12  ;;  %v8722_v14 = vpop.f32.mrb[137].mxu1  ;;  %v4593_v12 = vld [vmem:[#allocation2 + $0x7a] ss:$2 sm:$0xff] }
 0x4a4   :  { %v3015_v20 = vpop.f32.mrb[138].mxu1  ;;  %v4608_v33 = vpack.c.bf16 %v4593_v12, %v4592_v49  ;;  %v4613_v14 = vpack.c.bf16 %v4603_v39, %v4602_v34  ;;  %v4789_v49 = vld [vmem:[#allocation2 + $0x9b] ss:$2 sm:$0xff] }
 0x4a5   :  { %v3046_v62 = vadd.f32 %v7526_v22, %v3034_v23  ;;  %v3035_v26 = vadd.f32 %v3015_v20, %v2919_v16  ;;  %v8723_v50 = vpop.f32.mrb[139].mxu1  ;;  %v9466_v23 = vld [vmem:[%s11531_s7 + $0x34] ss:$8 sps:$4 sm:$0xff]   ;;  %v9469_v20 = vld [vmem:[%s11531_s7 + $0x44] ss:$8 sps:$4 sm:$0xff]  }
 0x4a6   :  { %v9467_v50 = vld [vmem:[%s11531_s7 + $0x40] ss:$8 sps:$4 sm:$0xff]   ;;  %v9496_v39 = vld [vmem:[%s11531_s7 + $0x154] ss:$8 sps:$4 sm:$0xff]  }
 0x4a7   :  { %v3051_v45 = vmax.f32 %v3046_v62, 0.0  ;;  %v3047_v10 = vadd.f32 %v7526_v22, %v3035_v26  ;;  %8839 = vmatmul.mubr.msk.bf16.gmra.mrb[180].mxu1 %vm107_vm2, %v4420_v24  ;;  %v9464_v24 = vld [vmem:[%s11531_s7 + $0x30] ss:$8 sps:$4 sm:$0xff]  }
 0x4a8   :  { %8844 = vmatprep.mubr.msk.bf16.mxu1 %vm107_vm2, %v4605_v25  ;;  %v4604_v25 = vld [vmem:[#allocation2 + $0x12a] ss:$2 sm:$0x3f]  ;;  %v4780_v62 = vld [vmem:[#allocation2 + $0xb] ss:$2 sm:$0xff] }
 0x4a9   :  { %3056 = vst [vmem:[#allocation5 + $0x8] sm:$0xff] %v3051_v45  ;;  %v3052_v29 = vmax.f32 %v3047_v10, 0.0  ;;  %v4781_v26 = vld [vmem:[#allocation2 + $0x1b] ss:$2 sm:$0xff]  ;;  %v4614_v45 = vpack.c.bf16 %v4604_v25, %v4604_v25 }
 0x4aa   :  { %v3020_v32 = vpop.f32.mrb[140].mxu1  ;;  %v9472_v10 = vld [vmem:[%s11531_s7 + $0x54] ss:$8 sps:$4 sm:$0xff]   ;;  %v4799_v27 = vpack.c.bf16 %v4781_v26, %v4780_v62  ;;  %v9500_v25 = vld [vmem:[%s11531_s7 + $0x170] ss:$8 sps:$4 sm:$0xff]  }
 0x4ab   :  { %3057 = vst [vmem:[#allocation5 + $0x10] sm:$0xff] %v3052_v29  ;;  %v3036_v35 = vadd.f32 %v3020_v32, %v2920_v15  ;;  %v8726_v36 = vpop.f32.mrb[141].mxu1  ;;  %v4598_v15 = vld [vmem:[#allocation2 + $0xca] ss:$2 sm:$0xff]  ;;  %v4784_v32 = vld [vmem:[#allocation2 + $0x4b] ss:$2 sm:$0xff] }
 0x4ac   :  { %v3023_v38 = vpop.f32.mrb[142].mxu1  ;;  %v9475_v29 = vld [vmem:[%s11531_s7 + $0x64] ss:$8 sps:$4 sm:$0xff]   ;;  %v9473_v36 = vld [vmem:[%s11531_s7 + $0x60] ss:$8 sps:$4 sm:$0xff]  }
 0x4ad   :  { %v3048_v41 = vadd.f32 %v7526_v22, %v3036_v35  ;;  %v3037_v28 = vadd.f32 %v3023_v38, %v2921_v21  ;;  %v8727_v3 = vpop.f32.mrb[143].mxu1  ;;  %v4599_v21 = vld [vmem:[#allocation2 + $0xda] ss:$2 sm:$0xff]  ;;  %v4785_v35 = vld [vmem:[#allocation2 + $0x5b] ss:$2 sm:$0xff] }
 0x4ae   :  { %v4611_v6 = vpack.c.bf16 %v4599_v21, %v4598_v15  ;;  %v9478_v38 = vld [vmem:[%s11531_s7 + $0x74] ss:$8 sps:$4 sm:$0xff]  }
 0x4af   :  { %v3053_v43 = vmax.f32 %v3048_v41, 0.0  ;;  %v3049_v47 = vadd.f32 %v7526_v22, %v3037_v28  ;;  %8845 = vmatmul.mubr.msk.bf16.vlgmr.msra.gmra.mrb[148].mxu1 %vm107_vm2, %v4606_v37  ;;  %v4800_v37 = vpack.c.bf16 %v4783_v31, %v4782_v30  ;;  %v9476_v41 = vld [vmem:[%s11531_s7 + $0x70] ss:$8 sps:$4 sm:$0xff]   ;;  %v9481_v28 = vld [vmem:[%s11531_s7 + $0x104] ss:$8 sps:$4 sm:$0xff]  }
 0x4b0   :  { %8865 = vmatpush3.bf16.msra.mxu1 %v4841_v42  ;;  %8848 = vmatprep.mubr.msk.bf16.mxu1 %vm107_vm2, %v4607_v40  ;;  %v4801_v40 = vpack.c.bf16 %v4785_v35, %v4784_v32  ;;  %v4786_v42 = vld [vmem:[#allocation2 + $0x6b] ss:$2 sm:$0xff]  ;;  %v4793_v21 = vld [vmem:[#allocation2 + $0xdb] ss:$2 sm:$0xff] }
 0x4b1   :  { %3058 = vst [vmem:[#allocation5 + $0x18] sm:$0xff] %v3053_v43  ;;  %v3054_v16 = vmax.f32 %v3049_v47, 0.0  ;;  %9026 = vmatprep.subr.bf16.mxu1 %v9649_v1  ;;  %v4787_v43 = vld [vmem:[#allocation2 + $0x7b] ss:$2 sm:$0xff]  ;;  %v4788_v47 = vld [vmem:[#allocation2 + $0x8b] ss:$2 sm:$0xff] }
 0x4b2   :  { %v3028_v55 = vpop.f32.mrb[144].mxu1  ;;  %v3086_v51 = vld [vmem:[#allocation5 + $0x8] ss:$2 sm:$0xff]  ;;  %v4792_v15 = vld [vmem:[#allocation2 + $0xcb] ss:$2 sm:$0xff] }
 0x4b3   :  { %3059 = vst [vmem:[#allocation5 + $0x20] sm:$0xff] %v3054_v16  ;;  %v3038_v44 = vadd.f32 %v3028_v55, %v2922_v17  ;;  %v8730_v56 = vpop.f32.mrb[145].mxu1  ;;  %v4601_v17 = vld [vmem:[#allocation2 + $0xfa] ss:$2 sm:$0xff]  ;;  %v3062_v16 = vld [vmem:[#allocation5 + $0x7] ss:$2 sm:$0xff] }
 0x4b4   :  { %v3031_v58 = vpop.f32.mrb[146].mxu1  ;;  %v9484_v56 = vld [vmem:[%s11531_s7 + $0x114] ss:$8 sps:$4 sm:$0xff]  }
 0x4b5   :  { %v3050_v61 = vadd.f32 %v7526_v22, %v3038_v44  ;;  %v8731_v63 = vpop.f32.mrb[147].mxu1  ;;  %v4612_v22 = vpack.c.bf16 %v4601_v17, %v4600_v9  ;;  %v4802_v44 = vpack.c.bf16 %v4787_v43, %v4786_v42  ;;  %v4803_v58 = vpack.c.bf16 %v4789_v49, %v4788_v47  ;;  %v4796_v9 = vld [vmem:[#allocation2 + $0x10b] ss:$2 sm:$0xff] }
 0x4b6   :  { %v9487_v63 = vld [vmem:[%s11531_s7 + $0x124] ss:$8 sps:$4 sm:$0xff]   ;;  %v9491_v17 = vld [vmem:[%s11531_s7 + $0x140] ss:$8 sps:$4 sm:$0xff]   ;;  %v3373_v26 = vld [vmem:[#allocation5 + $0x9] ss:$2 sm:$0xff] }
 0x4b7   :  { %v3055_v46 = vmax.f32 %v3050_v61, 0.0  ;;  %8849 = vmatmul.mubr.msk.bf16.gmra.mrb[152].mxu1 %vm107_vm2, %v4608_v33  ;;  %v9482_v61 = vld [vmem:[%s11531_s7 + $0x110] ss:$8 sps:$4 sm:$0xff]   ;;  %v9504_v43 = vld [vmem:[%s11527_s3 + $0x28] sm:$0xff]  }
 0x4b8   :  { %8852 = vmatprep.mubr.msk.bf16.mxu1 %vm107_vm2, %v4609_v60  ;;  %v9505_v47 = vld [vmem:[%s11527_s3 + $0x30] sm:$0xff]   ;;  %v9506_v49 = vld [vmem:[%s11527_s3 + $0x38] sm:$0xff]  }
 0x4b9   :  { %3060 = vst [vmem:[#allocation5 + $0x28] sm:$0x3f] %v3055_v46  ;;  %v4790_v46 = vld [vmem:[#allocation2 + $0xab] ss:$2 sm:$0xff] }
 0x4ba   :  { %v3088_v59 = vld [vmem:[#allocation5 + $0x18] ss:$2 sm:$0xff]  ;;  %v3064_v3 = vld [vmem:[#allocation5 + $0x17] ss:$2 sm:$0xff] }
 0x4bb   :  { %v3091_v4 = vpack.c.bf16 %v3088_v59, %v3086_v51  ;;  %v3067_v55 = vpack.c.bf16 %v3064_v3, %v3062_v16  ;;  %v4804_v59 = vpack.c.bf16 %v4791_v11, %v4790_v46  ;;  %v3375_v62 = vld [vmem:[#allocation5 + $0x19] ss:$2 sm:$0xff] }
 0x4bc   :  { %v9503_v3 = vld [vmem:[%s11527_s3 + $0x20] sm:$0xff]  }
 0x4bd   :  { %3223 = vmatmul.mubr.bf16.vlgmr.msra.gmra.mrb[56].mxu0 %v3091_v4  ;;  %v9490_v4 = vld [vmem:[%s11531_s7 + $0x134] ss:$8 sps:$4 sm:$0xff]  }
 0x4be   :  { %3322 = vmatpush1.bf16.msra.mxu0 %v9455_v2  ;;  %3232 = vmatprep.mubr.bf16.mxu0 %v9651_v57  ;;  %v9485_v2 = vld [vmem:[%s11531_s7 + $0x120] ss:$8 sps:$4 sm:$0xff]  }
 0x4bf   :  { %8853 = vmatmul.mubr.msk.bf16.gmra.mrb[156].mxu1 %vm107_vm2, %v4610_v5  ;;  %3323 = vmatprep.subr.bf16.mxu0 %v9460_v52  ;;  %v4805_v5 = vpack.c.bf16 %v4793_v21, %v4792_v15  ;;  %v9488_v52 = vld [vmem:[%s11531_s7 + $0x130] ss:$8 sps:$4 sm:$0xff]  }
 0x4c0   :  { %v3090_v13 = vld [vmem:[#allocation5 + $0x28] ss:$2 sm:$0x7]  ;;  %8856 = vmatprep.mubr.msk.bf16.mxu1 %vm107_vm2, %v4611_v6  ;;  %v3066_v0 = vld [vmem:[#allocation5 + $0x27] ss:$2 sm:$0x7] }
 0x4c1   :  { %v3092_v19 = vpack.c.bf16 %v3090_v13, %v3090_v13  ;;  %v3068_v51 = vpack.c.bf16 %v3066_v0, %v3066_v0  ;;  %v9493_v6 = vld [vmem:[%s11531_s7 + $0x144] ss:$8 sps:$4 sm:$0xff]  }
 0x4c2   :  { %3324 = vmatpush1.bf16.msra.mxu0 %v9458_v7  ;;  %v4794_v7 = vld [vmem:[#allocation2 + $0xeb] ss:$2 sm:$0xff]  ;;  %v4797_v13 = vld [vmem:[#allocation2 + $0x11b] ss:$2 sm:$0xff] }
 0x4c3   :  { %3325 = vmatprep.subr.bf16.mxu0 %v9463_v8  ;;  %v4795_v8 = vld [vmem:[#allocation2 + $0xfb] ss:$2 sm:$0xff] }
 0x4c4   :  { %v4806_v34 = vpack.c.bf16 %v4795_v8, %v4794_v7  ;;  %v10878_v8 = vld [vmem:[%s11528_s2] ss:$0 sm:$0xff] }
 0x4c5   :  { %3233 = vmatmul.mubr.bf16.gmra.mrb[60].mxu0 %v3092_v19  ;;  %v9494_v19 = vld [vmem:[%s11531_s7 + $0x150] ss:$8 sps:$4 sm:$0xff]  }
 0x4c6   :  { %3326 = vmatpush1.bf16.msra.mxu0 %v9461_v18  ;;  %3353 = vmatprep.mubr.bf16.mxu0 %v9651_v57  ;;  %v4807_v18 = vpack.c.bf16 %v4797_v13, %v4796_v9 }
 0x4c7   :  { %8857 = vmatmul.mubr.msk.bf16.gmra.mrb[160].mxu1 %vm107_vm2, %v4612_v22  ;;  %3327 = vmatprep.subr.bf16.mxu0 %v9466_v23  ;;  %v9499_v22 = vld [vmem:[%s11531_s7 + $0x164] ss:$8 sps:$4 sm:$0xff]  }
 0x4c8   :  { %8860 = vmatprep.mubr.msk.bf16.mxu1 %vm107_vm2, %v4613_v14  ;;  %v4798_v23 = vld [vmem:[#allocation2 + $0x12b] ss:$2 sm:$0x3f] }
 0x4c9   :  { %v9497_v14 = vld [vmem:[%s11531_s7 + $0x160] ss:$8 sps:$4 sm:$0xff]  }
 0x4ca   :  { %3328 = vmatpush1.bf16.msra.mxu0 %v9464_v24  ;;  %v4808_v24 = vpack.c.bf16 %v4798_v23, %v4798_v23 }
 0x4cb   :  { %3329 = vmatprep.subr.bf16.mxu0 %v9469_v20  ;;  %v9502_v20 = vld [vmem:[%s11531_s7 + $0x174] ss:$8 sps:$4 sm:$0xff]  }
 0x4ce   :  { %3330 = vmatpush1.bf16.msra.mxu0 %v9467_v50  ;;  %v3378_v50 = vpack.c.bf16 %v3375_v62, %v3373_v26 }
 0x4cf   :  { %8861 = vmatmul.mubr.msk.bf16.gmra.mrb[184].mxu1 %vm107_vm2, %v4614_v45  ;;  %3331 = vmatprep.subr.bf16.mxu0 %v9472_v10  ;;  %v3377_v45 = vld [vmem:[#allocation5 + $0x29] ss:$2 sm:$0x7] }
 0x4d0   :  { %8866 = vmatprep.mubr.msk.bf16.mxu1 %vm107_vm2, %v4799_v27 }
 0x4d2   :  { %3332 = vmatpush1.bf16.msra.mxu0 %v9470_v48 }
 0x4d3   :  { %3333 = vmatprep.subr.bf16.mxu0 %v9475_v29  ;;  %v3379_v29 = vpack.c.bf16 %v3377_v45, %v3377_v45 }
 0x4d6   :  { %3334 = vmatpush1.bf16.msra.mxu0 %v9473_v36 }
 0x4d7   :  { %8867 = vmatmul.mubr.msk.bf16.vlgmr.msra.gmra.mrb[148].mxu1 %vm107_vm2, %v4800_v37  ;;  %3335 = vmatprep.subr.bf16.mxu0 %v9478_v38 }
 0x4d8   :  { %8870 = vmatprep.mubr.msk.bf16.mxu1 %vm107_vm2, %v4801_v40 }
 0x4da   :  { %3336 = vmatpush1.bf16.msra.mxu0 %v9476_v41  ;;  %v10784_v12 = vpop.f32.mrb[164].mxu1 }
 0x4db   :  { %v10789_v54 = vpop.f32.mrb[165].mxu1  ;;  %3477 = vmatprep.subr.bf16.mxu0 %v9481_v28 }
 0x4dc   :  { %v8753_v33 = vpop.f32.mrb[166].mxu1 }
 0x4dd   :  { %3354 = vmatmul.mubr.bf16.vlgmr.msra.gmra.mrb[56].mxu0 %v3067_v55  ;;  %v10794_v60 = vpop.f32.mrb[167].mxu1 }
 0x4de   :  { %3478 = vmatpush1.bf16.msra.mxu0 %v9479_v53  ;;  %3363 = vmatprep.mubr.bf16.mxu0 %v9651_v57 }
 0x4df   :  { %8871 = vmatmul.mubr.msk.bf16.gmra.mrb[152].mxu1 %vm107_vm2, %v4802_v44  ;;  %3479 = vmatprep.subr.bf16.mxu0 %v9484_v56 }
 0x4e0   :  { %8874 = vmatprep.mubr.msk.bf16.mxu1 %vm107_vm2, %v4803_v58 }
 0x4e2   :  { %3480 = vmatpush1.bf16.msra.mxu0 %v9482_v61 }
 0x4e3   :  { %3481 = vmatprep.subr.bf16.mxu0 %v9487_v63 }
 0x4e5   :  { %3364 = vmatmul.mubr.bf16.gmra.mrb[64].mxu0 %v3068_v51 }
 0x4e6   :  { %3482 = vmatpush1.bf16.msra.mxu0 %v9485_v2  ;;  %3509 = vmatprep.mubr.bf16.mxu0 %v9651_v57 }
 0x4e7   :  { %8875 = vmatmul.mubr.msk.bf16.gmra.mrb[156].mxu1 %vm107_vm2, %v4804_v59  ;;  %3483 = vmatprep.subr.bf16.mxu0 %v9490_v4 }
 0x4e8   :  { %8878 = vmatprep.mubr.msk.bf16.mxu1 %vm107_vm2, %v4805_v5 }
 0x4ea   :  { %3484 = vmatpush1.bf16.msra.mxu0 %v9488_v52 }
 0x4eb   :  { %3485 = vmatprep.subr.bf16.mxu0 %v9493_v6 }
 0x4ee   :  { %3486 = vmatpush1.bf16.msra.mxu0 %v9491_v17 }
 0x4ef   :  { %8879 = vmatmul.mubr.msk.bf16.gmra.mrb[160].mxu1 %vm107_vm2, %v4806_v34  ;;  %3487 = vmatprep.subr.bf16.mxu0 %v9496_v39 }
 0x4f0   :  { %8882 = vmatprep.mubr.msk.bf16.mxu1 %vm107_vm2, %v4807_v18 }
 0x4f2   :  { %3488 = vmatpush1.bf16.msra.mxu0 %v9494_v19 }
 0x4f3   :  { %3489 = vmatprep.subr.bf16.mxu0 %v9499_v22 }
 0x4f6   :  { %3490 = vmatpush1.bf16.msra.mxu0 %v9497_v14 }
 0x4f7   :  { %8883 = vmatmul.mubr.msk.bf16.gmra.mrb[188].mxu1 %vm107_vm2, %v4808_v24  ;;  %3491 = vmatprep.subr.bf16.mxu0 %v9502_v20 }
 0x4f8   :  { %9034 = vmatprep.mubr.msk.bf16.mxu1 %vm9650_vm5, %v9649_v1 }
 0x4fa   :  { %3492 = vmatpush1.bf16.msra.mxu0 %v9500_v25 }
 0x4fb   :  { %8886 = vmatprep.subr.bf16.mxu0 %v9649_v1 }
 0x4fd   :  { %3510 = vmatmul.mubr.bf16.vlgmr.msra.gmra.mrb[56].mxu0 %v3378_v50 }
 0x4fe   :  { %3519 = vmatprep.mubr.bf16.mxu0 %v9651_v57  ;;  %8887 = vmatpush3.bf16.msra.mxu0 %v9503_v3 }
 0x4ff   :  { %8888 = vmatprep.subr.bf16.mxu0 %v9649_v1 }
 0x502   :  { %v8774_v10 = vpop.f32.mrb[168].mxu1  ;;  %8889 = vmatpush3.bf16.msra.mxu0 %v9504_v43 }
 0x503   :  { %v3999_v27 = vadd.f32 %v8774_v10, %v10784_v12  ;;  %v3990_v48 = vpop.f32.mrb[169].mxu1  ;;  %8890 = vmatprep.subr.bf16.mxu0 %v9649_v1 }
 0x504   :  { %v3991_v30 = vadd.f32 %v3990_v48, %v10789_v54  ;;  %v8775_v31 = vpop.f32.mrb[170].mxu1 }
 0x505   :  { %3520 = vmatmul.mubr.bf16.gmra.mrb[68].mxu0 %v3379_v29  ;;  %v3993_v32 = vpop.f32.mrb[171].mxu1 }
 0x506   :  { %v3994_v35 = vadd.f32 %v3993_v32, %v10794_v60  ;;  %8894 = vmatprep.mubr.msk.bf16.mxu0 %vm9650_vm5, %v9649_v1  ;;  %8891 = vmatpush3.bf16.msra.mxu0 %v9505_v47 }
 0x507   :  { %8892 = vmatprep.subr.bf16.mxu0 %v9649_v1 }
 0x50a   :  { %8893 = vmatpush3.bf16.msra.mxu0 %v9506_v49 }
 0x50b   :  { %8914 = vmatprep.subr.bf16.mxu0 %v9649_v1 }
 0x52a   :  { %v8796_v36 = vpop.f32.mrb[172].mxu1 }
 0x52b   :  { %v4197_v37 = vadd.f32 %v8796_v36, %v3999_v27  ;;  %v4165_v38 = vpop.f32.mrb[173].mxu1 }
 0x52c   :  { %v4195_v40 = vadd.f32 %v4165_v38, %v3991_v30  ;;  %v8797_v41 = vpop.f32.mrb[174].mxu1 }
 0x52d   :  { %v4168_v28 = vpop.f32.mrb[175].mxu1  ;;  %v9507_v41 = vld [vmem:[%s11527_s3] sm:$0xff]  }
 0x52e   :  { %v4196_v42 = vadd.f32 %v4168_v28, %v3994_v35 }
 0x552   :  { %v8818_v12 = vpop.f32.mrb[176].mxu1 }
 0x553   :  { %v4391_v16 = vadd.f32 %v8818_v12, %v4197_v37  ;;  %v4359_v53 = vpop.f32.mrb[177].mxu1 }
 0x554   :  { %v4389_v54 = vadd.f32 %v4359_v53, %v4195_v40  ;;  %v8819_v55 = vpop.f32.mrb[178].mxu1 }
 0x555   :  { %v4362_v44 = vpop.f32.mrb[179].mxu1 }
 0x556   :  { %v4390_v56 = vadd.f32 %v4362_v44, %v4196_v42 }
 0x57a   :  { %v8840_v33 = vpop.f32.mrb[180].mxu1 }
 0x57b   :  { %v4585_v58 = vadd.f32 %v8840_v33, %v4391_v16  ;;  %v4553_v60 = vpop.f32.mrb[181].mxu1 }
 0x57c   :  { %v4583_v61 = vadd.f32 %v4553_v60, %v4389_v54  ;;  %v8841_v63 = vpop.f32.mrb[182].mxu1 }
 0x57d   :  { %v4556_v46 = vpop.f32.mrb[183].mxu1 }
 0x57e   :  { %v4584_v0 = vadd.f32 %v4556_v46, %v4390_v56  ;;  %v9508_v56 = vld [vmem:[%s11527_s3 + $0x8] sm:$0xff]  }
 0x598   :  { %v3234_v11 = vpop.f32.mrb[60].mxu0 }
 0x599   :  { %v3236_v15 = vpop.f32.mrb[61].mxu0 }
 0x59a   :  { %v3238_v21 = vpop.f32.mrb[62].mxu0 }
 0x59b   :  { %v3239_v2 = vpop.f32.mrb[63].mxu0 }
 0x5a2   :  { %v8862_v51 = vpop.f32.mrb[184].mxu1 }
 0x5a3   :  { %v10869_v59 = vadd.f32 %v8862_v51, %v4585_v58  ;;  %v4747_v4 = vpop.f32.mrb[185].mxu1 }
 0x5a4   :  { %v10871_v5 = vadd.f32 %v4747_v4, %v4583_v61  ;;  %v8863_v52 = vpop.f32.mrb[186].mxu1 }
 0x5a5   :  { %v4750_v6 = vpop.f32.mrb[187].mxu1 }
 0x5a6   :  { %v10873_v7 = vadd.f32 %v4750_v6, %v4584_v0  ;;  %v3536_v0 = vlaneseq }
 0x5aa   :  { %v8868_v9 = vpop.f32.mrb[148].mxu1 }
 0x5ab   :  { %v4983_v13 = vadd.f32 %v8868_v9, %v10878_v8  ;;  %v4877_v17 = vpop.f32.mrb[149].mxu1 }
 0x5ac   :  { %v4981_v34 = vadd.f32 %v10878_v8, %v4877_v17  ;;  %v8869_v39 = vpop.f32.mrb[150].mxu1  ;;  %v10928_v17 = vshrl.u32 %v3536_v0, 7 }
 0x5ad   :  { %v5002_v18 = vmax.f32 %v4983_v13, 0.0  ;;  %v4984_v19 = vadd.f32 %v8869_v39, %v10878_v8  ;;  %v4880_v22 = vpop.f32.mrb[151].mxu1 }
 0x5ae   :  { %v5000_v23 = vmax.f32 %v4981_v34, 0.0  ;;  %v4982_v14 = vadd.f32 %v10878_v8, %v4880_v22  ;;  %v9510_v34 = vld [vmem:[%s11527_s3 + $0x18] sm:$0xff]  }
 0x5af   :  { %5021 = vst.msk [vmem:[#allocation3 + $0x18] sm:$0xff] %vm1652_vm6, %v5002_v18  ;;  %v5003_v24 = vmax.f32 %v4984_v19, 0.0 }
 0x5b0   :  { %5019 = vst.msk [vmem:[#allocation3 + $0x8] sm:$0xff] %vm1652_vm6, %v5000_v23  ;;  %v5001_v20 = vmax.f32 %v4982_v14, 0.0 }
 0x5b1   :  { %5022 = vst.msk [vmem:[#allocation3 + $0x20] sm:$0xff] %vm1652_vm6, %v5003_v24  ;;  %v3538_v24 = vsub.s32 0, %v10928_v17 }
 0x5b2   :  { %5020 = vst.msk [vmem:[#allocation3 + $0x10] sm:$0xff] %vm1652_vm6, %v5001_v20  ;;  %v8872_v25 = vpop.f32.mrb[152].mxu1 }
 0x5b3   :  { %v4987_v62 = vadd.f32 %v8872_v25, %v10878_v8  ;;  %v4893_v26 = vpop.f32.mrb[153].mxu1 }
 0x5b4   :  { %v4985_v50 = vadd.f32 %v10878_v8, %v4893_v26  ;;  %v8873_v45 = vpop.f32.mrb[154].mxu1  ;;  %v3542_v26 = vsub.s32 1, %v10928_v17 }
 0x5b5   :  { %v5006_v10 = vmax.f32 %v4987_v62, 0.0  ;;  %v4988_v27 = vadd.f32 %v8873_v45, %v10878_v8  ;;  %v4896_v48 = vpop.f32.mrb[155].mxu1  ;;  %v3534_v62 = vld [vmem:[%s11533_s8] sm:$0x3] }
 0x5b6   :  { %v5004_v29 = vmax.f32 %v4985_v50, 0.0  ;;  %v4986_v30 = vadd.f32 %v10878_v8, %v4896_v48 }
 0x5b7   :  { %5025 = vst.msk [vmem:[#allocation3 + $0x38] sm:$0xff] %vm1652_vm6, %v5006_v10  ;;  %v5007_v31 = vmax.f32 %v4988_v27, 0.0 }
 0x5b8   :  { %5023 = vst.msk [vmem:[#allocation3 + $0x28] sm:$0xff] %vm1652_vm6, %v5004_v29  ;;  %v5005_v32 = vmax.f32 %v4986_v30, 0.0  ;;  %v3365_v35 = vpop.f32.mrb[64].mxu0  ;;  %v3539_v30 = vrot.slane %v3534_v62, %v3538_v24 }
 0x5b9   :  { %5026 = vst.msk [vmem:[#allocation3 + $0x40] sm:$0xff] %vm1652_vm6, %v5007_v31  ;;  %v10895_v36 = vadd.f32 %v3365_v35, %v3234_v11  ;;  %v3367_v37 = vpop.f32.mrb[65].mxu0  ;;  %v5061_v38 = vld [vmem:[#allocation3 + $0x7] ss:$2 sm:$0xff]  ;;  %v5062_v40 = vld [vmem:[#allocation3 + $0x17] ss:$2 sm:$0xff] }
 0x5ba   :  { %5024 = vst.msk [vmem:[#allocation3 + $0x30] sm:$0xff] %vm1652_vm6, %v5005_v32  ;;  %v10901_v28 = vadd.f32 %v3367_v37, %v3236_v15  ;;  %v3369_v3 = vpop.f32.mrb[66].mxu0  ;;  %v8876_v42 = vpop.f32.mrb[156].mxu1  ;;  %v5071_v43 = vpack.c.bf16 %v5062_v40, %v5061_v38  ;;  %v9509_v11 = vld [vmem:[%s11527_s3 + $0x10] sm:$0xff]  }
 0x5bb   :  { %v3370_v47 = vpop.f32.mrb[67].mxu0  ;;  %v4991_v49 = vadd.f32 %v8876_v42, %v10878_v8  ;;  %v4909_v12 = vpop.f32.mrb[157].mxu1 }
 0x5bc   :  { %v4989_v16 = vadd.f32 %v10878_v8, %v4909_v12  ;;  %v8877_v53 = vpop.f32.mrb[158].mxu1  ;;  %8895 = vmatmul.mubr.msk.bf16.vlgmr.msra.gmra.mrb[72].mxu0 %vm1652_vm6, %v5071_v43 }
 0x5bd   :  { %v5010_v54 = vmax.f32 %v4991_v49, 0.0  ;;  %v4992_v55 = vadd.f32 %v8877_v53, %v10878_v8  ;;  %v4912_v44 = vpop.f32.mrb[159].mxu1  ;;  %8915 = vmatpush3.bf16.msra.mxu0 %v9507_v41  ;;  %8898 = vmatprep.mubr.msk.bf16.mxu0 %vm9650_vm5, %v9649_v1 }
 0x5be   :  { %v5008_v33 = vmax.f32 %v4989_v16, 0.0  ;;  %v4990_v58 = vadd.f32 %v10878_v8, %v4912_v44  ;;  %8916 = vmatprep.subr.bf16.mxu0 %v9649_v1 }
 0x5bf   :  { %5029 = vst.msk [vmem:[#allocation3 + $0x58] sm:$0xff] %vm1652_vm6, %v5010_v54  ;;  %v5011_v60 = vmax.f32 %v4992_v55, 0.0 }
 0x5c0   :  { %5027 = vst.msk [vmem:[#allocation3 + $0x48] sm:$0xff] %vm1652_vm6, %v5008_v33  ;;  %v5009_v61 = vmax.f32 %v4990_v58, 0.0 }
 0x5c1   :  { %5030 = vst.msk [vmem:[#allocation3 + $0x60] sm:$0xff] %vm1652_vm6, %v5011_v60  ;;  %v5063_v63 = vld [vmem:[#allocation3 + $0x27] ss:$2 sm:$0xff]  ;;  %v5064_v46 = vld [vmem:[#allocation3 + $0x37] ss:$2 sm:$0xff]  ;;  %8917 = vmatpush3.bf16.msra.mxu0 %v9508_v56 }
 0x5c2   :  { %5028 = vst.msk [vmem:[#allocation3 + $0x50] sm:$0xff] %vm1652_vm6, %v5009_v61  ;;  %v8880_v15 = vpop.f32.mrb[160].mxu1  ;;  %v5072_v21 = vpack.c.bf16 %v5064_v46, %v5063_v63  ;;  %8918 = vmatprep.subr.bf16.mxu0 %v9649_v1 }
 0x5c3   :  { %v4995_v2 = vadd.f32 %v8880_v15, %v10878_v8  ;;  %v4925_v51 = vpop.f32.mrb[161].mxu1 }
 0x5c4   :  { %v4993_v4 = vadd.f32 %v10878_v8, %v4925_v51  ;;  %v8881_v52 = vpop.f32.mrb[162].mxu1  ;;  %8899 = vmatmul.mubr.msk.bf16.gmra.mrb[76].mxu0 %vm1652_vm6, %v5072_v21 }
 0x5c5   :  { %v5014_v6 = vmax.f32 %v4995_v2, 0.0  ;;  %v4996_v9 = vadd.f32 %v8881_v52, %v10878_v8  ;;  %v4928_v13 = vpop.f32.mrb[163].mxu1  ;;  %8902 = vmatprep.mubr.msk.bf16.mxu0 %vm9650_vm5, %v9649_v1  ;;  %8919 = vmatpush3.bf16.msra.mxu0 %v9509_v11 }
 0x5c6   :  { %v5012_v39 = vmax.f32 %v4993_v4, 0.0  ;;  %v4994_v18 = vadd.f32 %v10878_v8, %v4928_v13  ;;  %8920 = vmatprep.subr.bf16.mxu0 %v9649_v1  ;;  %v5038_v13 = vld [vmem:[#allocation3 + $0x6] ss:$2 sm:$0xff] }
 0x5c7   :  { %5033 = vst.msk [vmem:[#allocation3 + $0x78] sm:$0xff] %vm1652_vm6, %v5014_v6  ;;  %v5015_v19 = vmax.f32 %v4996_v9, 0.0 }
 0x5c8   :  { %5031 = vst.msk [vmem:[#allocation3 + $0x68] sm:$0xff] %vm1652_vm6, %v5012_v39  ;;  %v5013_v22 = vmax.f32 %v4994_v18, 0.0  ;;  %v9511_v39 = vld [vmem:[%s11527_s3 + $0x40] sm:$0xff]  }
 0x5c9   :  { %5034 = vst.msk [vmem:[#allocation3 + $0x80] sm:$0xff] %vm1652_vm6, %v5015_v19  ;;  %v5065_v23 = vld [vmem:[#allocation3 + $0x47] ss:$2 sm:$0xff]  ;;  %v5066_v14 = vld [vmem:[#allocation3 + $0x57] ss:$2 sm:$0xff]  ;;  %8921 = vmatpush3.bf16.msra.mxu0 %v9510_v34 }
 0x5ca   :  { %5032 = vst.msk [vmem:[#allocation3 + $0x70] sm:$0xff] %vm1652_vm6, %v5013_v22  ;;  %v8884_v20 = vpop.f32.mrb[188].mxu1  ;;  %v5073_v25 = vpack.c.bf16 %v5066_v14, %v5065_v23  ;;  %8942 = vmatprep.subr.bf16.mxu0 %v9649_v1  ;;  %v5039_v34 = vld [vmem:[#allocation3 + $0x16] ss:$2 sm:$0xff]  ;;  %v9512_v19 = vld [vmem:[%s11527_s3 + $0x48] sm:$0xff]  }
 0x5cb   :  { %v4973_v50 = vadd.f32 %v8884_v20, %v10869_v59  ;;  %v4941_v45 = vpop.f32.mrb[189].mxu1  ;;  %v3543_v59 = vrot.slane %v3534_v62, %v3542_v26  ;;  %v5048_v18 = vpack.c.bf16 %v5039_v34, %v5038_v13  ;;  %v5040_v22 = vld [vmem:[#allocation3 + $0x26] ss:$2 sm:$0xff]  ;;  %v5041_v23 = vld [vmem:[#allocation3 + $0x36] ss:$2 sm:$0xff] }
 0x5cc   :  { %v4971_v10 = vadd.f32 %v4941_v45, %v10871_v5  ;;  %v8885_v27 = vpop.f32.mrb[190].mxu1  ;;  %8903 = vmatmul.mubr.msk.bf16.gmra.mrb[80].mxu0 %vm1652_vm6, %v5073_v25  ;;  %v9513_v14 = vld [vmem:[%s11527_s3 + $0x50] sm:$0xff]   ;;  %v5049_v20 = vpack.c.bf16 %v5041_v23, %v5040_v22  ;;  %v9514_v25 = vld [vmem:[%s11527_s3 + $0x58] sm:$0xff]  }
 0x5cd   :  { %v4999_v48 = vadd.f32 %v10878_v8, %v4973_v50  ;;  %v4944_v29 = vpop.f32.mrb[191].mxu1  ;;  %8906 = vmatprep.mubr.msk.bf16.mxu0 %vm9650_vm5, %v9649_v1  ;;  %v5042_v62 = vld [vmem:[#allocation3 + $0x46] ss:$2 sm:$0xff]  ;;  %v5043_v50 = vld [vmem:[#allocation3 + $0x56] ss:$2 sm:$0xff] }
 0x5ce   :  { %v4997_v31 = vadd.f32 %v10878_v8, %v4971_v10  ;;  %v4972_v32 = vadd.f32 %v4944_v29, %v10873_v7  ;;  %v5050_v45 = vpack.c.bf16 %v5043_v50, %v5042_v62  ;;  %v5599_v13 = vld [vmem:[#allocation3 + $0x1a] ss:$2 sm:$0xff]  ;;  %v5598_v34 = vld [vmem:[#allocation3 + $0xa] ss:$2 sm:$0xff] }
 0x5cf   :  { %v5018_v5 = vmax.f32 %v4999_v48, 0.0  ;;  %v5603_v23 = vld [vmem:[#allocation3 + $0x5a] ss:$2 sm:$0xff] }
 0x5d0   :  { %v5016_v35 = vmax.f32 %v4997_v31, 0.0  ;;  %v4998_v37 = vadd.f32 %v10878_v8, %v4972_v32  ;;  %v3511_v38 = vpop.f32.mrb[56].mxu0  ;;  %v5308_v32 = vld [vmem:[#allocation3 + $0x8] ss:$2 sm:$0xff] }
 0x5d1   :  { %5037 = vst.msk [vmem:[#allocation3 + $0x98] sm:$0x3f] %vm1671_vm7, %v5018_v5  ;;  %v3546_v40 = vadd.f32 %v3539_v30, %v3511_v38  ;;  %v3513_v41 = vpop.f32.mrb[57].mxu0  ;;  %v5067_v3 = vld [vmem:[#allocation3 + $0x67] ss:$2 sm:$0xff] }
 0x5d2   :  { %v5068_v42 = vld [vmem:[#allocation3 + $0x77] ss:$2 sm:$0xff]  ;;  %5035 = vst.msk [vmem:[#allocation3 + $0x88] sm:$0xff] %vm1652_vm6, %v5016_v35  ;;  %v5017_v43 = vmax.f32 %v4998_v37, 0.0  ;;  %v3547_v47 = vadd.f32 %v3543_v59, %v3513_v41  ;;  %v3515_v49 = vpop.f32.mrb[58].mxu0  ;;  %v9516_v37 = vld [vmem:[%s11527_s3 + $0x68] sm:$0xff]  }
 0x5d3   :  { %v5074_v7 = vpack.c.bf16 %v5068_v42, %v5067_v3  ;;  %v3548_v12 = vadd.f32 %v3539_v30, %v3515_v49  ;;  %v3517_v16 = vpop.f32.mrb[59].mxu0  ;;  %v3552_v8 = vmax.f32 %v3546_v40, 0.0  ;;  %v5044_v10 = vld [vmem:[#allocation3 + $0x66] ss:$2 sm:$0xff]  ;;  %v5045_v27 = vld [vmem:[#allocation3 + $0x76] ss:$2 sm:$0xff] }
 0x5d4   :  { %5036 = vst.msk [vmem:[#allocation3 + $0x90] sm:$0xff] %vm1652_vm6, %v5017_v43  ;;  %v3549_v53 = vadd.f32 %v3543_v59, %v3517_v16  ;;  %v3553_v55 = vmax.f32 %v3547_v47, 0.0  ;;  %v5051_v48 = vpack.c.bf16 %v5045_v27, %v5044_v10  ;;  %v9515_v5 = vld [vmem:[%s11527_s3 + $0x60] sm:$0xff]   ;;  %v5310_v38 = vld [vmem:[#allocation3 + $0x28] ss:$2 sm:$0xff]  ;;  %v9518_v42 = vld [vmem:[%s11527_s3 + $0x78] sm:$0xff]  }
 0x5d5   :  { %8907 = vmatmul.mubr.msk.bf16.gmra.mrb[84].mxu0 %vm1652_vm6, %v5074_v7  ;;  %v3554_v54 = vmax.f32 %v3548_v12, 0.0  ;;  %v5311_v40 = vld [vmem:[#allocation3 + $0x38] ss:$2 sm:$0xff]  ;;  %v9517_v41 = vld [vmem:[%s11527_s3 + $0x70] sm:$0xff]  }
 0x5d6   :  { %8910 = vmatprep.mubr.msk.bf16.mxu0 %vm9650_vm5, %v9649_v1  ;;  %v3555_v44 = vmax.f32 %v3549_v53, 0.0  ;;  %v5319_v3 = vpack.c.bf16 %v5311_v40, %v5310_v38  ;;  %v5312_v43 = vld [vmem:[#allocation3 + $0x48] ss:$2 sm:$0xff]  ;;  %v5313_v47 = vld [vmem:[#allocation3 + $0x58] ss:$2 sm:$0xff] }
 0x5d7   :  { %v3558_v56 = vadd.f32 %v3554_v54, %v3552_v8  ;;  %v5320_v49 = vpack.c.bf16 %v5313_v47, %v5312_v43  ;;  %v5314_v7 = vld [vmem:[#allocation3 + $0x68] ss:$2 sm:$0xff]  ;;  %v5315_v12 = vld [vmem:[#allocation3 + $0x78] ss:$2 sm:$0xff] }
 0x5d8   :  { %v3568_v33 = vadd.f32 %v3555_v44, %v3553_v55  ;;  %v3521_v58 = vpop.f32.mrb[68].mxu0  ;;  %v5321_v16 = vpack.c.bf16 %v5315_v12, %v5314_v7  ;;  %v5317_v8 = vld [vmem:[#allocation3 + $0x98] ss:$2 sm:$0x7]  ;;  %v5453_v55 = vld [vmem:[#allocation3 + $0x9] ss:$2 sm:$0xff] }
 0x5d9   :  { %v3532_v60 = vadd.f32 %v3521_v58, %v10895_v36  ;;  %v3523_v61 = vpop.f32.mrb[69].mxu0  ;;  %v5454_v44 = vld [vmem:[#allocation3 + $0x19] ss:$2 sm:$0xff]  ;;  %v9520_v58 = vld [vmem:[%s11527_s3 + $0x88] sm:$0xff]  }
 0x5da   :  { %v3533_v63 = vadd.f32 %v3523_v61, %v10901_v28  ;;  %v3525_v46 = vpop.f32.mrb[70].mxu0  ;;  %v5456_v61 = vld [vmem:[#allocation3 + $0x39] ss:$2 sm:$0xff]  ;;  %v5604_v62 = vld [vmem:[#allocation3 + $0x6a] ss:$2 sm:$0xff] }
 0x5db   :  { %v3550_v0 = vadd.f32 %v3539_v30, %v3532_v60  ;;  %v3526_v11 = vpop.f32.mrb[71].mxu0  ;;  %v5069_v15 = vld [vmem:[#allocation3 + $0x87] ss:$2 sm:$0xff]  ;;  %v5070_v21 = vld [vmem:[#allocation3 + $0x97] ss:$2 sm:$0x7] }
 0x5dc   :  { %v3551_v2 = vadd.f32 %v3543_v59, %v3533_v63  ;;  %v5075_v51 = vpack.c.bf16 %v5070_v21, %v5069_v15  ;;  %v5046_v29 = vld [vmem:[#allocation3 + $0x86] ss:$2 sm:$0xff]  ;;  %v5047_v30 = vld [vmem:[#allocation3 + $0x96] ss:$2 sm:$0x7] }
 0x5dd   :  { %v3556_v4 = vmax.f32 %v3550_v0, 0.0  ;;  %v5052_v31 = vpack.c.bf16 %v5047_v30, %v5046_v29  ;;  %v5309_v59 = vld [vmem:[#allocation3 + $0x18] ss:$2 sm:$0xff]  ;;  %v5316_v53 = vld [vmem:[#allocation3 + $0x88] ss:$2 sm:$0xff] }
 0x5de   :  { %v3557_v52 = vmax.f32 %v3551_v2, 0.0  ;;  %8911 = vmatmul.mubr.msk.bf16.gmra.mrb[88].mxu0 %vm1652_vm6, %v5075_v51  ;;  %v5318_v35 = vpack.c.bf16 %v5309_v59, %v5308_v32  ;;  %v5322_v54 = vpack.c.bf16 %v5317_v8, %v5316_v53  ;;  %v5455_v60 = vld [vmem:[#allocation3 + $0x29] ss:$2 sm:$0xff]  ;;  %v9522_v0 = vld [vmem:[%s11527_s3 + $0x98] sm:$0xff]  }
 0x5df   :  { %v3560_v6 = vsel %vm3559_vm9, %v3556_v4, 0.0  ;;  %8922 = vmatprep.mubr.msk.bf16.mxu0 %vm9650_vm5, %v9649_v1  ;;  %v9521_v63 = vld [vmem:[%s11527_s3 + $0x90] sm:$0xff]   ;;  %v5464_v46 = vpack.c.bf16 %v5456_v61, %v5455_v60  ;;  %v5458_v15 = vld [vmem:[#allocation3 + $0x59] ss:$2 sm:$0xff] }
 0x5e0   :  { %v10970_v36 = vadd.f32 %v3560_v6, %v3558_v56  ;;  %v3569_v28 = vsel %vm3559_vm9, %v3557_v52, 0.0  ;;  %v9519_v56 = vld [vmem:[%s11527_s3 + $0x80] sm:$0xff]   ;;  %v5457_v11 = vld [vmem:[#allocation3 + $0x49] ss:$2 sm:$0xff] }
 0x5e1   :  { %v10973_v9 = vadd.f32 %v3569_v28, %v3568_v33  ;;  %v5463_v33 = vpack.c.bf16 %v5454_v44, %v5453_v55  ;;  %v5465_v21 = vpack.c.bf16 %v5458_v15, %v5457_v11  ;;  %v5459_v2 = vld [vmem:[#allocation3 + $0x69] ss:$2 sm:$0xff]  ;;  %v5460_v51 = vld [vmem:[#allocation3 + $0x79] ss:$2 sm:$0xff] }
 0x5e2   :  { %v5466_v4 = vpack.c.bf16 %v5460_v51, %v5459_v2  ;;  %v5461_v52 = vld [vmem:[#allocation3 + $0x89] ss:$2 sm:$0xff]  ;;  %v5462_v6 = vld [vmem:[#allocation3 + $0x99] ss:$2 sm:$0x7]  ;;  %v9525_v60 = vld [vmem:[%s11529_s5] sm:$0xff]  }
 0x5e3   :  { %v5467_v28 = vpack.c.bf16 %v5462_v6, %v5461_v52  ;;  %v5607_v10 = vld [vmem:[#allocation3 + $0x9a] ss:$2 sm:$0x7]  ;;  %v9524_v44 = vld [vmem:[%s11529_s5 + $0x28] sm:$0xff]   ;;  %v9528_v51 = vld [vmem:[%s11529_s5 + $0x10] sm:$0xff]   ;;  %v3571_v17 = vrot.slane %v10973_v9, 4 }
 0x5e4   :  { %v9527_v11 = vld [vmem:[%s11529_s5 + $0x8] sm:$0xff]  }
 0x5e6   :  { %8923 = vmatmul.mubr.msk.bf16.vlgmr.msra.gmra.mrb[92].mxu0 %vm1652_vm6, %v5048_v18  ;;  %v5601_v18 = vld [vmem:[#allocation3 + $0x3a] ss:$2 sm:$0xff] }
 0x5e7   :  { %8943 = vmatpush3.bf16.msra.mxu0 %v9511_v39  ;;  %8926 = vmatprep.mubr.msk.bf16.mxu0 %vm9650_vm5, %v9649_v1  ;;  %v5608_v39 = vpack.c.bf16 %v5599_v13, %v5598_v34  ;;  %v9530_v13 = vld [vmem:[%s11529_s5 + $0x18] sm:$0xff]  }
 0x5e8   :  { %8944 = vmatprep.subr.bf16.mxu0 %v9649_v1 }
 0x5eb   :  { %8945 = vmatpush3.bf16.msra.mxu0 %v9512_v19  ;;  %v5600_v19 = vld [vmem:[#allocation3 + $0x2a] ss:$2 sm:$0xff] }
 0x5ec   :  { %8946 = vmatprep.subr.bf16.mxu0 %v9649_v1  ;;  %v5609_v22 = vpack.c.bf16 %v5601_v18, %v5600_v19 }
 0x5ee   :  { %8927 = vmatmul.mubr.msk.bf16.gmra.mrb[96].mxu0 %vm1652_vm6, %v5049_v20 }
 0x5ef   :  { %8930 = vmatprep.mubr.msk.bf16.mxu0 %vm9650_vm5, %v9649_v1  ;;  %8947 = vmatpush3.bf16.msra.mxu0 %v9513_v14  ;;  %v5602_v14 = vld [vmem:[#allocation3 + $0x4a] ss:$2 sm:$0xff] }
 0x5f0   :  { %8948 = vmatprep.subr.bf16.mxu0 %v9649_v1  ;;  %v5610_v20 = vpack.c.bf16 %v5603_v23, %v5602_v14 }
 0x5f3   :  { %8949 = vmatpush3.bf16.msra.mxu0 %v9514_v25  ;;  %v5605_v25 = vld [vmem:[#allocation3 + $0x7a] ss:$2 sm:$0xff] }
 0x5f4   :  { %8970 = vmatprep.subr.bf16.mxu0 %v9649_v1  ;;  %v5611_v50 = vpack.c.bf16 %v5605_v25, %v5604_v62 }
 0x5f6   :  { %8931 = vmatmul.mubr.msk.bf16.gmra.mrb[100].mxu0 %vm1652_vm6, %v5050_v45  ;;  %v5606_v45 = vld [vmem:[#allocation3 + $0x8a] ss:$2 sm:$0xff] }
 0x5f7   :  { %8934 = vmatprep.mubr.msk.bf16.mxu0 %vm9650_vm5, %v9649_v1  ;;  %v5612_v27 = vpack.c.bf16 %v5607_v10, %v5606_v45 }
 0x5fe   :  { %8935 = vmatmul.mubr.msk.bf16.gmra.mrb[104].mxu0 %vm1652_vm6, %v5051_v48 }
 0x5ff   :  { %8938 = vmatprep.mubr.msk.bf16.mxu0 %vm9650_vm5, %v9649_v1 }
 0x606   :  { %8939 = vmatmul.mubr.msk.bf16.gmra.mrb[108].mxu0 %vm1652_vm6, %v5052_v31 }
 0x607   :  { %8950 = vmatprep.mubr.msk.bf16.mxu0 %vm9650_vm5, %v9649_v1 }
 0x60e   :  { %8951 = vmatmul.mubr.msk.bf16.vlgmr.msra.gmra.mrb[112].mxu0 %vm1652_vm6, %v5318_v35 }
 0x60f   :  { %8971 = vmatpush3.bf16.msra.mxu0 %v9515_v5  ;;  %8954 = vmatprep.mubr.msk.bf16.mxu0 %vm9650_vm5, %v9649_v1 }
 0x610   :  { %8972 = vmatprep.subr.bf16.mxu0 %v9649_v1 }
 0x613   :  { %8973 = vmatpush3.bf16.msra.mxu0 %v9516_v37 }
 0x614   :  { %8974 = vmatprep.subr.bf16.mxu0 %v9649_v1 }
 0x616   :  { %8955 = vmatmul.mubr.msk.bf16.gmra.mrb[116].mxu0 %vm1652_vm6, %v5319_v3 }
 0x617   :  { %8958 = vmatprep.mubr.msk.bf16.mxu0 %vm9650_vm5, %v9649_v1  ;;  %8975 = vmatpush3.bf16.msra.mxu0 %v9517_v41 }
 0x618   :  { %8976 = vmatprep.subr.bf16.mxu0 %v9649_v1 }
 0x61b   :  { %8977 = vmatpush3.bf16.msra.mxu0 %v9518_v42 }
 0x61c   :  { %8998 = vmatprep.subr.bf16.mxu0 %v9649_v1 }
 0x61e   :  { %8959 = vmatmul.mubr.msk.bf16.gmra.mrb[120].mxu0 %vm1652_vm6, %v5320_v49  ;;  %v9523_v49 = vld [vmem:[%s11529_s5 + $0x20] sm:$0xff]  }
 0x61f   :  { %8962 = vmatprep.mubr.msk.bf16.mxu0 %vm9650_vm5, %v9649_v1  ;;  %9027 = vmatpush3.bf16.msra.mxu1 %v9523_v49 }
 0x620   :  { %9028 = vmatprep.subr.bf16.mxu1 %v9649_v1 }
 0x623   :  { %9029 = vmatpush3.bf16.msra.mxu1 %v9524_v44 }
 0x624   :  { %9030 = vmatprep.subr.bf16.mxu1 %v9649_v1 }
 0x626   :  { %8963 = vmatmul.mubr.msk.bf16.gmra.mrb[124].mxu0 %vm1652_vm6, %v5321_v16 }
 0x627   :  { %8966 = vmatprep.mubr.msk.bf16.mxu0 %vm9650_vm5, %v9649_v1 }
 0x62e   :  { %8967 = vmatmul.mubr.msk.bf16.gmra.mrb[128].mxu0 %vm1652_vm6, %v5322_v54 }
 0x62f   :  { %8978 = vmatprep.mubr.msk.bf16.mxu0 %vm9650_vm5, %v9649_v1 }
 0x636   :  { %8979 = vmatmul.mubr.msk.bf16.vlgmr.msra.gmra.mrb[132].mxu0 %vm1652_vm6, %v5463_v33 }
 0x637   :  { %8999 = vmatpush3.bf16.msra.mxu0 %v9519_v56  ;;  %8982 = vmatprep.mubr.msk.bf16.mxu0 %vm9650_vm5, %v9649_v1 }
 0x638   :  { %9000 = vmatprep.subr.bf16.mxu0 %v9649_v1 }
 0x63b   :  { %9001 = vmatpush3.bf16.msra.mxu0 %v9520_v58 }
 0x63c   :  { %9002 = vmatprep.subr.bf16.mxu0 %v9649_v1 }
 0x63e   :  { %8983 = vmatmul.mubr.msk.bf16.gmra.mrb[136].mxu0 %vm1652_vm6, %v5464_v46 }
 0x63f   :  { %8986 = vmatprep.mubr.msk.bf16.mxu0 %vm9650_vm5, %v9649_v1  ;;  %9003 = vmatpush3.bf16.msra.mxu0 %v9521_v63 }
 0x640   :  { %9004 = vmatprep.subr.bf16.mxu0 %v9649_v1 }
 0x643   :  { %9005 = vmatpush3.bf16.msra.mxu0 %v9522_v0  ;;  %v9526_v0 = vld [vmem:[%s11529_s5 + $0x30] sm:$0xff]  }
 0x644   :  { %9046 = vmatprep.subr.bf16.mxu0 %v9649_v1  ;;  %9031 = vmatpush3.bf16.msra.mxu1 %v9526_v0 }
 0x645   :  { %9032 = vmatprep.subr.bf16.mxu1 %v9649_v1 }
 0x646   :  { %8987 = vmatmul.mubr.msk.bf16.gmra.mrb[140].mxu0 %vm1652_vm6, %v5465_v21 }
 0x647   :  { %8990 = vmatprep.mubr.msk.bf16.mxu0 %vm9650_vm5, %v9649_v1 }
 0x64e   :  { %8991 = vmatmul.mubr.msk.bf16.gmra.mrb[144].mxu0 %vm1652_vm6, %v5466_v4 }
 0x64f   :  { %8994 = vmatprep.mubr.msk.bf16.mxu0 %vm9650_vm5, %v9649_v1 }
 0x656   :  { %8995 = vmatmul.mubr.msk.bf16.gmra.mrb[148].mxu0 %vm1652_vm6, %v5467_v28  ;;  %v9529_v28 = vld [vmem:[%s11529_s5 + $0x38] sm:$0xff]  }
 0x657   :  { %9006 = vmatprep.mubr.msk.bf16.mxu0 %vm9650_vm5, %v9649_v1  ;;  %9033 = vmatpush3.bf16.msra.mxu1 %v9529_v28 }
 0x658   :  { %9066 = vmatprep.subr.bf16.mxu1 %v9649_v1 }
 0x65e   :  { %9007 = vmatmul.mubr.msk.bf16.vlgmr.msra.gmra.mrb[152].mxu0 %vm1652_vm6, %v5608_v39 }
 0x65f   :  { %9010 = vmatprep.mubr.msk.bf16.mxu0 %vm9650_vm5, %v9649_v1  ;;  %9047 = vmatpush3.bf16.msra.mxu0 %v9525_v60 }
 0x660   :  { %9048 = vmatprep.subr.bf16.mxu0 %v9649_v1 }
 0x663   :  { %9049 = vmatpush3.bf16.msra.mxu0 %v9527_v11 }
 0x664   :  { %9050 = vmatprep.subr.bf16.mxu0 %v9649_v1 }
 0x666   :  { %9011 = vmatmul.mubr.msk.bf16.gmra.mrb[156].mxu0 %vm1652_vm6, %v5609_v22 }
 0x667   :  { %9014 = vmatprep.mubr.msk.bf16.mxu0 %vm9650_vm5, %v9649_v1  ;;  %9051 = vmatpush3.bf16.msra.mxu0 %v9528_v51 }
 0x668   :  { %9052 = vmatprep.subr.bf16.mxu0 %v9649_v1 }
 0x66b   :  { %9053 = vmatpush3.bf16.msra.mxu0 %v9530_v13 }
 0x66c   :  { %9086 = vmatprep.subr.bf16.mxu0 %v9649_v1 }
 0x66e   :  { %9015 = vmatmul.mubr.msk.bf16.gmra.mrb[160].mxu0 %vm1652_vm6, %v5610_v20 }
 0x66f   :  { %9018 = vmatprep.mubr.msk.bf16.mxu0 %vm9650_vm5, %v9649_v1 }
 0x676   :  { %9019 = vmatmul.mubr.msk.bf16.gmra.mrb[164].mxu0 %vm1652_vm6, %v5611_v50 }
 0x677   :  { %9022 = vmatprep.mubr.msk.bf16.mxu0 %vm9650_vm5, %v9649_v1 }
 0x67e   :  { %9023 = vmatmul.mubr.msk.bf16.gmra.mrb[168].mxu0 %vm1652_vm6, %v5612_v27 }
 0x67f   :  { %9054 = vmatprep.mubr.msk.bf16.mxu0 %vm9650_vm5, %v9649_v1 }
 0x68f   :  { %v5157_v48 = vpop.f32.mrb[72].mxu0 }
 0x690   :  { %v8896_v29 = vpop.f32.mrb[73].mxu0 }
 0x691   :  { %v5160_v30 = vpop.f32.mrb[74].mxu0 }
 0x692   :  { %v8897_v31 = vpop.f32.mrb[75].mxu0 }
 0x697   :  { %v5165_v32 = vpop.f32.mrb[76].mxu0 }
 0x698   :  { %v8900_v59 = vpop.f32.mrb[77].mxu0 }
 0x699   :  { %v5168_v5 = vpop.f32.mrb[78].mxu0 }
 0x69a   :  { %v8901_v35 = vpop.f32.mrb[79].mxu0 }
 0x69f   :  { %v5173_v37 = vpop.f32.mrb[80].mxu0 }
 0x6a0   :  { %v8904_v38 = vpop.f32.mrb[81].mxu0 }
 0x6a1   :  { %v5176_v40 = vpop.f32.mrb[82].mxu0 }
 0x6a2   :  { %v8905_v41 = vpop.f32.mrb[83].mxu0 }
 0x6a8   :  { %v5181_v3 = vpop.f32.mrb[84].mxu0 }
 0x6a9   :  { %v8908_v42 = vpop.f32.mrb[85].mxu0 }
 0x6aa   :  { %v5184_v43 = vpop.f32.mrb[86].mxu0 }
 0x6ab   :  { %v8909_v47 = vpop.f32.mrb[87].mxu0 }
 0x6b1   :  { %v5189_v7 = vpop.f32.mrb[88].mxu0 }
 0x6b2   :  { %v8912_v12 = vpop.f32.mrb[89].mxu0 }
 0x6b3   :  { %v5192_v16 = vpop.f32.mrb[90].mxu0 }
 0x6b4   :  { %v8913_v53 = vpop.f32.mrb[91].mxu0 }
 0x6b9   :  { %v5269_v8 = vpop.f32.mrb[92].mxu0 }
 0x6ba   :  { %v5270_v54 = vadd.f32 %v5269_v8, %v5157_v48  ;;  %v8924_v55 = vpop.f32.mrb[93].mxu0 }
 0x6bb   :  { %v5272_v56 = vpop.f32.mrb[94].mxu0 }
 0x6bc   :  { %v5273_v33 = vadd.f32 %v5272_v56, %v5160_v30  ;;  %v8925_v58 = vpop.f32.mrb[95].mxu0 }
 0x6c1   :  { %v5277_v61 = vpop.f32.mrb[96].mxu0 }
 0x6c2   :  { %v5278_v63 = vadd.f32 %v5277_v61, %v5165_v32  ;;  %v8928_v46 = vpop.f32.mrb[97].mxu0 }
 0x6c3   :  { %v5280_v15 = vpop.f32.mrb[98].mxu0 }
 0x6c4   :  { %v5281_v21 = vadd.f32 %v5280_v15, %v5168_v5  ;;  %v8929_v2 = vpop.f32.mrb[99].mxu0 }
 0x6c9   :  { %v5285_v4 = vpop.f32.mrb[100].mxu0 }
 0x6ca   :  { %v5286_v52 = vadd.f32 %v5285_v4, %v5173_v37  ;;  %v8932_v6 = vpop.f32.mrb[101].mxu0 }
 0x6cb   :  { %v5288_v34 = vpop.f32.mrb[102].mxu0 }
 0x6cc   :  { %v5289_v39 = vadd.f32 %v5288_v34, %v5176_v40  ;;  %v8933_v18 = vpop.f32.mrb[103].mxu0 }
 0x6d1   :  { %v5293_v19 = vpop.f32.mrb[104].mxu0 }
 0x6d2   :  { %v5294_v22 = vadd.f32 %v5293_v19, %v5181_v3  ;;  %v8936_v23 = vpop.f32.mrb[105].mxu0 }
 0x6d3   :  { %v5296_v14 = vpop.f32.mrb[106].mxu0 }
 0x6d4   :  { %v5297_v20 = vadd.f32 %v5296_v14, %v5184_v43  ;;  %v8937_v25 = vpop.f32.mrb[107].mxu0 }
 0x6d9   :  { %v5301_v62 = vpop.f32.mrb[108].mxu0 }
 0x6da   :  { %v5302_v50 = vadd.f32 %v5301_v62, %v5189_v7  ;;  %v8940_v45 = vpop.f32.mrb[109].mxu0 }
 0x6db   :  { %v5304_v10 = vpop.f32.mrb[110].mxu0 }
 0x6dc   :  { %v5305_v27 = vadd.f32 %v5304_v10, %v5192_v16  ;;  %v8941_v48 = vpop.f32.mrb[111].mxu0 }
 0x6e1   :  { %v5404_v29 = vpop.f32.mrb[112].mxu0 }
 0x6e2   :  { %v5443_v30 = vadd.f32 %v5404_v29, %v5270_v54  ;;  %v8952_v31 = vpop.f32.mrb[113].mxu0 }
 0x6e3   :  { %v5407_v32 = vpop.f32.mrb[114].mxu0 }
 0x6e4   :  { %v5444_v59 = vadd.f32 %v5407_v32, %v5273_v33  ;;  %v8953_v5 = vpop.f32.mrb[115].mxu0 }
 0x6e9   :  { %v5412_v35 = vpop.f32.mrb[116].mxu0 }
 0x6ea   :  { %v5445_v37 = vadd.f32 %v5412_v35, %v5278_v63  ;;  %v8956_v38 = vpop.f32.mrb[117].mxu0 }
 0x6eb   :  { %v5415_v40 = vpop.f32.mrb[118].mxu0 }
 0x6ec   :  { %v5446_v41 = vadd.f32 %v5415_v40, %v5281_v21  ;;  %v8957_v3 = vpop.f32.mrb[119].mxu0 }
 0x6f1   :  { %v5420_v42 = vpop.f32.mrb[120].mxu0 }
 0x6f2   :  { %v5447_v43 = vadd.f32 %v5420_v42, %v5286_v52  ;;  %v8960_v47 = vpop.f32.mrb[121].mxu0 }
 0x6f3   :  { %v5423_v49 = vpop.f32.mrb[122].mxu0 }
 0x6f4   :  { %v5448_v7 = vadd.f32 %v5423_v49, %v5289_v39  ;;  %v8961_v12 = vpop.f32.mrb[123].mxu0 }
 0x6f9   :  { %v5428_v16 = vpop.f32.mrb[124].mxu0 }
 0x6fa   :  { %v5449_v53 = vadd.f32 %v5428_v16, %v5294_v22  ;;  %v8964_v8 = vpop.f32.mrb[125].mxu0 }
 0x6fb   :  { %v5431_v54 = vpop.f32.mrb[126].mxu0 }
 0x6fc   :  { %v5450_v55 = vadd.f32 %v5431_v54, %v5297_v20  ;;  %v8965_v44 = vpop.f32.mrb[127].mxu0 }
 0x701   :  { %v5436_v56 = vpop.f32.mrb[128].mxu0 }
 0x702   :  { %v5451_v33 = vadd.f32 %v5436_v56, %v5302_v50  ;;  %v8968_v58 = vpop.f32.mrb[129].mxu0 }
 0x703   :  { %v5439_v60 = vpop.f32.mrb[130].mxu0 }
 0x704   :  { %v5452_v61 = vadd.f32 %v5439_v60, %v5305_v27  ;;  %v8969_v63 = vpop.f32.mrb[131].mxu0 }
 0x709   :  { %v5549_v46 = vpop.f32.mrb[132].mxu0 }
 0x70a   :  { %v5588_v0 = vadd.f32 %v5549_v46, %v5443_v30  ;;  %v8980_v11 = vpop.f32.mrb[133].mxu0 }
 0x70b   :  { %v5552_v15 = vpop.f32.mrb[134].mxu0 }
 0x70c   :  { %v5589_v21 = vadd.f32 %v5552_v15, %v5444_v59  ;;  %v8981_v2 = vpop.f32.mrb[135].mxu0  ;;  %v11122_v59 = vld [vmem:[%s11530_s4] ss:$0 sm:$0xff] }
 0x711   :  { %v5557_v51 = vpop.f32.mrb[136].mxu0 }
 0x712   :  { %v5590_v4 = vadd.f32 %v5557_v51, %v5445_v37  ;;  %v8984_v52 = vpop.f32.mrb[137].mxu0 }
 0x713   :  { %v5560_v6 = vpop.f32.mrb[138].mxu0 }
 0x714   :  { %v5591_v28 = vadd.f32 %v5560_v6, %v5446_v41  ;;  %v8985_v13 = vpop.f32.mrb[139].mxu0  ;;  %v9531_v6 = vld [vmem:[%s11529_s5 + $0x40] sm:$0xff]  }
 0x719   :  { %v5565_v34 = vpop.f32.mrb[140].mxu0 }
 0x71a   :  { %v5592_v39 = vadd.f32 %v5565_v34, %v5447_v43  ;;  %v8988_v18 = vpop.f32.mrb[141].mxu0 }
 0x71b   :  { %v5568_v19 = vpop.f32.mrb[142].mxu0 }
 0x71c   :  { %v5593_v22 = vadd.f32 %v5568_v19, %v5448_v7  ;;  %v8989_v23 = vpop.f32.mrb[143].mxu0  ;;  %v9533_v19 = vld [vmem:[%s11529_s5 + $0x60] sm:$0xff]  }
 0x721   :  { %v5573_v14 = vpop.f32.mrb[144].mxu0 }
 0x722   :  { %v5594_v20 = vadd.f32 %v5573_v14, %v5449_v53  ;;  %v8992_v25 = vpop.f32.mrb[145].mxu0 }
 0x723   :  { %v5576_v62 = vpop.f32.mrb[146].mxu0 }
 0x724   :  { %v5595_v50 = vadd.f32 %v5576_v62, %v5450_v55  ;;  %v8993_v45 = vpop.f32.mrb[147].mxu0 }
 0x729   :  { %v5581_v10 = vpop.f32.mrb[148].mxu0 }
 0x72a   :  { %v11115_v27 = vadd.f32 %v5581_v10, %v5451_v33  ;;  %v8996_v48 = vpop.f32.mrb[149].mxu0 }
 0x72b   :  { %v5584_v29 = vpop.f32.mrb[150].mxu0  ;;  %v9534_v48 = vld [vmem:[%s11529_s5 + $0x50] sm:$0xff]  }
 0x72c   :  { %v11117_v30 = vadd.f32 %v5584_v29, %v5452_v61  ;;  %v8997_v31 = vpop.f32.mrb[151].mxu0 }
 0x731   :  { %v5694_v32 = vpop.f32.mrb[152].mxu0 }
 0x732   :  { %v5733_v5 = vadd.f32 %v5694_v32, %v5588_v0  ;;  %v9008_v35 = vpop.f32.mrb[153].mxu0 }
 0x733   :  { %v5697_v37 = vpop.f32.mrb[154].mxu0 }
 0x734   :  { %v5750_v38 = vadd.f32 %v11122_v59, %v5733_v5  ;;  %v5734_v40 = vadd.f32 %v5697_v37, %v5589_v21  ;;  %v9009_v41 = vpop.f32.mrb[155].mxu0  ;;  %v9536_v5 = vld [vmem:[%s11529_s5 + $0x70] sm:$0xff]  }
 0x736   :  { %v5760_v3 = vmax.f32 %v5750_v38, 0.0  ;;  %v5751_v42 = vadd.f32 %v11122_v59, %v5734_v40 }
 0x738   :  { %5770 = vst.msk [vmem:[#allocation4 + $0x8] sm:$0xff] %vm1652_vm6, %v5760_v3  ;;  %v5761_v43 = vmax.f32 %v5751_v42, 0.0  ;;  %v9538_v3 = vld [vmem:[%s11529_s5 + $0x78] sm:$0xff]  }
 0x739   :  { %v5702_v47 = vpop.f32.mrb[156].mxu0 }
 0x73a   :  { %5771 = vst.msk [vmem:[#allocation4 + $0x10] sm:$0xff] %vm1652_vm6, %v5761_v43  ;;  %v5735_v49 = vadd.f32 %v5702_v47, %v5590_v4  ;;  %v9012_v7 = vpop.f32.mrb[157].mxu0 }
 0x73b   :  { %v5705_v12 = vpop.f32.mrb[158].mxu0 }
 0x73c   :  { %v5752_v16 = vadd.f32 %v11122_v59, %v5735_v49  ;;  %v5736_v53 = vadd.f32 %v5705_v12, %v5591_v28  ;;  %v9013_v8 = vpop.f32.mrb[159].mxu0 }
 0x73e   :  { %v5762_v54 = vmax.f32 %v5752_v16, 0.0  ;;  %v5753_v55 = vadd.f32 %v11122_v59, %v5736_v53 }
 0x740   :  { %5772 = vst.msk [vmem:[#allocation4 + $0x18] sm:$0xff] %vm1652_vm6, %v5762_v54  ;;  %v5763_v44 = vmax.f32 %v5753_v55, 0.0 }
 0x741   :  { %v5710_v56 = vpop.f32.mrb[160].mxu0  ;;  %v5796_v21 = vld [vmem:[#allocation4 + $0x7] ss:$2 sm:$0xff]  ;;  %v5780_v2 = vld [vmem:[#allocation4 + $0x6] ss:$2 sm:$0xff] }
 0x742   :  { %5773 = vst.msk [vmem:[#allocation4 + $0x20] sm:$0xff] %vm1652_vm6, %v5763_v44  ;;  %v5737_v33 = vadd.f32 %v5710_v56, %v5592_v39  ;;  %v9016_v58 = vpop.f32.mrb[161].mxu0  ;;  %v5990_v44 = vld [vmem:[#allocation4 + $0x8] ss:$2 sm:$0xff]  ;;  %v6100_v56 = vld [vmem:[#allocation4 + $0x9] ss:$2 sm:$0xff] }
 0x743   :  { %v5713_v60 = vpop.f32.mrb[162].mxu0 }
 0x744   :  { %v5754_v61 = vadd.f32 %v11122_v59, %v5737_v33  ;;  %v5738_v63 = vadd.f32 %v5713_v60, %v5593_v22  ;;  %v9017_v46 = vpop.f32.mrb[163].mxu0  ;;  %v9539_v33 = vld [vmem:[%s11529_s5 + $0x80] sm:$0xff]  }
 0x746   :  { %v5764_v0 = vmax.f32 %v5754_v61, 0.0  ;;  %v5755_v11 = vadd.f32 %v11122_v59, %v5738_v63  ;;  %v9540_v61 = vld [vmem:[%s11529_s5 + $0x88] sm:$0xff]  }
 0x748   :  { %5774 = vst.msk [vmem:[#allocation4 + $0x28] sm:$0xff] %vm1652_vm6, %v5764_v0  ;;  %v5765_v15 = vmax.f32 %v5755_v11, 0.0 }
 0x749   :  { %v5718_v51 = vpop.f32.mrb[164].mxu0  ;;  %v5797_v4 = vld [vmem:[#allocation4 + $0x17] ss:$2 sm:$0xff]  ;;  %v5781_v52 = vld [vmem:[#allocation4 + $0x16] ss:$2 sm:$0xff] }
 0x74a   :  { %5775 = vst.msk [vmem:[#allocation4 + $0x30] sm:$0xff] %vm1652_vm6, %v5765_v15  ;;  %v5739_v28 = vadd.f32 %v5718_v51, %v5594_v20  ;;  %v9020_v13 = vpop.f32.mrb[165].mxu0  ;;  %v5801_v34 = vpack.c.bf16 %v5797_v4, %v5796_v21  ;;  %v5785_v39 = vpack.c.bf16 %v5781_v52, %v5780_v2  ;;  %v9532_v20 = vld [vmem:[%s11529_s5 + $0x48] sm:$0xff]   ;;  %v9541_v15 = vld [vmem:[%s11529_s5 + $0x90] sm:$0xff]   ;;  %v9542_v51 = vld [vmem:[%s11529_s5 + $0x98] sm:$0xff]  }
 0x74b   :  { %v5721_v18 = vpop.f32.mrb[166].mxu0  ;;  %v5991_v54 = vld [vmem:[#allocation4 + $0x18] ss:$2 sm:$0xff]  ;;  %v6101_v55 = vld [vmem:[#allocation4 + $0x19] ss:$2 sm:$0xff] }
 0x74c   :  { %v5756_v22 = vadd.f32 %v11122_v59, %v5739_v28  ;;  %v5740_v23 = vadd.f32 %v5721_v18, %v5595_v50  ;;  %v9021_v14 = vpop.f32.mrb[167].mxu0  ;;  %9035 = vmatmul.mubr.msk.bf16.vlgmr.msra.gmra.mrb[192].mxu1 %vm1652_vm6, %v5801_v34  ;;  %9055 = vmatmul.mubr.msk.bf16.vlgmr.msra.gmra.mrb[172].mxu0 %vm1652_vm6, %v5785_v39  ;;  %v9535_v50 = vld [vmem:[%s11529_s5 + $0x68] sm:$0xff]   ;;  %v5995_v58 = vpack.c.bf16 %v5991_v54, %v5990_v44  ;;  %v6210_v34 = vld [vmem:[#allocation4 + $0xa] ss:$2 sm:$0xff] }
 0x74d   :  { %9067 = vmatpush3.bf16.msra.mxu1 %v9531_v6  ;;  %9038 = vmatprep.mubr.msk.bf16.mxu1 %vm9650_vm5, %v9649_v1  ;;  %v6105_v60 = vpack.c.bf16 %v6101_v55, %v6100_v56 }
 0x74e   :  { %v5766_v25 = vmax.f32 %v5756_v22, 0.0  ;;  %v5757_v62 = vadd.f32 %v11122_v59, %v5740_v23  ;;  %9068 = vmatprep.subr.bf16.mxu1 %v9649_v1  ;;  %9058 = vmatprep.mubr.msk.bf16.mxu0 %vm9650_vm5, %v9649_v1 }
 0x74f   :  { %9087 = vmatpush3.bf16.msra.mxu0 %v9533_v19  ;;  %v6211_v13 = vld [vmem:[#allocation4 + $0x1a] ss:$2 sm:$0xff] }
 0x750   :  { %5776 = vst.msk [vmem:[#allocation4 + $0x38] sm:$0xff] %vm1652_vm6, %v5766_v25  ;;  %v5767_v45 = vmax.f32 %v5757_v62, 0.0  ;;  %9088 = vmatprep.subr.bf16.mxu0 %v9649_v1  ;;  %v6215_v39 = vpack.c.bf16 %v6211_v13, %v6210_v34  ;;  %v9545_v25 = vld [vmem:[%s11531_s7 + $0x84] ss:$8 sps:$4 sm:$0xff]   ;;  %v9548_v62 = vld [vmem:[%s11531_s7 + $0x94] ss:$8 sps:$4 sm:$0xff]  }
 0x751   :  { %v5726_v10 = vpop.f32.mrb[168].mxu0  ;;  %9069 = vmatpush3.bf16.msra.mxu1 %v9532_v20  ;;  %v5798_v42 = vld [vmem:[#allocation4 + $0x27] ss:$2 sm:$0xff]  ;;  %v5782_v47 = vld [vmem:[#allocation4 + $0x26] ss:$2 sm:$0xff] }
 0x752   :  { %5777 = vst.msk [vmem:[#allocation4 + $0x40] sm:$0xff] %vm1652_vm6, %v5767_v45  ;;  %v5741_v29 = vadd.f32 %v5726_v10, %v11115_v27  ;;  %v9024_v31 = vpop.f32.mrb[169].mxu0  ;;  %9070 = vmatprep.subr.bf16.mxu1 %v9649_v1  ;;  %v9537_v27 = vld [vmem:[%s11529_s5 + $0x58] sm:$0xff]   ;;  %v9543_v20 = vld [vmem:[%s11531_s7 + $0x80] ss:$8 sps:$4 sm:$0xff]  }
 0x753   :  { %v5729_v32 = vpop.f32.mrb[170].mxu0  ;;  %9089 = vmatpush3.bf16.msra.mxu0 %v9535_v50  ;;  %v5992_v0 = vld [vmem:[#allocation4 + $0x28] ss:$2 sm:$0xff]  ;;  %v6102_v11 = vld [vmem:[#allocation4 + $0x29] ss:$2 sm:$0xff] }
 0x754   :  { %v5758_v35 = vadd.f32 %v11122_v59, %v5741_v29  ;;  %v5742_v37 = vadd.f32 %v5729_v32, %v11117_v30  ;;  %v9025_v38 = vpop.f32.mrb[171].mxu0  ;;  %9090 = vmatprep.subr.bf16.mxu0 %v9649_v1  ;;  %v9546_v50 = vld [vmem:[%s11531_s7 + $0x90] ss:$8 sps:$4 sm:$0xff]   ;;  %v9551_v45 = vld [vmem:[%s11531_s7 + $0xa4] ss:$8 sps:$4 sm:$0xff]  }
 0x755   :  { %9071 = vmatpush3.bf16.msra.mxu1 %v9534_v48  ;;  %v9549_v10 = vld [vmem:[%s11531_s7 + $0xa0] ss:$8 sps:$4 sm:$0xff]   ;;  %v9554_v48 = vld [vmem:[%s11531_s7 + $0xb4] ss:$8 sps:$4 sm:$0xff]   ;;  %v9552_v29 = vld [vmem:[%s11531_s7 + $0xb0] ss:$8 sps:$4 sm:$0xff]  }
 0x756   :  { %v5768_v40 = vmax.f32 %v5758_v35, 0.0  ;;  %v5759_v41 = vadd.f32 %v11122_v59, %v5742_v37  ;;  %9072 = vmatprep.subr.bf16.mxu1 %v9649_v1  ;;  %v9557_v31 = vld [vmem:[%s11531_s7 + $0xc4] ss:$8 sps:$4 sm:$0xff]   ;;  %v9555_v32 = vld [vmem:[%s11531_s7 + $0xc0] ss:$8 sps:$4 sm:$0xff]  }
 0x757   :  { %9091 = vmatpush3.bf16.msra.mxu0 %v9536_v5  ;;  %v6212_v19 = vld [vmem:[#allocation4 + $0x2a] ss:$2 sm:$0xff]  ;;  %v9563_v37 = vld [vmem:[%s11531_s7 + $0xe4] ss:$8 sps:$4 sm:$0xff]  }
 0x758   :  { %5778 = vst.msk [vmem:[#allocation4 + $0x48] sm:$0xff] %vm1652_vm6, %v5768_v40  ;;  %v5769_v30 = vmax.f32 %v5759_v41, 0.0  ;;  %9092 = vmatprep.subr.bf16.mxu0 %v9649_v1  ;;  %v9560_v5 = vld [vmem:[%s11531_s7 + $0xd4] ss:$8 sps:$4 sm:$0xff]   ;;  %v9558_v35 = vld [vmem:[%s11531_s7 + $0xd0] ss:$8 sps:$4 sm:$0xff]  }
 0x759   :  { %v5799_v43 = vld [vmem:[#allocation4 + $0x37] ss:$2 sm:$0xff]  ;;  %v5783_v49 = vld [vmem:[#allocation4 + $0x36] ss:$2 sm:$0xff]  ;;  %9073 = vmatpush3.bf16.msra.mxu1 %v9537_v27  ;;  %v9564_v27 = vld [vmem:[%s11531_s7 + $0xf0] ss:$8 sps:$4 sm:$0xff]  }
 0x75a   :  { %5779 = vst.msk [vmem:[#allocation4 + $0x50] sm:$0x7] %vm2468_vm8, %v5769_v30  ;;  %v5802_v59 = vpack.c.bf16 %v5799_v43, %v5798_v42  ;;  %v5786_v7 = vpack.c.bf16 %v5783_v49, %v5782_v47  ;;  %9106 = vmatprep.subr.bf16.mxu1 %v9649_v1  ;;  %v5993_v63 = vld [vmem:[#allocation4 + $0x38] ss:$2 sm:$0xff]  ;;  %v6103_v46 = vld [vmem:[#allocation4 + $0x39] ss:$2 sm:$0xff] }
 0x75b   :  { %9093 = vmatpush3.bf16.msra.mxu0 %v9538_v3  ;;  %v5996_v21 = vpack.c.bf16 %v5993_v63, %v5992_v0  ;;  %v6106_v2 = vpack.c.bf16 %v6103_v46, %v6102_v11  ;;  %v9561_v38 = vld [vmem:[%s11531_s7 + $0xe0] ss:$8 sps:$4 sm:$0xff]   ;;  %v9566_v40 = vld [vmem:[%s11531_s7 + $0xf4] ss:$8 sps:$4 sm:$0xff]   ;;  %v9569_v41 = vld [vmem:[%s11531_s7 + $0x4] ss:$8 sps:$4 sm:$0xff]  }
 0x75c   :  { %9039 = vmatmul.mubr.msk.bf16.gmra.mrb[196].mxu1 %vm1652_vm6, %v5802_v59  ;;  %9059 = vmatmul.mubr.msk.bf16.gmra.mrb[176].mxu0 %vm1652_vm6, %v5786_v7 }
 0x75d   :  { %9042 = vmatprep.mubr.msk.bf16.mxu1 %vm9650_vm5, %v9649_v1  ;;  %9062 = vmatprep.mubr.msk.bf16.mxu0 %vm9650_vm5, %v9649_v1 }
 0x75e   :  { %6464 = vmatprep.subr.bf16.mxu0 %v9545_v25 }
 0x75f   :  { %v6213_v18 = vld [vmem:[#allocation4 + $0x3a] ss:$2 sm:$0xff] }
 0x760   :  { %v6216_v22 = vpack.c.bf16 %v6213_v18, %v6212_v19 }
 0x761   :  { %v5800_v12 = vld [vmem:[#allocation4 + $0x47] ss:$2 sm:$0x3f]  ;;  %v5784_v16 = vld [vmem:[#allocation4 + $0x46] ss:$2 sm:$0x3f] }
 0x762   :  { %v5803_v53 = vpack.c.bf16 %v5800_v12, %v5800_v12  ;;  %v5787_v8 = vpack.c.bf16 %v5784_v16, %v5784_v16  ;;  %v5994_v4 = vld [vmem:[#allocation4 + $0x48] ss:$2 sm:$0x3f]  ;;  %v6104_v52 = vld [vmem:[#allocation4 + $0x49] ss:$2 sm:$0x3f] }
 0x763   :  { %v5997_v6 = vpack.c.bf16 %v5994_v4, %v5994_v4  ;;  %v6107_v28 = vpack.c.bf16 %v6104_v52, %v6104_v52  ;;  %v6214_v23 = vld [vmem:[#allocation4 + $0x4a] ss:$2 sm:$0x3f] }
 0x764   :  { %9043 = vmatmul.mubr.msk.bf16.gmra.mrb[200].mxu1 %vm1652_vm6, %v5803_v53  ;;  %9063 = vmatmul.mubr.msk.bf16.gmra.mrb[180].mxu0 %vm1652_vm6, %v5787_v8  ;;  %v6217_v14 = vpack.c.bf16 %v6214_v23, %v6214_v23 }
 0x765   :  { %9074 = vmatprep.mubr.msk.bf16.mxu1 %vm9650_vm5, %v9649_v1  ;;  %9094 = vmatprep.mubr.msk.bf16.mxu0 %vm9650_vm5, %v9649_v1 }
 0x76c   :  { %9075 = vmatmul.mubr.msk.bf16.vlgmr.msra.gmra.mrb[204].mxu1 %vm1652_vm6, %v5995_v58  ;;  %9095 = vmatmul.mubr.msk.bf16.vlgmr.msra.gmra.mrb[184].mxu0 %vm1652_vm6, %v6105_v60 }
 0x76d   :  { %9107 = vmatpush3.bf16.msra.mxu1 %v9539_v33  ;;  %9078 = vmatprep.mubr.msk.bf16.mxu1 %vm9650_vm5, %v9649_v1 }
 0x76e   :  { %9108 = vmatprep.subr.bf16.mxu1 %v9649_v1  ;;  %9098 = vmatprep.mubr.msk.bf16.mxu0 %vm9650_vm5, %v9649_v1 }
 0x76f   :  { %6465 = vmatpush1.bf16.msra.mxu0 %v9543_v20 }
 0x770   :  { %6466 = vmatprep.subr.bf16.mxu0 %v9548_v62 }
 0x771   :  { %9109 = vmatpush3.bf16.msra.mxu1 %v9540_v61 }
 0x772   :  { %9110 = vmatprep.subr.bf16.mxu1 %v9649_v1 }
 0x773   :  { %6467 = vmatpush1.bf16.msra.mxu0 %v9546_v50 }
 0x774   :  { %9079 = vmatmul.mubr.msk.bf16.gmra.mrb[208].mxu1 %vm1652_vm6, %v5996_v21  ;;  %9099 = vmatmul.mubr.msk.bf16.gmra.mrb[188].mxu0 %vm1652_vm6, %v6106_v2 }
 0x775   :  { %9111 = vmatpush3.bf16.msra.mxu1 %v9541_v15  ;;  %9082 = vmatprep.mubr.msk.bf16.mxu1 %vm9650_vm5, %v9649_v1 }
 0x776   :  { %9102 = vmatprep.mubr.msk.bf16.mxu0 %vm9650_vm5, %v9649_v1  ;;  %9112 = vmatprep.subr.bf16.mxu1 %v9649_v1 }
 0x777   :  { %6468 = vmatprep.subr.bf16.mxu0 %v9551_v45 }
 0x778   :  { %6469 = vmatpush1.bf16.msra.mxu0 %v9549_v10 }
 0x779   :  { %9113 = vmatpush3.bf16.msra.mxu1 %v9542_v51  ;;  %6470 = vmatprep.subr.bf16.mxu0 %v9554_v48 }
 0x77c   :  { %9083 = vmatmul.mubr.msk.bf16.gmra.mrb[212].mxu1 %vm1652_vm6, %v5997_v6  ;;  %9103 = vmatmul.mubr.msk.bf16.gmra.mrb[192].mxu0 %vm1652_vm6, %v6107_v28 }
 0x77d   :  { %9114 = vmatprep.mubr.msk.bf16.mxu1 %vm9650_vm5, %v9649_v1  ;;  %6496 = vmatprep.mubr.bf16.mxu0 %v9651_v57 }
 0x77e   :  { %6471 = vmatpush1.bf16.msra.mxu0 %v9552_v29 }
 0x77f   :  { %6472 = vmatprep.subr.bf16.mxu0 %v9557_v31 }
 0x782   :  { %6473 = vmatpush1.bf16.msra.mxu0 %v9555_v32 }
 0x783   :  { %6474 = vmatprep.subr.bf16.mxu0 %v9560_v5 }
 0x784   :  { %9115 = vmatmul.mubr.msk.bf16.vlgmr.msra.gmra.mrb[216].mxu1 %vm1652_vm6, %v6215_v39 }
 0x785   :  { %9118 = vmatprep.mubr.msk.bf16.mxu1 %vm9650_vm5, %v9649_v1 }
 0x786   :  { %6475 = vmatpush1.bf16.msra.mxu0 %v9558_v35 }
 0x787   :  { %6476 = vmatprep.subr.bf16.mxu0 %v9563_v37 }
 0x78a   :  { %6477 = vmatpush1.bf16.msra.mxu0 %v9561_v38 }
 0x78b   :  { %6478 = vmatprep.subr.bf16.mxu0 %v9566_v40 }
 0x78c   :  { %9119 = vmatmul.mubr.msk.bf16.gmra.mrb[220].mxu1 %vm1652_vm6, %v6216_v22 }
 0x78d   :  { %9122 = vmatprep.mubr.msk.bf16.mxu1 %vm9650_vm5, %v9649_v1 }
 0x78e   :  { %6479 = vmatpush1.bf16.msra.mxu0 %v9564_v27 }
 0x78f   :  { %6595 = vmatprep.subr.bf16.mxu0 %v9569_v41 }
 0x794   :  { %9123 = vmatmul.mubr.msk.bf16.gmra.mrb[224].mxu1 %vm1652_vm6, %v6217_v14 }
 0x81f   :  { %v5879_v3 = vpop.f32.mrb[192].mxu1  ;;  %v5968_v30 = vpop.f32.mrb[172].mxu0 }
 0x820   :  { %v5969_v42 = vadd.f32 %v5968_v30, %v5879_v3  ;;  %v9036_v43 = vpop.f32.mrb[193].mxu1  ;;  %v9056_v47 = vpop.f32.mrb[173].mxu0 }
 0x821   :  { %v5882_v49 = vpop.f32.mrb[194].mxu1  ;;  %v5971_v59 = vpop.f32.mrb[174].mxu0 }
 0x822   :  { %v5972_v7 = vadd.f32 %v5971_v59, %v5882_v49  ;;  %v9037_v12 = vpop.f32.mrb[195].mxu1  ;;  %v9057_v16 = vpop.f32.mrb[175].mxu0 }
 0x82f   :  { %v5887_v53 = vpop.f32.mrb[196].mxu1  ;;  %v5976_v8 = vpop.f32.mrb[176].mxu0 }
 0x830   :  { %v5977_v54 = vadd.f32 %v5976_v8, %v5887_v53  ;;  %v9040_v55 = vpop.f32.mrb[197].mxu1  ;;  %v9060_v44 = vpop.f32.mrb[177].mxu0 }
 0x831   :  { %v5890_v56 = vpop.f32.mrb[198].mxu1  ;;  %v5979_v33 = vpop.f32.mrb[178].mxu0 }
 0x832   :  { %v5980_v58 = vadd.f32 %v5979_v33, %v5890_v56  ;;  %v9041_v60 = vpop.f32.mrb[199].mxu1  ;;  %v9061_v61 = vpop.f32.mrb[179].mxu0 }
 0x837   :  { %v5895_v63 = vpop.f32.mrb[200].mxu1  ;;  %v5984_v46 = vpop.f32.mrb[180].mxu0 }
 0x838   :  { %v5985_v0 = vadd.f32 %v5984_v46, %v5895_v63  ;;  %v9044_v11 = vpop.f32.mrb[201].mxu1  ;;  %v9064_v15 = vpop.f32.mrb[181].mxu0 }
 0x839   :  { %v5898_v21 = vpop.f32.mrb[202].mxu1  ;;  %v5987_v2 = vpop.f32.mrb[182].mxu0 }
 0x83a   :  { %v9045_v51 = vpop.f32.mrb[203].mxu1  ;;  %v9065_v4 = vpop.f32.mrb[183].mxu0 }
 0x83f   :  { %v6073_v52 = vpop.f32.mrb[204].mxu1  ;;  %v6183_v6 = vpop.f32.mrb[184].mxu0 }
 0x840   :  { %v6095_v28 = vadd.f32 %v6073_v52, %v5969_v42  ;;  %v9076_v13 = vpop.f32.mrb[205].mxu1  ;;  %v9096_v34 = vpop.f32.mrb[185].mxu0 }
 0x841   :  { %v6076_v39 = vpop.f32.mrb[206].mxu1  ;;  %v6186_v18 = vpop.f32.mrb[186].mxu0 }
 0x842   :  { %v6205_v19 = vadd.f32 %v6183_v6, %v6095_v28  ;;  %v6096_v22 = vadd.f32 %v6076_v39, %v5972_v7  ;;  %v9077_v23 = vpop.f32.mrb[207].mxu1  ;;  %v9097_v14 = vpop.f32.mrb[187].mxu0  ;;  %v7867_v7 = vld [vmem:[%s11532_s6] ss:$0 sm:$0xff] }
 0x843   :  { %v9567_v39 = vld [vmem:[%s11531_s7] ss:$8 sps:$4 sm:$0xff]   ;;  %v9572_v23 = vld [vmem:[%s11531_s7 + $0x14] ss:$8 sps:$4 sm:$0xff]   ;;  %v9570_v14 = vld [vmem:[%s11531_s7 + $0x10] ss:$8 sps:$4 sm:$0xff]  }
 0x844   :  { %v6206_v20 = vadd.f32 %v6186_v18, %v6096_v22 }
 0x847   :  { %v6081_v25 = vpop.f32.mrb[208].mxu1  ;;  %v6191_v62 = vpop.f32.mrb[188].mxu0 }
 0x848   :  { %v6097_v50 = vadd.f32 %v6081_v25, %v5977_v54  ;;  %v9080_v45 = vpop.f32.mrb[209].mxu1  ;;  %v9100_v10 = vpop.f32.mrb[189].mxu0 }
 0x849   :  { %v6084_v48 = vpop.f32.mrb[210].mxu1  ;;  %v6194_v29 = vpop.f32.mrb[190].mxu0  ;;  %v9578_v45 = vld [vmem:[%s11531_s7 + $0x34] ss:$8 sps:$4 sm:$0xff]   ;;  %v9576_v10 = vld [vmem:[%s11531_s7 + $0x30] ss:$8 sps:$4 sm:$0xff]  }
 0x84a   :  { %v6207_v31 = vadd.f32 %v6191_v62, %v6097_v50  ;;  %v6098_v32 = vadd.f32 %v6084_v48, %v5980_v58  ;;  %v9081_v5 = vpop.f32.mrb[211].mxu1  ;;  %v9101_v35 = vpop.f32.mrb[191].mxu0  ;;  %v9573_v62 = vld [vmem:[%s11531_s7 + $0x20] ss:$8 sps:$4 sm:$0xff]   ;;  %v9581_v48 = vld [vmem:[%s11531_s7 + $0x44] ss:$8 sps:$4 sm:$0xff]  }
 0x84b   :  { %v9587_v5 = vld [vmem:[%s11531_s7 + $0x64] ss:$8 sps:$4 sm:$0xff]   ;;  %v9585_v35 = vld [vmem:[%s11531_s7 + $0x60] ss:$8 sps:$4 sm:$0xff]  }
 0x84c   :  { %v6208_v37 = vadd.f32 %v6194_v29, %v6098_v32  ;;  %v9579_v29 = vld [vmem:[%s11531_s7 + $0x40] ss:$8 sps:$4 sm:$0xff]   ;;  %v9582_v32 = vld [vmem:[%s11531_s7 + $0x50] ss:$8 sps:$4 sm:$0xff]  }
 0x84f   :  { %v6089_v38 = vpop.f32.mrb[212].mxu1  ;;  %v6199_v27 = vpop.f32.mrb[192].mxu0 }
 0x850   :  { %v6099_v40 = vadd.f32 %v6089_v38, %v5985_v0  ;;  %v9084_v41 = vpop.f32.mrb[213].mxu1  ;;  %v9104_v3 = vpop.f32.mrb[193].mxu0  ;;  %v9588_v38 = vld [vmem:[%s11531_s7 + $0x70] ss:$8 sps:$4 sm:$0xff]  }
 0x851   :  { %v6092_v30 = vpop.f32.mrb[214].mxu1  ;;  %v6202_v42 = vpop.f32.mrb[194].mxu0  ;;  %v9591_v3 = vld [vmem:[%s11531_s7 + $0x100] ss:$8 sps:$4 sm:$0xff]  }
 0x852   :  { %v6209_v43 = vadd.f32 %v6199_v27, %v6099_v40  ;;  %v9085_v47 = vpop.f32.mrb[215].mxu1  ;;  %v9105_v49 = vpop.f32.mrb[195].mxu0  ;;  %v9593_v27 = vld [vmem:[%s11531_s7 + $0x104] ss:$8 sps:$4 sm:$0xff]   ;;  %v9596_v42 = vld [vmem:[%s11531_s7 + $0x114] ss:$8 sps:$4 sm:$0xff]  }
 0x853   :  { %v9599_v47 = vld [vmem:[%s11531_s7 + $0x124] ss:$8 sps:$4 sm:$0xff]  }
 0x857   :  { %v6293_v59 = vpop.f32.mrb[216].mxu1 }
 0x858   :  { %v6315_v12 = vadd.f32 %v6293_v59, %v6205_v19  ;;  %v9116_v16 = vpop.f32.mrb[217].mxu1  ;;  %v9597_v59 = vld [vmem:[%s11531_s7 + $0x120] ss:$8 sps:$4 sm:$0xff]  }
 0x859   :  { %v6296_v53 = vpop.f32.mrb[218].mxu1  ;;  %v9600_v16 = vld [vmem:[%s11531_s7 + $0x130] ss:$8 sps:$4 sm:$0xff]  }
 0x85a   :  { %v6327_v8 = vadd.f32 %v7867_v7, %v6315_v12  ;;  %v6316_v54 = vadd.f32 %v6296_v53, %v6206_v20  ;;  %v9117_v55 = vpop.f32.mrb[219].mxu1  ;;  %v9575_v20 = vld [vmem:[%s11531_s7 + $0x24] ss:$8 sps:$4 sm:$0xff]   ;;  %v9602_v12 = vld [vmem:[%s11531_s7 + $0x134] ss:$8 sps:$4 sm:$0xff]  }
 0x85b   :  { %v9605_v53 = vld [vmem:[%s11531_s7 + $0x144] ss:$8 sps:$4 sm:$0xff]   ;;  %v9606_v55 = vld [vmem:[%s11531_s7 + $0x150] ss:$8 sps:$4 sm:$0xff]  }
 0x85c   :  { %v6332_v44 = vmax.f32 %v6327_v8, 0.0  ;;  %v6328_v56 = vadd.f32 %v7867_v7, %v6316_v54  ;;  %v9603_v8 = vld [vmem:[%s11531_s7 + $0x140] ss:$8 sps:$4 sm:$0xff]   ;;  %v9608_v54 = vld [vmem:[%s11531_s7 + $0x154] ss:$8 sps:$4 sm:$0xff]  }
 0x85e   :  { %6337 = vst [vmem:[#allocation5 + $0x8] sm:$0xff] %v6332_v44  ;;  %v6333_v33 = vmax.f32 %v6328_v56, 0.0  ;;  %v9611_v44 = vld [vmem:[%s11531_s7 + $0x164] ss:$8 sps:$4 sm:$0xff]   ;;  %v9609_v56 = vld [vmem:[%s11531_s7 + $0x160] ss:$8 sps:$4 sm:$0xff]  }
 0x85f   :  { %v6301_v58 = vpop.f32.mrb[220].mxu1 }
 0x860   :  { %6338 = vst [vmem:[#allocation5 + $0x10] sm:$0xff] %v6333_v33  ;;  %v6317_v60 = vadd.f32 %v6301_v58, %v6207_v31  ;;  %v9120_v61 = vpop.f32.mrb[221].mxu1  ;;  %v9584_v31 = vld [vmem:[%s11531_s7 + $0x54] ss:$8 sps:$4 sm:$0xff]   ;;  %v9612_v58 = vld [vmem:[%s11531_s7 + $0x170] ss:$8 sps:$4 sm:$0xff]  }
 0x861   :  { %v6304_v63 = vpop.f32.mrb[222].mxu1  ;;  %v9614_v33 = vld [vmem:[%s11531_s7 + $0x174] ss:$8 sps:$4 sm:$0xff]  }
 0x862   :  { %v6329_v46 = vadd.f32 %v7867_v7, %v6317_v60  ;;  %v6318_v0 = vadd.f32 %v6304_v63, %v6208_v37  ;;  %v9121_v11 = vpop.f32.mrb[223].mxu1  ;;  %v9590_v37 = vld [vmem:[%s11531_s7 + $0x74] ss:$8 sps:$4 sm:$0xff]  }
 0x863   :  { %v9615_v11 = vld [vmem:[%s11534_s9 + $0x40] sm:$0xff]  }
 0x864   :  { %v6334_v15 = vmax.f32 %v6329_v46, 0.0  ;;  %v6330_v21 = vadd.f32 %v7867_v7, %v6318_v0  ;;  %8299 = vmatprep.subr.bf16.mxu1 %v9615_v11 }
 0x866   :  { %6339 = vst [vmem:[#allocation5 + $0x18] sm:$0xff] %v6334_v15  ;;  %v6335_v2 = vmax.f32 %v6330_v21, 0.0  ;;  %v9616_v15 = vld [vmem:[%s11534_s9] sm:$0xff]   ;;  %v9617_v21 = vld [vmem:[%s11534_s9 + $0x48] sm:$0xff]  }
 0x867   :  { %v6309_v51 = vpop.f32.mrb[224].mxu1  ;;  %v6363_v18 = vld [vmem:[#allocation5 + $0x8] ss:$2 sm:$0xff]  ;;  %v6342_v41 = vld [vmem:[#allocation5 + $0x7] ss:$2 sm:$0xff]  ;;  %8300 = vmatpush3.bf16.msra.mxu1 %v9616_v15 }
 0x868   :  { %6340 = vst [vmem:[#allocation5 + $0x20] sm:$0xff] %v6335_v2  ;;  %v6319_v4 = vadd.f32 %v6309_v51, %v6209_v43  ;;  %v9124_v52 = vpop.f32.mrb[225].mxu1  ;;  %v9594_v43 = vld [vmem:[%s11531_s7 + $0x110] ss:$8 sps:$4 sm:$0xff]   ;;  %8301 = vmatprep.subr.bf16.mxu1 %v9617_v21 }
 0x869   :  { %v6312_v6 = vpop.f32.mrb[226].mxu1  ;;  %v6646_v61 = vld [vmem:[#allocation5 + $0x9] ss:$2 sm:$0xff] }
 0x86a   :  { %v6331_v28 = vadd.f32 %v7867_v7, %v6319_v4  ;;  %v9125_v13 = vpop.f32.mrb[227].mxu1  ;;  %v9619_v2 = vld [vmem:[%s11534_s9 + $0x50] sm:$0xff]   ;;  %v9621_v4 = vld [vmem:[%s11534_s9 + $0x58] sm:$0xff]   ;;  %v9623_v6 = vld [vmem:[%s11534_s9 + $0x60] sm:$0xff]  }
 0x86b   :  { %v9620_v51 = vld [vmem:[%s11534_s9 + $0x10] sm:$0xff]   ;;  %v9622_v52 = vld [vmem:[%s11534_s9 + $0x18] sm:$0xff]   ;;  %v9625_v13 = vld [vmem:[%s11534_s9 + $0x68] sm:$0xff]  }
 0x86c   :  { %v6336_v34 = vmax.f32 %v6331_v28, 0.0  ;;  %v9624_v28 = vld [vmem:[%s11534_s9 + $0x20] sm:$0xff]  }
 0x86e   :  { %6341 = vst [vmem:[#allocation5 + $0x28] sm:$0x3f] %v6336_v34  ;;  %v9626_v34 = vld [vmem:[%s11534_s9 + $0x28] sm:$0xff]  }
 0x86f   :  { %v6364_v19 = vld [vmem:[#allocation5 + $0x18] ss:$2 sm:$0xff]  ;;  %v6343_v40 = vld [vmem:[#allocation5 + $0x17] ss:$2 sm:$0xff] }
 0x870   :  { %v6366_v22 = vpack.c.bf16 %v6364_v19, %v6363_v18  ;;  %v6345_v30 = vpack.c.bf16 %v6343_v40, %v6342_v41  ;;  %v6647_v60 = vld [vmem:[#allocation5 + $0x19] ss:$2 sm:$0xff]  ;;  %v9628_v18 = vld [vmem:[%s11534_s9 + $0x30] sm:$0xff]   ;;  %v9629_v19 = vld [vmem:[%s11534_s9 + $0x78] sm:$0xff]  }
 0x871   :  { %v6649_v63 = vpack.c.bf16 %v6647_v60, %v6646_v61 }
 0x872   :  { %6497 = vmatmul.mubr.bf16.vlgmr.msra.gmra.mrb[196].mxu0 %v6366_v22  ;;  %v9630_v22 = vld [vmem:[%s11534_s9 + $0x38] sm:$0xff]  }
 0x873   :  { %6596 = vmatpush1.bf16.msra.mxu0 %v9567_v39  ;;  %6506 = vmatprep.mubr.bf16.mxu0 %v9651_v57  ;;  %v9627_v39 = vld [vmem:[%s11534_s9 + $0x70] sm:$0xff]  }
 0x874   :  { %6597 = vmatprep.subr.bf16.mxu0 %v9572_v23 }
 0x875   :  { %v6365_v25 = vld [vmem:[#allocation5 + $0x28] ss:$2 sm:$0x7]  ;;  %v6344_v49 = vld [vmem:[#allocation5 + $0x27] ss:$2 sm:$0x7] }
 0x876   :  { %v6367_v50 = vpack.c.bf16 %v6365_v25, %v6365_v25  ;;  %v6346_v7 = vpack.c.bf16 %v6344_v49, %v6344_v49  ;;  %v6648_v46 = vld [vmem:[#allocation5 + $0x29] ss:$2 sm:$0x7] }
 0x877   :  { %6598 = vmatpush1.bf16.msra.mxu0 %v9570_v14  ;;  %v6650_v0 = vpack.c.bf16 %v6648_v46, %v6648_v46 }
 0x878   :  { %6599 = vmatprep.subr.bf16.mxu0 %v9575_v20 }
 0x87a   :  { %6507 = vmatmul.mubr.bf16.gmra.mrb[200].mxu0 %v6367_v50 }
 0x87b   :  { %6600 = vmatpush1.bf16.msra.mxu0 %v9573_v62  ;;  %6627 = vmatprep.mubr.bf16.mxu0 %v9651_v57 }
 0x87c   :  { %6601 = vmatprep.subr.bf16.mxu0 %v9578_v45 }
 0x87f   :  { %6602 = vmatpush1.bf16.msra.mxu0 %v9576_v10 }
 0x880   :  { %6603 = vmatprep.subr.bf16.mxu0 %v9581_v48 }
 0x883   :  { %6604 = vmatpush1.bf16.msra.mxu0 %v9579_v29 }
 0x884   :  { %6605 = vmatprep.subr.bf16.mxu0 %v9584_v31  ;;  %v6804_v31 = vld [vmem:[%s11533_s8] sm:$0x3] }
 0x887   :  { %6606 = vmatpush1.bf16.msra.mxu0 %v9582_v32  ;;  %v6809_v32 = vrot.slane %v6804_v31, %v3538_v24 }
 0x888   :  { %6607 = vmatprep.subr.bf16.mxu0 %v9587_v5  ;;  %v6813_v5 = vrot.slane %v6804_v31, %v3542_v26  ;;  %v9635_v31 = vld [vmem:[%s11535_s11 + $0x20] sm:$0xff]  }
 0x88b   :  { %6608 = vmatpush1.bf16.msra.mxu0 %v9585_v35 }
 0x88c   :  { %6609 = vmatprep.subr.bf16.mxu0 %v9590_v37 }
 0x88f   :  { %6610 = vmatpush1.bf16.msra.mxu0 %v9588_v38 }
 0x890   :  { %6747 = vmatprep.subr.bf16.mxu0 %v9593_v27 }
 0x892   :  { %6628 = vmatmul.mubr.bf16.vlgmr.msra.gmra.mrb[196].mxu0 %v6345_v30 }
 0x893   :  { %6748 = vmatpush1.bf16.msra.mxu0 %v9591_v3  ;;  %6637 = vmatprep.mubr.bf16.mxu0 %v9651_v57 }
 0x894   :  { %6749 = vmatprep.subr.bf16.mxu0 %v9596_v42 }
 0x897   :  { %6750 = vmatpush1.bf16.msra.mxu0 %v9594_v43 }
 0x898   :  { %6751 = vmatprep.subr.bf16.mxu0 %v9599_v47 }
 0x89a   :  { %6638 = vmatmul.mubr.bf16.gmra.mrb[204].mxu0 %v6346_v7  ;;  %v3562_v7 = vrot.slane %v10970_v36, 4 }
 0x89b   :  { %6752 = vmatpush1.bf16.msra.mxu0 %v9597_v59  ;;  %6779 = vmatprep.mubr.bf16.mxu0 %v9651_v57 }
 0x89c   :  { %6753 = vmatprep.subr.bf16.mxu0 %v9602_v12 }
 0x89f   :  { %6754 = vmatpush1.bf16.msra.mxu0 %v9600_v16 }
 0x8a0   :  { %6755 = vmatprep.subr.bf16.mxu0 %v9605_v53 }
 0x8a3   :  { %6756 = vmatpush1.bf16.msra.mxu0 %v9603_v8 }
 0x8a4   :  { %6757 = vmatprep.subr.bf16.mxu0 %v9608_v54 }
 0x8a7   :  { %6758 = vmatpush1.bf16.msra.mxu0 %v9606_v55 }
 0x8a8   :  { %6759 = vmatprep.subr.bf16.mxu0 %v9611_v44  ;;  %v3563_v44 = vadd.f32 %v3562_v7, %v10970_v36  ;;  %v9642_v7 = vld [vmem:[%s11536_s13 + $0x18] sm:$0xff]  }
 0x8ab   :  { %6760 = vmatpush1.bf16.msra.mxu0 %v9609_v56 }
 0x8ac   :  { %6761 = vmatprep.subr.bf16.mxu0 %v9614_v33  ;;  %v3572_v33 = vadd.f32 %v3571_v17, %v10973_v9 }
 0x8ae   :  { %v3573_v11 = vrot.slane %v3572_v33, 2 }
 0x8af   :  { %6762 = vmatpush1.bf16.msra.mxu0 %v9612_v58 }
 0x8b2   :  { %6780 = vmatmul.mubr.bf16.vlgmr.msra.gmra.mrb[196].mxu0 %v6649_v63  ;;  %v3564_v63 = vrot.slane %v3563_v44, 2 }
 0x8b3   :  { %6789 = vmatprep.mubr.bf16.mxu0 %v9651_v57  ;;  %v9618_v57 = vld [vmem:[%s11534_s9 + $0x8] sm:$0xff]  }
 0x8b4   :  { %8302 = vmatpush3.bf16.msra.mxu1 %v9618_v57 }
 0x8b5   :  { %8303 = vmatprep.subr.bf16.mxu1 %v9619_v2  ;;  %v3565_v2 = vadd.f32 %v3564_v63, %v3563_v44  ;;  %v9644_v44 = vld [vmem:[%s11538_s15 + $0x8] sm:$0xff]  }
 0x8b8   :  { %8304 = vmatpush3.bf16.msra.mxu1 %v9620_v51 }
 0x8b9   :  { %8305 = vmatprep.subr.bf16.mxu1 %v9621_v4  ;;  %v3574_v4 = vadd.f32 %v3573_v11, %v3572_v33  ;;  %v7974_v33 = vld [vmem:[%s11541_s14] ss:$0 sm:$0xff] }
 0x8ba   :  { %6790 = vmatmul.mubr.bf16.gmra.mrb[208].mxu0 %v6650_v0 }
 0x8bc   :  { %8306 = vmatpush3.bf16.msra.mxu1 %v9622_v52 }
 0x8bd   :  { %8307 = vmatprep.subr.bf16.mxu1 %v9623_v6 }
 0x8c0   :  { %8308 = vmatpush3.bf16.msra.mxu1 %v9624_v28  ;;  %v3566_v28 = vrot.slane %v3565_v2, 1 }
 0x8c1   :  { %8309 = vmatprep.subr.bf16.mxu1 %v9625_v13 }
 0x8c4   :  { %8310 = vmatpush3.bf16.msra.mxu1 %v9626_v34  ;;  %v3575_v34 = vrot.slane %v3574_v4, 1 }
 0x8c5   :  { %8311 = vmatprep.subr.bf16.mxu1 %v9627_v39 }
 0x8c8   :  { %8312 = vmatpush3.bf16.msra.mxu1 %v9628_v18 }
 0x8c9   :  { %8313 = vmatprep.subr.bf16.mxu1 %v9629_v19  ;;  %v3567_v19 = vadd.f32 %v3566_v28, %v3565_v2 }
 0x8cc   :  { %8314 = vmatpush3.bf16.msra.mxu1 %v9630_v22 }
 0x8cd   :  { %9126 = vmatprep.subr.bf16.mxu1 %v9649_v1 }
 0x94d   :  { %v6508_v23 = vpop.f32.mrb[200].mxu0 }
 0x94e   :  { %v6510_v14 = vpop.f32.mrb[201].mxu0 }
 0x94f   :  { %v6512_v20 = vpop.f32.mrb[202].mxu0 }
 0x950   :  { %v6513_v25 = vpop.f32.mrb[203].mxu0 }
 0x96d   :  { %v6639_v62 = vpop.f32.mrb[204].mxu0 }
 0x96e   :  { %v6640_v50 = vadd.f32 %v6639_v62, %v6508_v23  ;;  %v6641_v45 = vpop.f32.mrb[205].mxu0  ;;  %v3576_v23 = vadd.f32 %v3575_v34, %v3574_v4 }
 0x96f   :  { %v6642_v10 = vadd.f32 %v6641_v45, %v6510_v14  ;;  %v6643_v48 = vpop.f32.mrb[206].mxu0 }
 0x970   :  { %v6644_v29 = vpop.f32.mrb[207].mxu0  ;;  %v9633_v48 = vld [vmem:[%s11535_s11 + $0x10] sm:$0xff]  }
 0x971   :  { %v9634_v29 = vld [vmem:[%s11535_s11 + $0x18] sm:$0xff]  }
 0x985   :  { %v6781_v35 = vpop.f32.mrb[196].mxu0 }
 0x986   :  { %v6816_v37 = vadd.f32 %v6809_v32, %v6781_v35  ;;  %v6783_v38 = vpop.f32.mrb[197].mxu0  ;;  %v9638_v35 = vld [vmem:[%s11535_s11 + $0x38] sm:$0xff]  }
 0x987   :  { %v6817_v27 = vadd.f32 %v6813_v5, %v6783_v38  ;;  %v6785_v40 = vpop.f32.mrb[198].mxu0  ;;  %v7948_v38 = vld [vmem:[%s11537_s10] ss:$0 sm:$0xff] }
 0x988   :  { %v6818_v41 = vadd.f32 %v6809_v32, %v6785_v40  ;;  %v6787_v3 = vpop.f32.mrb[199].mxu0  ;;  %v6822_v42 = vmax.f32 %v6816_v37, 0.0 }
 0x989   :  { %v6819_v30 = vadd.f32 %v6813_v5, %v6787_v3  ;;  %v6823_v47 = vmax.f32 %v6817_v27, 0.0 }
 0x98a   :  { %v6824_v43 = vmax.f32 %v6818_v41, 0.0 }
 0x98b   :  { %v6825_v49 = vmax.f32 %v6819_v30, 0.0 }
 0x98c   :  { %v6828_v59 = vadd.f32 %v6824_v43, %v6822_v42  ;;  %v9639_v43 = vld [vmem:[%s11536_s13] sm:$0xff]  }
 0x98d   :  { %v6837_v12 = vadd.f32 %v6825_v49, %v6823_v47  ;;  %v6791_v24 = vpop.f32.mrb[208].mxu0  ;;  %v9640_v49 = vld [vmem:[%s11536_s13 + $0x8] sm:$0xff]  }
 0x98e   :  { %v6802_v26 = vadd.f32 %v6791_v24, %v6640_v50  ;;  %v6793_v16 = vpop.f32.mrb[209].mxu0  ;;  %v9631_v50 = vld [vmem:[%s11535_s11] sm:$0xff]  }
 0x98f   :  { %v6803_v53 = vadd.f32 %v6793_v16, %v6642_v10  ;;  %v6795_v8 = vpop.f32.mrb[210].mxu0  ;;  %v9632_v10 = vld [vmem:[%s11535_s11 + $0x8] sm:$0xff]  }
 0x990   :  { %v6820_v54 = vadd.f32 %v6809_v32, %v6802_v26  ;;  %v6796_v55 = vpop.f32.mrb[211].mxu0  ;;  %v9636_v32 = vld [vmem:[%s11535_s11 + $0x28] sm:$0xff]  }
 0x991   :  { %v6821_v56 = vadd.f32 %v6813_v5, %v6803_v53  ;;  %v9637_v5 = vld [vmem:[%s11535_s11 + $0x30] sm:$0xff]  }
 0x992   :  { %v6826_v58 = vmax.f32 %v6820_v54, 0.0  ;;  %v9643_v54 = vld [vmem:[%s11538_s15] sm:$0xff]  }
 0x993   :  { %v6827_v60 = vmax.f32 %v6821_v56, 0.0  ;;  %v22_v56 = vstv %s11540_s16 }
 0x994   :  { %v6829_v61 = vsel %vm3559_vm9, %v6826_v58, 0.0  ;;  %23 = vst [vmem:[#allocation6] sm:$0x1] %v22_v56 }
 0x995   :  { %v6830_v46 = vadd.f32 %v6829_v61, %v6828_v59  ;;  %v6838_v0 = vsel %vm3559_vm9, %v6827_v60, 0.0  ;;  %v9641_v59 = vld [vmem:[%s11536_s13 + $0x10] sm:$0xff]  }
 0x996   :  { %v6839_v15 = vadd.f32 %v6838_v0, %v6837_v12  ;;  %v7965_v12 = vld [vmem:[%s11539_s12] ss:$0 sm:$0xff] }
 0x997   :  { %v6831_v21 = vrot.slane %v6830_v46, 4 }
 0x998   :  { %v6840_v57 = vrot.slane %v6839_v15, 4 }
 0x999   :  { %v6832_v51 = vadd.f32 %v6831_v21, %v6830_v46 }
 0x99a   :  { %v6841_v52 = vadd.f32 %v6840_v57, %v6839_v15 }
 0x99b   :  { %v6833_v36 = vrot.slane %v6832_v51, 2  ;;  %v7980_v11 = vld [vmem:[#allocation6] ss:$0 sm:$0xff] }
 0x99c   :  { %v6842_v6 = vrot.slane %v6841_v52, 2 }
 0x99d   :  { %v6834_v9 = vadd.f32 %v6833_v36, %v6832_v51 }
 0x99e   :  { %v6843_v13 = vadd.f32 %v6842_v6, %v6841_v52 }
 0x99f   :  { %v6835_v39 = vrot.slane %v6834_v9, 1 }
 0x9a0   :  { %v6844_v18 = vrot.slane %v6843_v13, 1 }
 0x9a1   :  { %v6836_v22 = vadd.f32 %v6835_v39, %v6834_v9 }
 0x9a2   :  { %v6845_v14 = vadd.f32 %v6844_v18, %v6843_v13 }
 0x9a3   :  { %v6847_v20 = vsel %vm6846_vm10, %v3567_v19, %v6836_v22 }
 0x9a4   :  { %v6848_v25 = vsel %vm6846_vm10, %v3576_v23, %v6845_v14  ;;  %v6849_v45 = vpack.c.bf16 %v6847_v20, %v6847_v20 }
 0x9a5   :  { %v6850_v62 = vpack.c.bf16 %v6848_v25, %v6848_v25 }
 0x9a7   :  { %7018 = vmatprep.mubr.bf16.mxu1 %v6850_v62 }
 0x9a8   :  { %7019 = vmatmul.mubr.bf16.vlgmr.msra.gmra.mrb[228].mxu1 %v6849_v45 }
 0x9a9   :  { %9127 = vmatpush3.bf16.msra.mxu1 %v9631_v50  ;;  %9142 = vmatprep.mubr.msk.bf16.mxu1 %vm9650_vm5, %v9649_v1 }
 0x9aa   :  { %9128 = vmatprep.subr.bf16.mxu1 %v9649_v1 }
 0x9ad   :  { %9129 = vmatpush3.bf16.msra.mxu1 %v9632_v10 }
 0x9ae   :  { %9130 = vmatprep.subr.bf16.mxu1 %v9649_v1 }
 0x9b1   :  { %9131 = vmatpush3.bf16.msra.mxu1 %v9633_v48 }
 0x9b2   :  { %9132 = vmatprep.subr.bf16.mxu1 %v9649_v1 }
 0x9b5   :  { %9133 = vmatpush3.bf16.msra.mxu1 %v9634_v29 }
 0x9b6   :  { %9134 = vmatprep.subr.bf16.mxu1 %v9649_v1 }
 0x9b9   :  { %9135 = vmatpush3.bf16.msra.mxu1 %v9635_v31 }
 0x9ba   :  { %9136 = vmatprep.subr.bf16.mxu1 %v9649_v1 }
 0x9bd   :  { %9137 = vmatpush3.bf16.msra.mxu1 %v9636_v32 }
 0x9be   :  { %9138 = vmatprep.subr.bf16.mxu1 %v9649_v1 }
 0x9c1   :  { %9139 = vmatpush3.bf16.msra.mxu1 %v9637_v5 }
 0x9c2   :  { %9140 = vmatprep.subr.bf16.mxu1 %v9649_v1 }
 0x9c5   :  { %9141 = vmatpush3.bf16.msra.mxu1 %v9638_v35 }
 0x9c6   :  { %9146 = vmatprep.subr.bf16.mxu1 %v9649_v1 }
 0xa7b   :  { %v8315_v37 = vpop.f32.mrb[228].mxu1 }
 0xa7c   :  { %v8316_v27 = vpop.f32.mrb[229].mxu1 }
 0xa7d   :  { %v8317_v40 = vadd.f32 %v8316_v27, %v8315_v37  ;;  %v8318_v41 = vpop.f32.mrb[230].mxu1 }
 0xa7e   :  { %v8319_v3 = vpop.f32.mrb[231].mxu1 }
 0xa7f   :  { %v7021_v30 = vadd.f32 %v8317_v40, %v7948_v38 }
 0xa81   :  { %v7026_v42 = vmax.f32 %v7021_v30, 0.0 }
 0xa83   :  { %v7027_v47 = vpack.c.bf16 %v7026_v42, %v7026_v42 }
 0xa85   :  { %9143 = vmatmul.mubr.bf16.vlgmr.msra.gmra.mrb[232].mxu1 %v7027_v47 }
 0xa86   :  { %9147 = vmatpush3.bf16.msra.mxu1 %v9639_v43  ;;  %9154 = vmatprep.mubr.msk.bf16.mxu1 %vm9650_vm5, %v9649_v1 }
 0xa87   :  { %9148 = vmatprep.subr.bf16.mxu1 %v9649_v1 }
 0xa8a   :  { %9149 = vmatpush3.bf16.msra.mxu1 %v9640_v49 }
 0xa8b   :  { %9150 = vmatprep.subr.bf16.mxu1 %v9649_v1 }
 0xa8e   :  { %9151 = vmatpush3.bf16.msra.mxu1 %v9641_v59 }
 0xa8f   :  { %9152 = vmatprep.subr.bf16.mxu1 %v9649_v1 }
 0xa92   :  { %9153 = vmatpush3.bf16.msra.mxu1 %v9642_v7 }
 0xa93   :  { %9158 = vmatprep.subr.bf16.mxu1 %v9649_v1 }
 0xb58   :  { %v7133_v24 = vpop.f32.mrb[232].mxu1 }
 0xb59   :  { %v7134_v17 = vadd.f32 %v7965_v12, %v7133_v24  ;;  %v9144_v26 = vpop.f32.mrb[233].mxu1 }
 0xb5a   :  { %v7136_v16 = vpop.f32.mrb[234].mxu1 }
 0xb5b   :  { %v7139_v53 = vmax.f32 %v7134_v17, 0.0  ;;  %v9145_v8 = vpop.f32.mrb[235].mxu1 }
 0xb5d   :  { %v7140_v55 = vpack.c.bf16 %v7139_v53, %v7139_v53 }
 0xb5f   :  { %9155 = vmatmul.mubr.msk.bf16.vlgmr.msra.gmra.mrb[236].mxu1 %vm1652_vm6, %v7140_v55 }
 0xb60   :  { %9159 = vmatpush3.bf16.msra.mxu1 %v9643_v54  ;;  %9162 = vmatprep.mubr.msk.bf16.mxu1 %vm9650_vm5, %v9649_v1 }
 0xb61   :  { %9160 = vmatprep.subr.bf16.mxu1 %v9649_v1 }
 0xb64   :  { %9161 = vmatpush3.bf16.msra.mxu1 %v9644_v44 }
 0xc32   :  { %v7217_v58 = vpop.f32.mrb[236].mxu1 }
 0xc33   :  { %v7218_v60 = vadd.f32 %v7974_v33, %v7217_v58  ;;  %v9156_v61 = vpop.f32.mrb[237].mxu1 }
 0xc34   :  { %v7220_v63 = vpop.f32.mrb[238].mxu1 }
 0xc35   :  { %v7223_v46 = vmax.f32 %v7218_v60, 0.0  ;;  %v9157_v1 = vpop.f32.mrb[239].mxu1 }
 0xc37   :  { %v7224_v0 = vpack.c.bf16 %v7223_v46, %v7223_v46 }
 0xc39   :  { %9163 = vmatmul.mubr.msk.bf16.vlgmr.msra.gmra.mrb[240].mxu1 %vm7248_vm11, %v7224_v0 }
 0xd0c   :  { %v7286_v15 = vpop.f32.mrb[240].mxu1 }
 0xd0d   :  { %v7287_v21 = vadd.f32 %v7980_v11, %v7286_v15  ;;  %v9164_v57 = vpop.f32.mrb[241].mxu1 }
 0xd0e   :  { %v7289_v2 = vpop.f32.mrb[242].mxu1 }
 0xd0f   :  { %v7984_v51 = vmul.f32 -1.442695, %v7287_v21  ;;  %v9165_v4 = vpop.f32.mrb[243].mxu1 }
 0xd11   :  { %9645 = vpow2.f32 %v7984_v51 }
 0xd1b   :  { %v9646_v52 = vpop.eup %9645 }
 0xd1c   :  { %v7295_v36 = vadd.f32 1.0, %v9646_v52 }
 0xd1e   :  { %9647 = vrcp.f32 %v7295_v36 }
 0xd28   :  { %v9648_v6 = vpop.eup %9647 }
 0xd29   :  { %7299 = vst.msk [vmem:[%s11542_s17] sm:$0x3] %vm7298_vm12, %v9648_v6 }

</bundles_post_ra>
